<compile_context>
chip_gen: v6e
topology: v6e:2x2x1
jax: 0.10.0
libtpu: 0.0.40
codegen_flags: <defaults>
</compile_context>

<pallas_src>
import functools

import jax
import jax.numpy as jnp
from jax import lax
from jax.experimental import pallas as pl
from jax.experimental.pallas import tpu as pltpu

_WPAD = 8          # sublane-aligned halo padding along W inside conv scratch
_EPS = 1e-5        # InstanceNorm2d default eps


def _round_up(x, m):
    return ((x + m - 1) // m) * m


# ----------------------------------------------------------------------------
# in-kernel helpers
# ----------------------------------------------------------------------------
def _im2col_3x3(pad_ref, y, c):
    """Build the (H*W, 9*CP) im2col matrix of `y` for a 3x3 'same' conv.

    y: (H, W, c) f32 value.  pad_ref: f32 VMEM scratch (H+2, W+2*_WPAD, CP).
    Channels [c:CP] and the halo stay zero (weights are packed with matching
    zero rows).  Interior store uses row offset 1 (untiled axis), column
    offset _WPAD (sublane aligned) and lane window [0:c], so no unaligned
    masked stores are needed.  Result is bf16 (feeds the MXU)."""
    H, W, _ = y.shape
    CP = pad_ref.shape[-1]
    pad_ref[...] = jnp.zeros_like(pad_ref)
    pad_ref[1:1 + H, _WPAD:_WPAD + W, 0:c] = y
    cols = []
    for kh in range(3):
        for kw in range(3):
            o = _WPAD - 1 + kw
            cols.append(pad_ref[kh:kh + H, o:o + W, :].reshape(H * W, CP))
    # 128-aligned lane concat -> one deep-contraction matmul downstream.
    return jnp.concatenate(cols, axis=-1).astype(jnp.bfloat16)


def _instance_norm_modulate(x_ref, gamma_ref, beta_ref, leaky):
    """InstanceNorm (single-pass stats) + SPADE modulation (+ LeakyReLU 0.2)."""
    _, H, W, C = x_ref.shape
    HW = H * W
    x = x_ref[0].astype(jnp.float32).reshape(HW, C)
    inv_hw = 1.0 / float(HW)
    mean = jnp.sum(x, axis=0, keepdims=True) * inv_hw
    var = jnp.sum(x * x, axis=0, keepdims=True) * inv_hw - mean * mean
    xn = (x - mean) * lax.rsqrt(jnp.maximum(var, 0.0) + _EPS)
    gamma = gamma_ref[0].astype(jnp.float32).reshape(HW, C)
    beta = beta_ref[0].astype(jnp.float32).reshape(HW, C)
    y = xn * (1.0 + gamma) + beta
    if leaky:
        y = jnp.where(y >= 0.0, y, 0.2 * y)          # F.leaky_relu(., 0.2)
    return y                                          # (HW, C) f32


# ----------------------------------------------------------------------------
# Pallas kernels (grid over batch; whole per-sample tiles live in VMEM)
# ----------------------------------------------------------------------------
def _spade_gb_kernel(seg_ref, wsh_ref, bsh_ref, wg_ref, wb_ref, bg_ref, bb_ref,
                     gamma_ref, beta_ref, pseg_ref, pact_ref):
    """One SPADE module's segmentation branch, fully fused:
       actv = ReLU(conv3x3(seg)); gamma = conv3x3(actv); beta = conv3x3(actv).
       actv and the im2col matrices never leave VMEM."""
    _, H, W, L = seg_ref.shape
    NH = bsh_ref.shape[-1]
    C = gamma_ref.shape[-1]

    patches = _im2col_3x3(pseg_ref, seg_ref[0].astype(jnp.float32), L)
    actv = jnp.dot(patches, wsh_ref[...], preferred_element_type=jnp.float32)
    actv = jnp.maximum(actv + bsh_ref[...].astype(jnp.float32), 0.0)  # (HW,NH)

    patches = _im2col_3x3(pact_ref, actv.reshape(H, W, NH), NH)
    gamma = jnp.dot(patches, wg_ref[...], preferred_element_type=jnp.float32)
    beta = jnp.dot(patches, wb_ref[...], preferred_element_type=jnp.float32)
    gamma = gamma + bg_ref[...].astype(jnp.float32)
    beta = beta + bb_ref[...].astype(jnp.float32)
    gamma_ref[0] = gamma.reshape(H, W, C).astype(gamma_ref.dtype)
    beta_ref[0] = beta.reshape(H, W, C).astype(beta_ref.dtype)


def _spade_conv_kernel(*refs, K, leaky, has_bias, has_res):
    """Fused: InstanceNorm + SPADE modulation (+LeakyReLU) -> KxK 'same' conv
       as one deep-contraction matmul -> (+bias) -> (+residual) -> store."""
    x_ref, gamma_ref, beta_ref, w_ref = refs[:4]
    i = 4
    b_ref = None
    r_ref = None
    if has_bias:
        b_ref = refs[i]; i += 1
    if has_res:
        r_ref = refs[i]; i += 1
    o_ref = refs[i]; i += 1
    pad_ref = refs[i] if K == 3 else None

    _, H, W, C = x_ref.shape
    Cout = o_ref.shape[-1]
    HW = H * W

    y = _instance_norm_modulate(x_ref, gamma_ref, beta_ref, leaky)  # (HW,C) f32

    if K == 1:                                    # 1x1 conv: no halo / im2col
        patches = y.astype(jnp.bfloat16)
    else:
        patches = _im2col_3x3(pad_ref, y.reshape(H, W, C), C)

    acc = jnp.dot(patches, w_ref[...], preferred_element_type=jnp.float32)
    if has_bias:
        acc = acc + b_ref[...].astype(jnp.float32)
    if has_res:
        acc = acc + r_ref[0].astype(jnp.float32).reshape(HW, Cout)
    o_ref[0] = acc.reshape(H, W, Cout).astype(o_ref.dtype)


# ----------------------------------------------------------------------------
# Pallas wrappers
# ----------------------------------------------------------------------------
def spade_gamma_beta(seg, sp):
    """Fused SPADE seg branch.  seg: (N,H,W,L) f32 -> (gamma, beta) bf16."""
    N, H, W, L = seg.shape
    NH = sp["b_sh"].shape[-1]
    C = sp["b_g"].shape[-1]
    LP = sp["w_sh"].shape[0] // 9
    NHP = sp["w_g"].shape[0] // 9
    act = lambda c: pl.BlockSpec((1, H, W, c), lambda n: (n, 0, 0, 0))
    mat = lambda a, b: pl.BlockSpec((a, b), lambda n: (0, 0))
    return pl.pallas_call(
        _spade_gb_kernel,
        out_shape=(jax.ShapeDtypeStruct((N, H, W, C), jnp.bfloat16),
                   jax.ShapeDtypeStruct((N, H, W, C), jnp.bfloat16)),
        grid=(N,),
        in_specs=[act(L),
                  mat(9 * LP, NH), mat(1, NH),
                  mat(9 * NHP, C), mat(9 * NHP, C),
                  mat(1, C), mat(1, C)],
        out_specs=(act(C), act(C)),
        scratch_shapes=[pltpu.VMEM((H + 2, W + 2 * _WPAD, LP), jnp.float32),
                        pltpu.VMEM((H + 2, W + 2 * _WPAD, NHP), jnp.float32)],
        compiler_params=pltpu.CompilerParams(dimension_semantics=("parallel",)),
    )(seg, sp["w_sh"], sp["b_sh"], sp["w_g"], sp["w_b"], sp["b_g"], sp["b_b"])


def spade_conv(x, gamma, beta, w, b=None, res=None, *, K, leaky):
    """Fused SPADE-norm (+LeakyReLU) + KxK same conv (+bias) (+residual)."""
    assert K in (1, 3)
    N, H, W, C = x.shape
    Cout = w.shape[-1]
    CP = w.shape[0] // (K * K)
    has_bias = b is not None
    has_res = res is not None
    kernel = functools.partial(_spade_conv_kernel, K=K, leaky=leaky,
                               has_bias=has_bias, has_res=has_res)
    act = lambda c: pl.BlockSpec((1, H, W, c), lambda n: (n, 0, 0, 0))
    in_specs = [act(C), act(C), act(C),
                pl.BlockSpec((K * K * CP, Cout), lambda n: (0, 0))]
    args = [x, gamma, beta, w]
    if has_bias:
        in_specs.append(pl.BlockSpec((1, Cout), lambda n: (0, 0)))
        args.append(b)
    if has_res:
        in_specs.append(act(Cout))
        args.append(res)
    scratch = []
    if K == 3:
        scratch.append(pltpu.VMEM((H + 2, W + 2 * _WPAD, CP), jnp.float32))
    return pl.pallas_call(
        kernel,
        out_shape=jax.ShapeDtypeStruct((N, H, W, Cout), x.dtype),
        grid=(N,),
        in_specs=in_specs,
        out_specs=act(Cout),
        scratch_shapes=scratch,
        compiler_params=pltpu.CompilerParams(dimension_semantics=("parallel",)),
    )(*args)


# ----------------------------------------------------------------------------
# Plain-JAX glue: weight packing, spectral norm, parameter setup
# ----------------------------------------------------------------------------
def pack_conv_weight(w, cin_pad=None):
    """HWIO (K,K,Cin,Cout) -> im2col (K*K*Cin_pad, Cout) bf16 (zero-row pad)."""
    K, _, cin, cout = w.shape
    if cin_pad is not None and cin_pad > cin:
        w = jnp.pad(w, ((0, 0), (0, 0), (0, cin_pad - cin), (0, 0)))
        cin = cin_pad
    return w.reshape(K * K * cin, cout).astype(jnp.bfloat16)


def spectral_normalize(w, key, n_iter=50):
    """W / sigma, sigma = largest singular value of W viewed as (Cout, -1)."""
    K1, K2, Cin, Cout = w.shape
    wm = w.reshape(K1 * K2 * Cin, Cout).T
    u = jax.random.normal(key, (Cout,), jnp.float32)
    u = u / (jnp.linalg.norm(u) + 1e-12)
    v = jnp.zeros((wm.shape[1],), jnp.float32)
    for _ in range(n_iter):
        v = wm.T @ u
        v = v / (jnp.linalg.norm(v) + 1e-12)
        u = wm @ v
        u = u / (jnp.linalg.norm(u) + 1e-12)
    sigma = u @ (wm @ v)
    return w / sigma


def init_params(key, fin, fout, label_nc, nhidden=128):
    fmiddle = min(fin, fout)
    learned = fin != fout
    ki = iter(list(jax.random.split(key, 32)))

    def conv_w(ks, cin, cout, scale=0.1):
        return scale * jax.random.normal(next(ki), (ks, ks, cin, cout),
                                         jnp.float32)

    def conv_b(cout, scale=0.05):
        return scale * jax.random.normal(next(ki), (cout,), jnp.float32)

    LP = _round_up(label_nc, 128)
    NHP = _round_up(nhidden, 128)

    def spade_p(cnorm):
        return dict(
            w_sh=pack_conv_weight(conv_w(3, label_nc, nhidden), LP),
            b_sh=conv_b(nhidden).reshape(1, nhidden),
            w_g=pack_conv_weight(conv_w(3, nhidden, cnorm), NHP),
            b_g=conv_b(cnorm).reshape(1, cnorm),
            w_b=pack_conv_weight(conv_w(3, nhidden, cnorm), NHP),
            b_b=conv_b(cnorm).reshape(1, cnorm),
        )

    p = dict(learned_shortcut=learned, fin=fin, fout=fout, fmiddle=fmiddle)
    p["norm_0"] = spade_p(fin)
    p["norm_1"] = spade_p(fmiddle)
    p["w_0"] = pack_conv_weight(
        spectral_normalize(conv_w(3, fin, fmiddle), next(ki)),
        _round_up(fin, 128))
    p["b_0"] = conv_b(fmiddle).reshape(1, fmiddle)
    p["w_1"] = pack_conv_weight(
        spectral_normalize(conv_w(3, fmiddle, fout), next(ki)),
        _round_up(fmiddle, 128))
    p["b_1"] = conv_b(fout).reshape(1, fout)
    if learned:
        p["norm_s"] = spade_p(fin)
        p["w_s"] = pack_conv_weight(
            spectral_normalize(conv_w(1, fin, fout), next(ki)))  # 1x1, no bias
    return p


# ----------------------------------------------------------------------------
# Forward pass
# ----------------------------------------------------------------------------
def spade_resnet_block(x_nchw, seg_nchw, params):
    """Forward pass of SPADEResnetBlock. Inputs NCHW (PyTorch), output NCHW."""
    x = jnp.transpose(x_nchw, (0, 2, 3, 1))        # -> NHWC
    seg = jnp.transpose(seg_nchw, (0, 2, 3, 1))
    N, H, W, _ = x.shape

    sh, sw = seg.shape[1], seg.shape[2]
    if (sh, sw) != (H, W):                         # F.interpolate(mode='nearest')
        ih = (jnp.arange(H) * sh) // H
        iw = (jnp.arange(W) * sw) // W
        seg = seg[:, ih][:, :, iw]

    # --- shortcut -----------------------------------------------------------
    if params["learned_shortcut"]:
        gs, bs = spade_gamma_beta(seg, params["norm_s"])
        x_s = spade_conv(x, gs, bs, params["w_s"], K=1, leaky=False)
    else:
        x_s = x

    # --- main branch (residual add fused into conv_1) ------------------------
    g0, b0 = spade_gamma_beta(seg, params["norm_0"])
    dx = spade_conv(x, g0, b0, params["w_0"], b=params["b_0"],
                    K=3, leaky=True)               # conv_0(actvn(norm_0(x)))

    g1, b1 = spade_gamma_beta(seg, params["norm_1"])
    out = spade_conv(dx, g1, b1, params["w_1"], b=params["b_1"], res=x_s,
                     K=3, leaky=True)              # x_s + conv_1(actvn(norm_1(dx)))

    return jnp.transpose(out, (0, 3, 1, 2))        # -> NCHW


# ----------------------------------------------------------------------------
if __name__ == "__main__":
    N, H, W = 2, 16, 16
    fin, fout = 4, 8          # fin != fout -> exercises learned shortcut path
    label_nc = 3              # cfg.SPADE.L_NC

    key = jax.random.PRNGKey(0)
    kx, kseg, kp = jax.random.split(key, 3)
    x = jax.random.normal(kx, (N, fin, H, W), jnp.float32)
    seg = jax.random.normal(kseg, (N, label_nc, H, W), jnp.float32)

    params = init_params(kp, fin, fout, label_nc)

    out = spade_resnet_block(x, seg, params)
    out = jax.block_until_ready(out)
    assert out.shape == (N, fout, H, W), out.shape
    assert bool(jnp.all(jnp.isfinite(out)))
    print("KERNEL_OK")
</pallas_src>

<mosaic_0001>
module attributes {stable_mosaic.version = 11 : i64} {
  func.func @_spade_gb_kernel(%arg0: i32, %arg1: memref<1x16x16x3xf32, #tpu.memory_space<vmem>>, %arg2: memref<1152x128xbf16, #tpu.memory_space<vmem>>, %arg3: memref<1x128xf32, #tpu.memory_space<vmem>>, %arg4: memref<1152x4xbf16, #tpu.memory_space<vmem>>, %arg5: memref<1152x4xbf16, #tpu.memory_space<vmem>>, %arg6: memref<1x4xf32, #tpu.memory_space<vmem>>, %arg7: memref<1x4xf32, #tpu.memory_space<vmem>>, %arg8: memref<1x16x16x4xbf16, #tpu.memory_space<vmem>>, %arg9: memref<1x16x16x4xbf16, #tpu.memory_space<vmem>>, %arg10: memref<18x32x128xf32, #tpu.memory_space<vmem>>, %arg11: memref<18x32x128xf32, #tpu.memory_space<vmem>>) attributes {dimension_semantics = [#tpu.dimension_semantics<parallel>], iteration_bounds = array<i64: 2>, scalar_prefetch = 0 : i64, scratch_operands = 2 : i64, tpu.core_type = #tpu.core_type<tc>, window_params = [{transform_indices = @transform_0, window_bounds = array<i64: 1, 16, 16, 3>}, {pipeline_mode = #tpu.pipeline_mode<synchronous>, transform_indices = @transform_1, window_bounds = array<i64: 1152, 128>}, {pipeline_mode = #tpu.pipeline_mode<synchronous>, transform_indices = @transform_2, window_bounds = array<i64: 1, 128>}, {pipeline_mode = #tpu.pipeline_mode<synchronous>, transform_indices = @transform_3, window_bounds = array<i64: 1152, 4>}, {pipeline_mode = #tpu.pipeline_mode<synchronous>, transform_indices = @transform_4, window_bounds = array<i64: 1152, 4>}, {pipeline_mode = #tpu.pipeline_mode<synchronous>, transform_indices = @transform_5, window_bounds = array<i64: 1, 4>}, {pipeline_mode = #tpu.pipeline_mode<synchronous>, transform_indices = @transform_6, window_bounds = array<i64: 1, 4>}, {transform_indices = @transform_7, window_bounds = array<i64: 1, 16, 16, 4>}, {transform_indices = @transform_8, window_bounds = array<i64: 1, 16, 16, 4>}]} {
    %c0 = arith.constant 0 : index
    %c0_0 = arith.constant 0 : index
    %c0_1 = arith.constant 0 : index
    %c0_2 = arith.constant 0 : index
    %0 = vector.load %arg1[%c0, %c0_0, %c0_1, %c0_2] : memref<1x16x16x3xf32, #tpu.memory_space<vmem>>, vector<1x16x16x3xf32>
    %1 = vector.shape_cast %0 : vector<1x16x16x3xf32> to vector<16x16x3xf32>
    %cst = arith.constant 0.000000e+00 : f32
    %2 = vector.broadcast %cst : f32 to vector<18x32x128xf32>
    %c0_3 = arith.constant 0 : index
    %c0_4 = arith.constant 0 : index
    %c0_5 = arith.constant 0 : index
    %3 = vector.load %arg10[%c0_3, %c0_4, %c0_5] : memref<18x32x128xf32, #tpu.memory_space<vmem>>, vector<18x32x128xf32>
    tpu.vector_store %arg10[%c0_3, %c0_4, %c0_5], %2 {strides = array<i32>} : memref<18x32x128xf32, #tpu.memory_space<vmem>>, vector<18x32x128xf32>,
    %c1 = arith.constant 1 : index
    %c8 = arith.constant 8 : index
    %c0_6 = arith.constant 0 : index
    %4 = vector.load %arg10[%c1, %c8, %c0_6] : memref<18x32x128xf32, #tpu.memory_space<vmem>>, vector<16x16x3xf32>
    tpu.vector_store %arg10[%c1, %c8, %c0_6], %1 {strides = array<i32>} : memref<18x32x128xf32, #tpu.memory_space<vmem>>, vector<16x16x3xf32>,
    %c0_7 = arith.constant 0 : index
    %c7 = arith.constant 7 : index
    %c0_8 = arith.constant 0 : index
    %5 = vector.load %arg10[%c0_7, %c7, %c0_8] : memref<18x32x128xf32, #tpu.memory_space<vmem>>, vector<16x16x128xf32>
    %6 = vector.shape_cast %5 : vector<16x16x128xf32> to vector<256x128xf32>
    %c0_9 = arith.constant 0 : index
    %c8_10 = arith.constant 8 : index
    %c0_11 = arith.constant 0 : index
    %7 = vector.load %arg10[%c0_9, %c8_10, %c0_11] : memref<18x32x128xf32, #tpu.memory_space<vmem>>, vector<16x16x128xf32>
    %8 = vector.shape_cast %7 : vector<16x16x128xf32> to vector<256x128xf32>
    %c0_12 = arith.constant 0 : index
    %c9 = arith.constant 9 : index
    %c0_13 = arith.constant 0 : index
    %9 = vector.load %arg10[%c0_12, %c9, %c0_13] : memref<18x32x128xf32, #tpu.memory_space<vmem>>, vector<16x16x128xf32>
    %10 = vector.shape_cast %9 : vector<16x16x128xf32> to vector<256x128xf32>
    %c1_14 = arith.constant 1 : index
    %c7_15 = arith.constant 7 : index
    %c0_16 = arith.constant 0 : index
    %11 = vector.load %arg10[%c1_14, %c7_15, %c0_16] : memref<18x32x128xf32, #tpu.memory_space<vmem>>, vector<16x16x128xf32>
    %12 = vector.shape_cast %11 : vector<16x16x128xf32> to vector<256x128xf32>
    %c1_17 = arith.constant 1 : index
    %c8_18 = arith.constant 8 : index
    %c0_19 = arith.constant 0 : index
    %13 = vector.load %arg10[%c1_17, %c8_18, %c0_19] : memref<18x32x128xf32, #tpu.memory_space<vmem>>, vector<16x16x128xf32>
    %14 = vector.shape_cast %13 : vector<16x16x128xf32> to vector<256x128xf32>
    %c1_20 = arith.constant 1 : index
    %c9_21 = arith.constant 9 : index
    %c0_22 = arith.constant 0 : index
    %15 = vector.load %arg10[%c1_20, %c9_21, %c0_22] : memref<18x32x128xf32, #tpu.memory_space<vmem>>, vector<16x16x128xf32>
    %16 = vector.shape_cast %15 : vector<16x16x128xf32> to vector<256x128xf32>
    %c2 = arith.constant 2 : index
    %c7_23 = arith.constant 7 : index
    %c0_24 = arith.constant 0 : index
    %17 = vector.load %arg10[%c2, %c7_23, %c0_24] : memref<18x32x128xf32, #tpu.memory_space<vmem>>, vector<16x16x128xf32>
    %18 = vector.shape_cast %17 : vector<16x16x128xf32> to vector<256x128xf32>
    %c2_25 = arith.constant 2 : index
    %c8_26 = arith.constant 8 : index
    %c0_27 = arith.constant 0 : index
    %19 = vector.load %arg10[%c2_25, %c8_26, %c0_27] : memref<18x32x128xf32, #tpu.memory_space<vmem>>, vector<16x16x128xf32>
    %20 = vector.shape_cast %19 : vector<16x16x128xf32> to vector<256x128xf32>
    %c2_28 = arith.constant 2 : index
    %c9_29 = arith.constant 9 : index
    %c0_30 = arith.constant 0 : index
    %21 = vector.load %arg10[%c2_28, %c9_29, %c0_30] : memref<18x32x128xf32, #tpu.memory_space<vmem>>, vector<16x16x128xf32>
    %22 = vector.shape_cast %21 : vector<16x16x128xf32> to vector<256x128xf32>
    %23 = tpu.concatenate %6, %8, %10, %12, %14, %16, %18, %20, %22 in 1 : vector<256x128xf32>, vector<256x128xf32>, vector<256x128xf32>, vector<256x128xf32>, vector<256x128xf32>, vector<256x128xf32>, vector<256x128xf32>, vector<256x128xf32>, vector<256x128xf32> -> vector<256x1152xf32>
    %24 = arith.truncf %23 : vector<256x1152xf32> to vector<256x1152xbf16>
    %c0_31 = arith.constant 0 : index
    %c0_32 = arith.constant 0 : index
    %25 = vector.load %arg2[%c0_31, %c0_32] : memref<1152x128xbf16, #tpu.memory_space<vmem>>, vector<1152x128xbf16>
    %cst_33 = arith.constant dense<0.000000e+00> : vector<256x128xf32>
    %26 = tpu.matmul %24, %25, %cst_33 {dimension_numbers = #tpu.dot_dimension_numbers<[1], [0], [0], [1], [0, 0, 1, 1], [], []>} : vector<256x1152xbf16>, vector<1152x128xbf16>, vector<256x128xf32> -> vector<256x128xf32>
    %c0_34 = arith.constant 0 : index
    %c0_35 = arith.constant 0 : index
    %27 = vector.load %arg3[%c0_34, %c0_35] : memref<1x128xf32, #tpu.memory_space<vmem>>, vector<1x128xf32>
    %28 = vector.broadcast %27 : vector<1x128xf32> to vector<256x128xf32>
    %29 = arith.addf %26, %28 : vector<256x128xf32>
    %cst_36 = arith.constant 0.000000e+00 : f32
    %30 = vector.broadcast %cst_36 : f32 to vector<256x128xf32>
    %31 = arith.maximumf %29, %30 : vector<256x128xf32>
    %32 = vector.shape_cast %31 : vector<256x128xf32> to vector<16x16x128xf32>
    %cst_37 = arith.constant 0.000000e+00 : f32
    %33 = vector.broadcast %cst_37 : f32 to vector<18x32x128xf32>
    %c0_38 = arith.constant 0 : index
    %c0_39 = arith.constant 0 : index
    %c0_40 = arith.constant 0 : index
    %34 = vector.load %arg11[%c0_38, %c0_39, %c0_40] : memref<18x32x128xf32, #tpu.memory_space<vmem>>, vector<18x32x128xf32>
    tpu.vector_store %arg11[%c0_38, %c0_39, %c0_40], %33 {strides = array<i32>} : memref<18x32x128xf32, #tpu.memory_space<vmem>>, vector<18x32x128xf32>,
    %c1_41 = arith.constant 1 : index
    %c8_42 = arith.constant 8 : index
    %c0_43 = arith.constant 0 : index
    %35 = vector.load %arg11[%c1_41, %c8_42, %c0_43] : memref<18x32x128xf32, #tpu.memory_space<vmem>>, vector<16x16x128xf32>
    tpu.vector_store %arg11[%c1_41, %c8_42, %c0_43], %32 {strides = array<i32>} : memref<18x32x128xf32, #tpu.memory_space<vmem>>, vector<16x16x128xf32>,
    %c0_44 = arith.constant 0 : index
    %c7_45 = arith.constant 7 : index
    %c0_46 = arith.constant 0 : index
    %36 = vector.load %arg11[%c0_44, %c7_45, %c0_46] : memref<18x32x128xf32, #tpu.memory_space<vmem>>, vector<16x16x128xf32>
    %37 = vector.shape_cast %36 : vector<16x16x128xf32> to vector<256x128xf32>
    %c0_47 = arith.constant 0 : index
    %c8_48 = arith.constant 8 : index
    %c0_49 = arith.constant 0 : index
    %38 = vector.load %arg11[%c0_47, %c8_48, %c0_49] : memref<18x32x128xf32, #tpu.memory_space<vmem>>, vector<16x16x128xf32>
    %39 = vector.shape_cast %38 : vector<16x16x128xf32> to vector<256x128xf32>
    %c0_50 = arith.constant 0 : index
    %c9_51 = arith.constant 9 : index
    %c0_52 = arith.constant 0 : index
    %40 = vector.load %arg11[%c0_50, %c9_51, %c0_52] : memref<18x32x128xf32, #tpu.memory_space<vmem>>, vector<16x16x128xf32>
    %41 = vector.shape_cast %40 : vector<16x16x128xf32> to vector<256x128xf32>
    %c1_53 = arith.constant 1 : index
    %c7_54 = arith.constant 7 : index
    %c0_55 = arith.constant 0 : index
    %42 = vector.load %arg11[%c1_53, %c7_54, %c0_55] : memref<18x32x128xf32, #tpu.memory_space<vmem>>, vector<16x16x128xf32>
    %43 = vector.shape_cast %42 : vector<16x16x128xf32> to vector<256x128xf32>
    %c1_56 = arith.constant 1 : index
    %c8_57 = arith.constant 8 : index
    %c0_58 = arith.constant 0 : index
    %44 = vector.load %arg11[%c1_56, %c8_57, %c0_58] : memref<18x32x128xf32, #tpu.memory_space<vmem>>, vector<16x16x128xf32>
    %45 = vector.shape_cast %44 : vector<16x16x128xf32> to vector<256x128xf32>
    %c1_59 = arith.constant 1 : index
    %c9_60 = arith.constant 9 : index
    %c0_61 = arith.constant 0 : index
    %46 = vector.load %arg11[%c1_59, %c9_60, %c0_61] : memref<18x32x128xf32, #tpu.memory_space<vmem>>, vector<16x16x128xf32>
    %47 = vector.shape_cast %46 : vector<16x16x128xf32> to vector<256x128xf32>
    %c2_62 = arith.constant 2 : index
    %c7_63 = arith.constant 7 : index
    %c0_64 = arith.constant 0 : index
    %48 = vector.load %arg11[%c2_62, %c7_63, %c0_64] : memref<18x32x128xf32, #tpu.memory_space<vmem>>, vector<16x16x128xf32>
    %49 = vector.shape_cast %48 : vector<16x16x128xf32> to vector<256x128xf32>
    %c2_65 = arith.constant 2 : index
    %c8_66 = arith.constant 8 : index
    %c0_67 = arith.constant 0 : index
    %50 = vector.load %arg11[%c2_65, %c8_66, %c0_67] : memref<18x32x128xf32, #tpu.memory_space<vmem>>, vector<16x16x128xf32>
    %51 = vector.shape_cast %50 : vector<16x16x128xf32> to vector<256x128xf32>
    %c2_68 = arith.constant 2 : index
    %c9_69 = arith.constant 9 : index
    %c0_70 = arith.constant 0 : index
    %52 = vector.load %arg11[%c2_68, %c9_69, %c0_70] : memref<18x32x128xf32, #tpu.memory_space<vmem>>, vector<16x16x128xf32>
    %53 = vector.shape_cast %52 : vector<16x16x128xf32> to vector<256x128xf32>
    %54 = tpu.concatenate %37, %39, %41, %43, %45, %47, %49, %51, %53 in 1 : vector<256x128xf32>, vector<256x128xf32>, vector<256x128xf32>, vector<256x128xf32>, vector<256x128xf32>, vector<256x128xf32>, vector<256x128xf32>, vector<256x128xf32>, vector<256x128xf32> -> vector<256x1152xf32>
    %55 = arith.truncf %54 : vector<256x1152xf32> to vector<256x1152xbf16>
    %c0_71 = arith.constant 0 : index
    %c0_72 = arith.constant 0 : index
    %56 = vector.load %arg4[%c0_71, %c0_72] : memref<1152x4xbf16, #tpu.memory_space<vmem>>, vector<1152x4xbf16>
    %cst_73 = arith.constant dense<0.000000e+00> : vector<256x4xf32>
    %57 = tpu.matmul %55, %56, %cst_73 {dimension_numbers = #tpu.dot_dimension_numbers<[1], [0], [0], [1], [0, 0, 1, 1], [], []>} : vector<256x1152xbf16>, vector<1152x4xbf16>, vector<256x4xf32> -> vector<256x4xf32>
    %c0_74 = arith.constant 0 : index
    %c0_75 = arith.constant 0 : index
    %58 = vector.load %arg5[%c0_74, %c0_75] : memref<1152x4xbf16, #tpu.memory_space<vmem>>, vector<1152x4xbf16>
    %cst_76 = arith.constant dense<0.000000e+00> : vector<256x4xf32>
    %59 = tpu.matmul %55, %58, %cst_76 {dimension_numbers = #tpu.dot_dimension_numbers<[1], [0], [0], [1], [0, 0, 1, 1], [], []>} : vector<256x1152xbf16>, vector<1152x4xbf16>, vector<256x4xf32> -> vector<256x4xf32>
    %c0_77 = arith.constant 0 : index
    %c0_78 = arith.constant 0 : index
    %60 = vector.load %arg6[%c0_77, %c0_78] : memref<1x4xf32, #tpu.memory_space<vmem>>, vector<1x4xf32>
    %61 = vector.broadcast %60 : vector<1x4xf32> to vector<256x4xf32>
    %62 = arith.addf %57, %61 : vector<256x4xf32>
    %c0_79 = arith.constant 0 : index
    %c0_80 = arith.constant 0 : index
    %63 = vector.load %arg7[%c0_79, %c0_80] : memref<1x4xf32, #tpu.memory_space<vmem>>, vector<1x4xf32>
    %64 = vector.broadcast %63 : vector<1x4xf32> to vector<256x4xf32>
    %65 = arith.addf %59, %64 : vector<256x4xf32>
    %66 = vector.shape_cast %62 : vector<256x4xf32> to vector<16x16x4xf32>
    %67 = arith.truncf %66 : vector<16x16x4xf32> to vector<16x16x4xbf16>
    %c0_81 = arith.constant 0 : index
    %c0_82 = arith.constant 0 : index
    %c0_83 = arith.constant 0 : index
    %c0_84 = arith.constant 0 : index
    %68 = vector.load %arg8[%c0_81, %c0_82, %c0_83, %c0_84] : memref<1x16x16x4xbf16, #tpu.memory_space<vmem>>, vector<1x16x16x4xbf16>
    %69 = vector.shape_cast %68 : vector<1x16x16x4xbf16> to vector<16x16x4xbf16>
    %70 = vector.shape_cast %67 : vector<16x16x4xbf16> to vector<1x16x16x4xbf16>
    tpu.vector_store %arg8[%c0_81, %c0_82, %c0_83, %c0_84], %70 {strides = array<i32>} : memref<1x16x16x4xbf16, #tpu.memory_space<vmem>>, vector<1x16x16x4xbf16>,
    %71 = vector.shape_cast %65 : vector<256x4xf32> to vector<16x16x4xf32>
    %72 = arith.truncf %71 : vector<16x16x4xf32> to vector<16x16x4xbf16>
    %c0_85 = arith.constant 0 : index
    %c0_86 = arith.constant 0 : index
    %c0_87 = arith.constant 0 : index
    %c0_88 = arith.constant 0 : index
    %73 = vector.load %arg9[%c0_85, %c0_86, %c0_87, %c0_88] : memref<1x16x16x4xbf16, #tpu.memory_space<vmem>>, vector<1x16x16x4xbf16>
    %74 = vector.shape_cast %73 : vector<1x16x16x4xbf16> to vector<16x16x4xbf16>
    %75 = vector.shape_cast %72 : vector<16x16x4xbf16> to vector<1x16x16x4xbf16>
    tpu.vector_store %arg9[%c0_85, %c0_86, %c0_87, %c0_88], %75 {strides = array<i32>} : memref<1x16x16x4xbf16, #tpu.memory_space<vmem>>, vector<1x16x16x4xbf16>,
    return
  }
  func.func @transform_0(%arg0: i32) -> (i32, i32, i32, i32) {
    %c0_i32 = arith.constant 0 : i32
    %c0_i32_0 = arith.constant 0 : i32
    %c0_i32_1 = arith.constant 0 : i32
    %c0_i32_2 = arith.constant 0 : i32
    return %arg0, %c0_i32, %c0_i32_0, %c0_i32_1 : i32, i32, i32, i32
  }
  func.func @transform_1(%arg0: i32) -> (i32, i32) {
    %c0_i32 = arith.constant 0 : i32
    %c0_i32_0 = arith.constant 0 : i32
    %c0_i32_1 = arith.constant 0 : i32
    return %c0_i32, %c0_i32_0 : i32, i32
  }
  func.func @transform_2(%arg0: i32) -> (i32, i32) {
    %c0_i32 = arith.constant 0 : i32
    %c0_i32_0 = arith.constant 0 : i32
    %c0_i32_1 = arith.constant 0 : i32
    return %c0_i32, %c0_i32_0 : i32, i32
  }
  func.func @transform_3(%arg0: i32) -> (i32, i32) {
    %c0_i32 = arith.constant 0 : i32
    %c0_i32_0 = arith.constant 0 : i32
    %c0_i32_1 = arith.constant 0 : i32
    return %c0_i32, %c0_i32_0 : i32, i32
  }
  func.func @transform_4(%arg0: i32) -> (i32, i32) {
    %c0_i32 = arith.constant 0 : i32
    %c0_i32_0 = arith.constant 0 : i32
    %c0_i32_1 = arith.constant 0 : i32
    return %c0_i32, %c0_i32_0 : i32, i32
  }
  func.func @transform_5(%arg0: i32) -> (i32, i32) {
    %c0_i32 = arith.constant 0 : i32
    %c0_i32_0 = arith.constant 0 : i32
    %c0_i32_1 = arith.constant 0 : i32
    return %c0_i32, %c0_i32_0 : i32, i32
  }
  func.func @transform_6(%arg0: i32) -> (i32, i32) {
    %c0_i32 = arith.constant 0 : i32
    %c0_i32_0 = arith.constant 0 : i32
    %c0_i32_1 = arith.constant 0 : i32
    return %c0_i32, %c0_i32_0 : i32, i32
  }
  func.func @transform_7(%arg0: i32) -> (i32, i32, i32, i32) {
    %c0_i32 = arith.constant 0 : i32
    %c0_i32_0 = arith.constant 0 : i32
    %c0_i32_1 = arith.constant 0 : i32
    %c0_i32_2 = arith.constant 0 : i32
    return %arg0, %c0_i32, %c0_i32_0, %c0_i32_1 : i32, i32, i32, i32
  }
  func.func @transform_8(%arg0: i32) -> (i32, i32, i32, i32) {
    %c0_i32 = arith.constant 0 : i32
    %c0_i32_0 = arith.constant 0 : i32
    %c0_i32_1 = arith.constant 0 : i32
    %c0_i32_2 = arith.constant 0 : i32
    return %arg0, %c0_i32, %c0_i32_0, %c0_i32_1 : i32, i32, i32, i32
  }
}

</mosaic_0001>

<bundles_post_ra>
// kernel: tpu_custom_call.1
= control target key start
LH: loop header
LB: loop body
LE: loop exit
PB: predicated region body
PF: predicated region fallthrough
CT: control target
= control target key end

     0   :  { %s8255_s27 = smov 0   ;;  %s11173_s0 = inlined_call_operand.vmem [shape: f32[2,16,16,3], index: 0, kind: input, shape index: {}]   ;;  %s11174_s1 = inlined_call_operand.vmem [shape: bf16[1152,128], index: 1, kind: input, shape index: {}]   ;;  %s11175_s2 = inlined_call_operand.vmem [shape: f32[1,128], index: 2, kind: input, shape index: {}]   ;;  %s11176_s3 = inlined_call_operand.vmem [shape: bf16[1152,4], index: 3, kind: input, shape index: {}]   ;;  %s11177_s4 = inlined_call_operand.vmem [shape: bf16[1152,4], index: 4, kind: input, shape index: {}]   ;;  %s11178_s5 = inlined_call_operand.vmem [shape: f32[1,4], index: 5, kind: input, shape index: {}]   ;;  %s11179_s6 = inlined_call_operand.vmem [shape: f32[1,4], index: 6, kind: input, shape index: {}]   ;;  %s11180_s7 = inlined_call_operand.vmem [shape: bf16[2,16,16,4], index: 7, kind: output, shape index: {0}]   ;;  %s11181_s8 = inlined_call_operand.vmem [shape: bf16[2,16,16,4], index: 8, kind: output, shape index: {1}]  }
   0x1 LB: > { %s6034_s28 = sadd.s32 4294967295, %s8206_s27   ;;  %p6038_p0 = scmp.ge.s32.totalorder %s8206_s27, 1  ;;  %s8206_s27 = sphi %s8255_s27, %s19_s27  }
   0x2   : > { %p265_p1 = scmp.lt.s32.totalorder %s8206_s27, 3 }
   0x4   : > { %p266_p2 = pnand %p6038_p0, %p265_p1 }
   0x6   : > { %269 = sbr.rel (%p266_p2) target bundleno = 1286 (0x506), region = 48 }
   0xb   : > { %v8266_v0 = vld [vmem:[%s11174_s1 + $0x78] sm:$0xff]   ;;  %v8208_v2 = vmov 0.0   ;;  %v7984_v3 = vld [vmem:[%s11174_s1 + $0x70] sm:$0xff]   ;;  %p304_p3 = scmp.lt.s32.totalorder %s6034_s28, 1  ;;  %v7986_v5 = vld [vmem:[%s11174_s1 + $0x68] sm:$0xff]   ;;  %v8209_v6 = vmov 0.0|0.0  }
   0xc   : > { %v8271_v1 = vld [vmem:[%s11174_s1 + $0x38] sm:$0xff]   ;;  %353 = vst [vmem:[#allocation2 + $0x8] sm:$0xff] %v8208_v2  ;;  %354 = vst [vmem:[#allocation2 + $0x10] sm:$0xff] %v8208_v2  ;;  %6397 = vmatprep.subr.bf16.mxu0 %v8266_v0  ;;  %7957 = vmatprep.subr.bf16.mxu1 %v8266_v0  ;;  %v7985_v4 = vld [vmem:[%s11174_s1 + $0x30] sm:$0xff]   ;;  %vm425_vm0 = vcmask 23552   ;;  %vm5753_vm1 = vcmask 27648  }
   0xd   : > { %352 = vst [vmem:[#allocation2] sm:$0xff] %v8208_v2  ;;  %355 = vst [vmem:[#allocation2 + $0x18] sm:$0xff] %v8208_v2  ;;  %6398 = vmatpush3.bf16.msra.mxu0 %v8271_v1  ;;  %7965 = vmatpush3.bf16.msra.mxu1 %v8271_v1  ;;  %s11486_s28 = smov (!%p304_p3, %s6034_s28), 1  ;;  %v7987_v7 = vld [vmem:[%s11174_s1 + $0x28] sm:$0xff]   ;;  %v7988_v8 = vld [vmem:[%s11174_s1 + $0x60] sm:$0xff]  }
   0xe   : > { %356 = vst [vmem:[#allocation2 + $0x20] sm:$0xff] %v8208_v2  ;;  %357 = vst [vmem:[#allocation2 + $0x28] sm:$0xff] %v8208_v2  ;;  %6399 = vmatprep.subr.bf16.mxu0 %v7984_v3  ;;  %7958 = vmatprep.subr.bf16.mxu1 %v7984_v3  ;;  %s6330_s21 = sshll.u32 %s11486_s28, 8  ;;  %v7989_v9 = vld [vmem:[%s11174_s1 + $0x20] sm:$0xff]   ;;  %v7990_v10 = vld [vmem:[%s11174_s1 + $0x58] sm:$0xff]   ;;  %s6331_s12 = sshll.u32 %s11486_s28, 7 }
   0xf   : > { %358 = vst [vmem:[#allocation2 + $0x30] sm:$0xff] %v8208_v2  ;;  %359 = vst [vmem:[#allocation2 + $0x38] sm:$0xff] %v8208_v2  ;;  %1506 = vmatprep.mubr.bf16.mxu0 %v8209_v6  ;;  %s8420_s30 = scalar_lea.vmem %s11173_s0, %s6330_s21  ;;  %v7991_v11 = vld [vmem:[%s11174_s1 + $0x18] sm:$0xff]   ;;  %v7992_v12 = vld [vmem:[%s11174_s1 + $0x50] sm:$0xff]   ;;  %s10444_s15 = scalar_lea.vmem %s11180_s7, %s6331_s12 }
  0x10   : > { %360 = vst [vmem:[#allocation2 + $0x40] sm:$0xff] %v8208_v2  ;;  %361 = vst [vmem:[#allocation2 + $0x48] sm:$0xff] %v8208_v2  ;;  %v342_v13 = vld [vmem:[%s8420_s30 + $0xb0] sm:$0xff]  ;;  %v343_v14 = vld [vmem:[%s8420_s30 + $0xb8] sm:$0xff] }
  0x11   : > { %362 = vst [vmem:[#allocation2 + $0x50] sm:$0xff] %v8208_v2  ;;  %363 = vst [vmem:[#allocation2 + $0x58] sm:$0xff] %v8208_v2  ;;  %6400 = vmatpush3.bf16.msra.mxu0 %v7985_v4  ;;  %7966 = vmatpush3.bf16.msra.mxu1 %v7985_v4  ;;  %v7993_v15 = vld [vmem:[%s11174_s1 + $0x10] sm:$0xff]   ;;  %v7994_v16 = vld [vmem:[%s11174_s1 + $0x48] sm:$0xff]  }
  0x12   : > { %364 = vst [vmem:[#allocation2 + $0x60] sm:$0xff] %v8208_v2  ;;  %365 = vst [vmem:[#allocation2 + $0x68] sm:$0xff] %v8208_v2  ;;  %6401 = vmatprep.subr.bf16.mxu0 %v7986_v5  ;;  %7959 = vmatprep.subr.bf16.mxu1 %v7986_v5  ;;  %v7995_v17 = vld [vmem:[%s11174_s1 + $0x8] sm:$0xff]   ;;  %v320_v18 = vld [vmem:[%s8420_s30] sm:$0xff] }
  0x13   : > { %366 = vst [vmem:[#allocation2 + $0x70] sm:$0xff] %v8208_v2  ;;  %367 = vst [vmem:[#allocation2 + $0x78] sm:$0xff] %v8208_v2  ;;  %v321_v19 = vld [vmem:[%s8420_s30 + $0x8] sm:$0xff]  ;;  %v7996_v20 = vld [vmem:[%s11174_s1 + $0x40] sm:$0xff]  }
  0x14   : > { %368 = vst [vmem:[#allocation2 + $0x80] sm:$0xff] %v8208_v2  ;;  %369 = vst [vmem:[#allocation2 + $0x88] sm:$0xff] %v8208_v2  ;;  %v7997_v23 = vld [vmem:[%s11174_s1] sm:$0xff]   ;;  %v459_v26 = vld [vmem:[#allocation2 + $0xf] sm:$0xff] }
  0x15   : > { %370 = vst [vmem:[#allocation2 + $0x90] sm:$0xff] %v8208_v2  ;;  %371 = vst [vmem:[#allocation2 + $0x98] sm:$0xff] %v8208_v2  ;;  %6402 = vmatpush3.bf16.msra.mxu0 %v7987_v7  ;;  %7967 = vmatpush3.bf16.msra.mxu1 %v7987_v7  ;;  %v458_v25 = vld [vmem:[#allocation2 + $0x7] sm:$0xff]  ;;  %v7998_v30 = vld [vmem:[%s11174_s1 + $0xf8] sm:$0xff]  }
  0x16   : > { %372 = vst [vmem:[#allocation2 + $0xa0] sm:$0xff] %v8208_v2  ;;  %373 = vst [vmem:[#allocation2 + $0xa8] sm:$0xff] %v8208_v2  ;;  %6403 = vmatprep.subr.bf16.mxu0 %v7988_v8  ;;  %7960 = vmatprep.subr.bf16.mxu1 %v7988_v8  ;;  %v344_v27 = vld [vmem:[%s8420_s30 + $0xc0] sm:$0xff]  ;;  %v345_v28 = vld [vmem:[%s8420_s30 + $0xc8] sm:$0xff]  ;;  %v747_v34 = vpack.c.bf16 %v459_v26, %v458_v25 }
  0x17   : > { %374 = vst [vmem:[#allocation2 + $0xb0] sm:$0xff] %v8208_v2  ;;  %375 = vst [vmem:[#allocation2 + $0xb8] sm:$0xff] %v8208_v2  ;;  %v7999_v32 = vld [vmem:[%s11174_s1 + $0x178] sm:$0xff]   ;;  %v8002_v37 = vld [vmem:[%s11174_s1 + $0xf0] sm:$0xff]  }
  0x18   : > { %376 = vst [vmem:[#allocation2 + $0xc0] sm:$0xff] %v8208_v2  ;;  %377 = vst [vmem:[#allocation2 + $0xc8] sm:$0xff] %v8208_v2  ;;  %v8000_v33 = vld [vmem:[%s11174_s1 + $0xb8] sm:$0xff]   ;;  %v8007_v41 = vld [vmem:[%s11174_s1 + $0x170] sm:$0xff]  }
  0x19   : > { %378 = vst [vmem:[#allocation2 + $0xd0] sm:$0xff] %v8208_v2  ;;  %379 = vst [vmem:[#allocation2 + $0xd8] sm:$0xff] %v8208_v2  ;;  %6404 = vmatpush3.bf16.msra.mxu0 %v7989_v9  ;;  %7968 = vmatpush3.bf16.msra.mxu1 %v7989_v9  ;;  %v8001_v36 = vld [vmem:[%s11174_s1 + $0x138] sm:$0xff]   ;;  %v8003_v42 = vld [vmem:[%s11174_s1 + $0xb0] sm:$0xff]  }
  0x1a   : > { %380 = vst [vmem:[#allocation2 + $0xe0] sm:$0xff] %v8208_v2  ;;  %381 = vst [vmem:[#allocation2 + $0xe8] sm:$0xff] %v8208_v2  ;;  %6405 = vmatprep.subr.bf16.mxu0 %v7990_v10  ;;  %7961 = vmatprep.subr.bf16.mxu1 %v7990_v10  ;;  %v8009_v50 = vld [vmem:[%s11174_s1 + $0x130] sm:$0xff]   ;;  %v323_v52 = vld [vmem:[%s8420_s30 + $0x18] sm:$0xff] }
  0x1b   : > { %382 = vst [vmem:[#allocation2 + $0xf0] sm:$0xff] %v8208_v2  ;;  %383 = vst [vmem:[#allocation2 + $0xf8] sm:$0xff] %v8208_v2  ;;  %v322_v51 = vld [vmem:[%s8420_s30 + $0x10] sm:$0xff]  ;;  %v347_v54 = vld [vmem:[%s8420_s30 + $0xd8] sm:$0xff] }
  0x1c   : > { %384 = vst [vmem:[#allocation2 + $0x100] sm:$0xff] %v8208_v2  ;;  %385 = vst [vmem:[#allocation2 + $0x108] sm:$0xff] %v8208_v2  ;;  %v346_v53 = vld [vmem:[%s8420_s30 + $0xd0] sm:$0xff]  ;;  %v8004_v55 = vld [vmem:[%s11174_s1 + $0xe8] sm:$0xff]  }
  0x1d   : > { %386 = vst [vmem:[#allocation2 + $0x110] sm:$0xff] %v8208_v2  ;;  %387 = vst [vmem:[#allocation2 + $0x118] sm:$0xff] %v8208_v2  ;;  %6406 = vmatpush3.bf16.msra.mxu0 %v7991_v11  ;;  %7969 = vmatpush3.bf16.msra.mxu1 %v7991_v11  ;;  %v8005_v58 = vld [vmem:[%s11174_s1 + $0xa8] sm:$0xff]   ;;  %v8006_v59 = vld [vmem:[%s11174_s1 + $0xe0] sm:$0xff]  }
  0x1e   : > { %388 = vst [vmem:[#allocation2 + $0x120] sm:$0xff] %v8208_v2  ;;  %389 = vst [vmem:[#allocation2 + $0x128] sm:$0xff] %v8208_v2  ;;  %6407 = vmatprep.subr.bf16.mxu0 %v7992_v12  ;;  %7962 = vmatprep.subr.bf16.mxu1 %v7992_v12  ;;  %v324_v60 = vld [vmem:[%s8420_s30 + $0x20] sm:$0xff]  ;;  %v325_v61 = vld [vmem:[%s8420_s30 + $0x28] sm:$0xff] }
  0x1f   : > { %390 = vst [vmem:[#allocation2 + $0x130] sm:$0xff] %v8208_v2  ;;  %391 = vst [vmem:[#allocation2 + $0x138] sm:$0xff] %v8208_v2  ;;  %v348_v62 = vld [vmem:[%s8420_s30 + $0xe0] sm:$0xff]  ;;  %v349_v0 = vld [vmem:[%s8420_s30 + $0xe8] sm:$0xff] }
  0x20   : > { %392 = vst [vmem:[#allocation2 + $0x140] sm:$0xff] %v8208_v2  ;;  %393 = vst [vmem:[#allocation2 + $0x148] sm:$0xff] %v8208_v2  ;;  %v8008_v63 = vld [vmem:[%s11174_s1 + $0xa0] sm:$0xff]   ;;  %v8010_v3 = vld [vmem:[%s11174_s1 + $0xd8] sm:$0xff]  }
  0x21   : > { %394 = vst [vmem:[#allocation2 + $0x150] sm:$0xff] %v8208_v2  ;;  %395 = vst [vmem:[#allocation2 + $0x158] sm:$0xff] %v8208_v2  ;;  %6408 = vmatpush3.bf16.msra.mxu0 %v7993_v15  ;;  %7970 = vmatpush3.bf16.msra.mxu1 %v7993_v15  ;;  %v8011_v12 = vld [vmem:[%s11174_s1 + $0x98] sm:$0xff]  }
  0x22   : > { %396 = vst [vmem:[#allocation2 + $0x160] sm:$0xff] %v8208_v2  ;;  %397 = vst [vmem:[#allocation2 + $0x168] sm:$0xff] %v8208_v2  ;;  %6409 = vmatprep.subr.bf16.mxu0 %v7994_v16  ;;  %7963 = vmatprep.subr.bf16.mxu1 %v7994_v16  ;;  %v8012_v16 = vld [vmem:[%s11174_s1 + $0xd0] sm:$0xff]  }
  0x23   : > { %398 = vst [vmem:[#allocation2 + $0x170] sm:$0xff] %v8208_v2  ;;  %399 = vst [vmem:[#allocation2 + $0x178] sm:$0xff] %v8208_v2 }
  0x24   : > { %400 = vst [vmem:[#allocation2 + $0x180] sm:$0xff] %v8208_v2  ;;  %401 = vst [vmem:[#allocation2 + $0x188] sm:$0xff] %v8208_v2 }
  0x25   : > { %402 = vst [vmem:[#allocation2 + $0x190] sm:$0xff] %v8208_v2  ;;  %403 = vst [vmem:[#allocation2 + $0x198] sm:$0xff] %v8208_v2  ;;  %6410 = vmatpush3.bf16.msra.mxu0 %v7995_v17  ;;  %7971 = vmatpush3.bf16.msra.mxu1 %v7995_v17  ;;  %v8017_v17 = vld [vmem:[%s11174_s1 + $0x128] sm:$0xff]  }
  0x26   : > { %404 = vst [vmem:[#allocation2 + $0x1a0] sm:$0xff] %v8208_v2  ;;  %405 = vst [vmem:[#allocation2 + $0x1a8] sm:$0xff] %v8208_v2  ;;  %6411 = vmatprep.subr.bf16.mxu0 %v7996_v20  ;;  %7964 = vmatprep.subr.bf16.mxu1 %v7996_v20 }
  0x27   : > { %406 = vst [vmem:[#allocation2 + $0x1b0] sm:$0xff] %v8208_v2  ;;  %407 = vst [vmem:[#allocation2 + $0x1b8] sm:$0xff] %v8208_v2 }
  0x28   : > { %408 = vst [vmem:[#allocation2 + $0x1c0] sm:$0xff] %v8208_v2  ;;  %409 = vst [vmem:[#allocation2 + $0x1c8] sm:$0xff] %v8208_v2 }
  0x29   : > { %410 = vst [vmem:[#allocation2 + $0x1d0] sm:$0xff] %v8208_v2  ;;  %411 = vst [vmem:[#allocation2 + $0x1d8] sm:$0xff] %v8208_v2  ;;  %6412 = vmatpush3.bf16.msra.mxu0 %v7997_v23  ;;  %7972 = vmatpush3.bf16.msra.mxu1 %v7997_v23 }
  0x2a   : > { %412 = vst [vmem:[#allocation2 + $0x1e0] sm:$0xff] %v8208_v2  ;;  %413 = vst [vmem:[#allocation2 + $0x1e8] sm:$0xff] %v8208_v2  ;;  %6509 = vmatprep.subr.bf16.mxu1 %v7998_v30  ;;  %6621 = vmatprep.subr.bf16.mxu0 %v7999_v32  ;;  %v326_v30 = vld [vmem:[%s8420_s30 + $0x30] sm:$0xff]  ;;  %v327_v32 = vld [vmem:[%s8420_s30 + $0x38] sm:$0xff] }
  0x2b   : > { %414 = vst [vmem:[#allocation2 + $0x1f0] sm:$0xff] %v8208_v2  ;;  %415 = vst [vmem:[#allocation2 + $0x1f8] sm:$0xff] %v8208_v2 }
  0x2c   : > { %416 = vst [vmem:[#allocation2 + $0x200] sm:$0xff] %v8208_v2  ;;  %417 = vst [vmem:[#allocation2 + $0x208] sm:$0xff] %v8208_v2  ;;  %1507 = vmatmul.mubr.bf16.vlgmr.msra.gmra.mxu0 %v747_v34 }
  0x2d   : > { %418 = vst [vmem:[#allocation2 + $0x210] sm:$0xff] %v8208_v2  ;;  %419 = vst [vmem:[#allocation2 + $0x218] sm:$0xff] %v8208_v2  ;;  %6622 = vmatpush3.bf16.msra.mxu0 %v8001_v36  ;;  %v8020_v36 = vld [vmem:[%s11174_s1 + $0x160] sm:$0xff]  }
  0x2e   : > { %420 = vst [vmem:[#allocation2 + $0x220] sm:$0xff] %v8208_v2  ;;  %421 = vst [vmem:[#allocation2 + $0x228] sm:$0xff] %v8208_v2  ;;  %6623 = vmatprep.subr.bf16.mxu0 %v8007_v41  ;;  %v329_v41 = vld [vmem:[%s8420_s30 + $0x48] sm:$0xff] }
  0x2f   : > { %422 = vst [vmem:[#allocation2 + $0x230] sm:$0xff] %v8208_v2  ;;  %423 = vst [vmem:[#allocation2 + $0x238] sm:$0xff] %v8208_v2 }
  0x30   : > { %2311 = vst [vmem:[#allocation3] sm:$0xff] %v8208_v2  ;;  %2312 = vst [vmem:[#allocation3 + $0x8] sm:$0xff] %v8208_v2 }
  0x31   : > { %2313 = vst [vmem:[#allocation3 + $0x10] sm:$0xff] %v8208_v2  ;;  %2314 = vst [vmem:[#allocation3 + $0x18] sm:$0xff] %v8208_v2  ;;  %6624 = vmatpush3.bf16.msra.mxu0 %v8009_v50 }
  0x32   : > { %2315 = vst [vmem:[#allocation3 + $0x20] sm:$0xff] %v8208_v2  ;;  %2318 = vst [vmem:[#allocation3 + $0x38] sm:$0xff] %v8208_v2 }
  0x33   : > { %2319 = vst [vmem:[#allocation3 + $0x40] sm:$0xff] %v8208_v2  ;;  %2322 = vst [vmem:[#allocation3 + $0x58] sm:$0xff] %v8208_v2 }
  0x34   : > { %2323 = vst [vmem:[#allocation3 + $0x60] sm:$0xff] %v8208_v2  ;;  %2326 = vst [vmem:[#allocation3 + $0x78] sm:$0xff] %v8208_v2 }
  0x35   : > { %2327 = vst [vmem:[#allocation3 + $0x80] sm:$0xff] %v8208_v2  ;;  %2330 = vst [vmem:[#allocation3 + $0x98] sm:$0xff] %v8208_v2 }
  0x36   : > { %2331 = vst [vmem:[#allocation3 + $0xa0] sm:$0xff] %v8208_v2  ;;  %2334 = vst [vmem:[#allocation3 + $0xb8] sm:$0xff] %v8208_v2 }
  0x37   : > { %2335 = vst [vmem:[#allocation3 + $0xc0] sm:$0xff] %v8208_v2  ;;  %2338 = vst [vmem:[#allocation3 + $0xd8] sm:$0xff] %v8208_v2 }
  0x38   : > { %2339 = vst [vmem:[#allocation3 + $0xe0] sm:$0xff] %v8208_v2  ;;  %2342 = vst [vmem:[#allocation3 + $0xf8] sm:$0xff] %v8208_v2 }
  0x39   : > { %2343 = vst [vmem:[#allocation3 + $0x100] sm:$0xff] %v8208_v2  ;;  %2346 = vst [vmem:[#allocation3 + $0x118] sm:$0xff] %v8208_v2 }
  0x3a   : > { %2347 = vst [vmem:[#allocation3 + $0x120] sm:$0xff] %v8208_v2  ;;  %2350 = vst [vmem:[#allocation3 + $0x138] sm:$0xff] %v8208_v2 }
  0x3b   : > { %2351 = vst [vmem:[#allocation3 + $0x140] sm:$0xff] %v8208_v2  ;;  %2354 = vst [vmem:[#allocation3 + $0x158] sm:$0xff] %v8208_v2 }
  0x3c   : > { %2355 = vst [vmem:[#allocation3 + $0x160] sm:$0xff] %v8208_v2  ;;  %2358 = vst [vmem:[#allocation3 + $0x178] sm:$0xff] %v8208_v2 }
  0x3d   : > { %2359 = vst [vmem:[#allocation3 + $0x180] sm:$0xff] %v8208_v2  ;;  %2362 = vst [vmem:[#allocation3 + $0x198] sm:$0xff] %v8208_v2 }
  0x3e   : > { %2363 = vst [vmem:[#allocation3 + $0x1a0] sm:$0xff] %v8208_v2  ;;  %2366 = vst [vmem:[#allocation3 + $0x1b8] sm:$0xff] %v8208_v2 }
  0x3f   : > { %2367 = vst [vmem:[#allocation3 + $0x1c0] sm:$0xff] %v8208_v2  ;;  %2370 = vst [vmem:[#allocation3 + $0x1d8] sm:$0xff] %v8208_v2 }
  0x40   : > { %2371 = vst [vmem:[#allocation3 + $0x1e0] sm:$0xff] %v8208_v2  ;;  %2374 = vst [vmem:[#allocation3 + $0x1f8] sm:$0xff] %v8208_v2 }
  0x41   : > { %2375 = vst [vmem:[#allocation3 + $0x200] sm:$0xff] %v8208_v2  ;;  %2378 = vst [vmem:[#allocation3 + $0x218] sm:$0xff] %v8208_v2 }
  0x42   : > { %2379 = vst [vmem:[#allocation3 + $0x220] sm:$0xff] %v8208_v2  ;;  %2380 = vst [vmem:[#allocation3 + $0x228] sm:$0xff] %v8208_v2 }
  0x43   : > { %2381 = vst [vmem:[#allocation3 + $0x230] sm:$0xff] %v8208_v2  ;;  %2382 = vst [vmem:[#allocation3 + $0x238] sm:$0xff] %v8208_v2 }
  0x44   : > { %448 = vst.msk [vmem:[#allocation2 + $0x188] sm:$0xff] %vm425_vm0, %v342_v13  ;;  %449 = vst.msk [vmem:[#allocation2 + $0x190] sm:$0xff] %vm425_vm0, %v343_v14  ;;  %v8015_v13 = vld [vmem:[%s11174_s1 + $0x168] sm:$0xff]  }
  0x45   : > { %426 = vst.msk [vmem:[#allocation2 + $0x28] sm:$0xff] %vm425_vm0, %v320_v18  ;;  %427 = vst.msk [vmem:[#allocation2 + $0x30] sm:$0xff] %vm425_vm0, %v321_v19  ;;  %6625 = vmatprep.subr.bf16.mxu0 %v8015_v13 }
  0x46   : > { %450 = vst.msk [vmem:[#allocation2 + $0x1a8] sm:$0xff] %vm425_vm0, %v344_v27  ;;  %451 = vst.msk [vmem:[#allocation2 + $0x1b0] sm:$0xff] %vm425_vm0, %v345_v28  ;;  %6626 = vmatpush3.bf16.msra.mxu0 %v8017_v17 }
  0x47   : > { %428 = vst.msk [vmem:[#allocation2 + $0x48] sm:$0xff] %vm425_vm0, %v322_v51  ;;  %429 = vst.msk [vmem:[#allocation2 + $0x50] sm:$0xff] %vm425_vm0, %v323_v52  ;;  %6627 = vmatprep.subr.bf16.mxu0 %v8020_v36  ;;  %v8023_v52 = vld [vmem:[%s11174_s1 + $0x118] sm:$0xff]   ;;  %v341_v36 = vld [vmem:[%s8420_s30 + $0xa8] sm:$0xff] }
  0x48   : > { %452 = vst.msk [vmem:[#allocation2 + $0x1c8] sm:$0xff] %vm425_vm0, %v346_v53  ;;  %453 = vst.msk [vmem:[#allocation2 + $0x1d0] sm:$0xff] %vm425_vm0, %v347_v54 }
  0x49   : > { %430 = vst.msk [vmem:[#allocation2 + $0x68] sm:$0xff] %vm425_vm0, %v324_v60  ;;  %431 = vst.msk [vmem:[#allocation2 + $0x70] sm:$0xff] %vm425_vm0, %v325_v61 }
  0x4a   : > { %454 = vst.msk [vmem:[#allocation2 + $0x1e8] sm:$0xff] %vm425_vm0, %v348_v62  ;;  %455 = vst.msk [vmem:[#allocation2 + $0x1f0] sm:$0xff] %vm425_vm0, %v349_v0 }
  0x4b   : > { %v514_v21 = vld [vmem:[#allocation2 + $0x188] sm:$0xff]  ;;  %v515_v22 = vld [vmem:[#allocation2 + $0x190] sm:$0xff]  ;;  %432 = vst.msk [vmem:[#allocation2 + $0x88] sm:$0xff] %vm425_vm0, %v326_v30  ;;  %433 = vst.msk [vmem:[#allocation2 + $0x90] sm:$0xff] %vm425_vm0, %v327_v32 }
  0x4c   : > { %v856_v24 = vpack.c.bf16 %v515_v22, %v514_v21  ;;  %v482_v29 = vld [vmem:[#allocation2 + $0x187] sm:$0xff]  ;;  %v483_v31 = vld [vmem:[#allocation2 + $0x18f] sm:$0xff]  ;;  %435 = vst.msk [vmem:[#allocation2 + $0xb0] sm:$0xff] %vm425_vm0, %v329_v41  ;;  %447 = vst.msk [vmem:[#allocation2 + $0x170] sm:$0xff] %vm425_vm0, %v341_v36 }
  0x4d   : > { %v8464_v35 = vpack.c.bf16 %v483_v31, %v482_v29  ;;  %v492_v38 = vld [vmem:[#allocation2 + $0x28] sm:$0xff]  ;;  %v493_v39 = vld [vmem:[#allocation2 + $0x30] sm:$0xff]  ;;  %v340_v32 = vld [vmem:[%s8420_s30 + $0xa0] sm:$0xff] }
  0x4e   : > { %1602 = vmatprep.mubr.bf16.mxu1 %v856_v24  ;;  %v8472_v40 = vpack.c.bf16 %v493_v39, %v492_v38  ;;  %v516_v43 = vld [vmem:[#allocation2 + $0x1a8] sm:$0xff]  ;;  %v517_v44 = vld [vmem:[#allocation2 + $0x1b0] sm:$0xff]  ;;  %v8018_v38 = vld [vmem:[%s11174_s1 + $0xc0] sm:$0xff]   ;;  %446 = vst.msk [vmem:[#allocation2 + $0x168] sm:$0xff] %vm425_vm0, %v340_v32 }
  0x4f   : > { %v460_v45 = vld [vmem:[#allocation2 + $0x27] sm:$0xff]  ;;  %v461_v46 = vld [vmem:[#allocation2 + $0x2f] sm:$0xff]  ;;  %1603 = vmatmul.mubr.bf16.vlgmr.msra.gmra.mxu1 %v8464_v35  ;;  %v865_v48 = vpack.c.bf16 %v517_v44, %v516_v43  ;;  %v331_v44 = vld [vmem:[%s8420_s30 + $0x58] sm:$0xff] }
  0x50   : > { %v484_v47 = vld [vmem:[#allocation2 + $0x1a7] sm:$0xff]  ;;  %v485_v49 = vld [vmem:[#allocation2 + $0x1af] sm:$0xff]  ;;  %6510 = vmatpush3.bf16.msra.mxu1 %v8000_v33  ;;  %1514 = vmatprep.mubr.bf16.mxu0 %v8472_v40  ;;  %v8496_v56 = vpack.c.bf16 %v461_v46, %v460_v45  ;;  %437 = vst.msk [vmem:[#allocation2 + $0xd0] sm:$0xff] %vm425_vm0, %v331_v44  ;;  %v351_v36 = vld [vmem:[%s8420_s30 + $0xf8] sm:$0xff] }
  0x51   : > { %6511 = vmatprep.subr.bf16.mxu1 %v8002_v37  ;;  %1610 = vmatprep.mubr.bf16.mxu1 %v865_v48  ;;  %v8498_v57 = vpack.c.bf16 %v485_v49, %v484_v47  ;;  %v494_v1 = vld [vmem:[#allocation2 + $0x48] sm:$0xff]  ;;  %v495_v4 = vld [vmem:[#allocation2 + $0x50] sm:$0xff]  ;;  %v8021_v37 = vld [vmem:[%s11174_s1 + $0x120] sm:$0xff]   ;;  %457 = vst.msk [vmem:[#allocation2 + $0x210] sm:$0xff] %vm425_vm0, %v351_v36 }
  0x52   : > { %1515 = vmatmul.mubr.bf16.gmra.mxu0 %v8496_v56  ;;  %v462_v2 = vld [vmem:[#allocation2 + $0x47] sm:$0xff]  ;;  %v519_v6 = vld [vmem:[#allocation2 + $0x1d0] sm:$0xff]  ;;  %v8522_v7 = vpack.c.bf16 %v495_v4, %v494_v1  ;;  %v8022_v47 = vld [vmem:[%s11174_s1 + $0x158] sm:$0xff]  }
  0x53   : > { %v518_v5 = vld [vmem:[#allocation2 + $0x1c8] sm:$0xff]  ;;  %v497_v19 = vld [vmem:[#allocation2 + $0x70] sm:$0xff]  ;;  %v328_v39 = vld [vmem:[%s8420_s30 + $0x40] sm:$0xff]  ;;  %6628 = vmatpush3.bf16.msra.mxu0 %v8021_v37 }
  0x54   : > { %6512 = vmatpush3.bf16.msra.mxu1 %v8003_v42  ;;  %v874_v8 = vpack.c.bf16 %v519_v6, %v518_v5  ;;  %v463_v9 = vld [vmem:[#allocation2 + $0x4f] sm:$0xff]  ;;  %v486_v10 = vld [vmem:[#allocation2 + $0x1c7] sm:$0xff]  ;;  %1522 = vmatprep.mubr.bf16.mxu0 %v8522_v7  ;;  %434 = vst.msk [vmem:[#allocation2 + $0xa8] sm:$0xff] %vm425_vm0, %v328_v39 }
  0x55   : > { %6513 = vmatprep.subr.bf16.mxu1 %v8004_v55  ;;  %v487_v11 = vld [vmem:[#allocation2 + $0x1cf] sm:$0xff]  ;;  %v8531_v14 = vpack.c.bf16 %v463_v9, %v462_v2  ;;  %v464_v24 = vld [vmem:[#allocation2 + $0x67] sm:$0xff]  ;;  %6629 = vmatprep.subr.bf16.mxu0 %v8022_v47 }
  0x56   : > { %v8533_v15 = vpack.c.bf16 %v487_v11, %v486_v10  ;;  %v496_v18 = vld [vmem:[#allocation2 + $0x68] sm:$0xff]  ;;  %v8013_v21 = vld [vmem:[%s11174_s1 + $0x90] sm:$0xff]   ;;  %v8019_v42 = vld [vmem:[%s11174_s1 + $0x80] sm:$0xff]  }
  0x57   : > { %1611 = vmatmul.mubr.bf16.gmra.mxu1 %v8498_v57  ;;  %v520_v20 = vld [vmem:[#allocation2 + $0x1e8] sm:$0xff]  ;;  %v8544_v22 = vpack.c.bf16 %v497_v19, %v496_v18  ;;  %v521_v23 = vld [vmem:[#allocation2 + $0x1f0] sm:$0xff]  ;;  %6630 = vmatpush3.bf16.msra.mxu0 %v8023_v52  ;;  %v336_v9 = vld [vmem:[%s8420_s30 + $0x80] sm:$0xff] }
  0x58   : > { %6514 = vmatpush3.bf16.msra.mxu1 %v8005_v58  ;;  %1618 = vmatprep.mubr.bf16.mxu1 %v874_v8  ;;  %v883_v25 = vpack.c.bf16 %v521_v23, %v520_v20  ;;  %v465_v26 = vld [vmem:[#allocation2 + $0x6f] sm:$0xff]  ;;  %v488_v27 = vld [vmem:[#allocation2 + $0x1e7] sm:$0xff]  ;;  %v335_v8 = vld [vmem:[%s8420_s30 + $0x78] sm:$0xff]  ;;  %442 = vst.msk [vmem:[#allocation2 + $0x128] sm:$0xff] %vm425_vm0, %v336_v9 }
  0x59   : > { %6515 = vmatprep.subr.bf16.mxu1 %v8006_v59  ;;  %v489_v28 = vld [vmem:[#allocation2 + $0x1ef] sm:$0xff]  ;;  %v8558_v33 = vpack.c.bf16 %v465_v26, %v464_v24  ;;  %v466_v49 = vld [vmem:[#allocation2 + $0x87] sm:$0xff]  ;;  %441 = vst.msk [vmem:[#allocation2 + $0x110] sm:$0xff] %vm425_vm0, %v335_v8  ;;  %v339_v23 = vld [vmem:[%s8420_s30 + $0x98] sm:$0xff] }
  0x5a   : > { %1523 = vmatmul.mubr.bf16.gmra.mxu0 %v8531_v14  ;;  %v8014_v29 = vld [vmem:[%s11174_s1 + $0xc8] sm:$0xff]   ;;  %v8560_v34 = vpack.c.bf16 %v489_v28, %v488_v27  ;;  %v330_v43 = vld [vmem:[%s8420_s30 + $0x50] sm:$0xff]  ;;  %445 = vst.msk [vmem:[#allocation2 + $0x150] sm:$0xff] %vm425_vm0, %v339_v23  ;;  %v8039_v8 = vld [vmem:[%s11174_s1 + $0x1e0] sm:$0xff]  }
  0x5b   : > { %1530 = vmatprep.mubr.bf16.mxu0 %v8544_v22  ;;  %v8016_v31 = vld [vmem:[%s11174_s1 + $0x88] sm:$0xff]   ;;  %v523_v46 = vld [vmem:[#allocation2 + $0x11] sm:$0xff]  ;;  %436 = vst.msk [vmem:[#allocation2 + $0xc8] sm:$0xff] %vm425_vm0, %v330_v43  ;;  %v8040_v9 = vld [vmem:[%s11174_s1 + $0x1a0] sm:$0xff]  }
  0x5c   : > { %6516 = vmatpush3.bf16.msra.mxu1 %v8008_v63  ;;  %v522_v45 = vld [vmem:[#allocation2 + $0x9] sm:$0xff]  ;;  %v525_v0 = vld [vmem:[#allocation2 + $0x31] sm:$0xff] }
  0x5d   : > { %6517 = vmatprep.subr.bf16.mxu1 %v8010_v3  ;;  %v498_v48 = vld [vmem:[#allocation2 + $0x88] sm:$0xff]  ;;  %v499_v50 = vld [vmem:[#allocation2 + $0x90] sm:$0xff]  ;;  %v749_v55 = vpack.c.bf16 %v523_v46, %v522_v45  ;;  %v8030_v43 = vld [vmem:[%s11174_s1 + $0x1f8] sm:$0xff]  }
  0x5e   : > { %v467_v51 = vld [vmem:[#allocation2 + $0x8f] sm:$0xff]  ;;  %v8592_v53 = vpack.c.bf16 %v499_v50, %v498_v48  ;;  %v468_v62 = vld [vmem:[#allocation2 + $0xa7] sm:$0xff]  ;;  %v8031_v45 = vld [vmem:[%s11174_s1 + $0x1b8] sm:$0xff]  }
  0x5f   : > { %1619 = vmatmul.mubr.bf16.gmra.mxu1 %v8533_v15  ;;  %v8594_v54 = vpack.c.bf16 %v467_v51, %v466_v49  ;;  %v333_v58 = vld [vmem:[%s8420_s30 + $0x68] sm:$0xff]  ;;  %v501_v60 = vld [vmem:[#allocation2 + $0xb0] sm:$0xff]  ;;  %v8673_v48 = vld [vmem:[%s11174_s1 + $0x238] sm:$0xff]  }
  0x60   : > { %6518 = vmatpush3.bf16.msra.mxu1 %v8011_v12  ;;  %1626 = vmatprep.mubr.bf16.mxu1 %v883_v25  ;;  %439 = vst.msk [vmem:[#allocation2 + $0xf0] sm:$0xff] %vm425_vm0, %v333_v58  ;;  %v500_v59 = vld [vmem:[#allocation2 + $0xa8] sm:$0xff]  ;;  %v8024_v3 = vld [vmem:[%s11174_s1 + $0x150] sm:$0xff]  }
  0x61   : > { %6519 = vmatprep.subr.bf16.mxu1 %v8012_v16  ;;  %v8601_v61 = vpack.c.bf16 %v501_v60, %v500_v59  ;;  %v524_v63 = vld [vmem:[#allocation2 + $0x29] sm:$0xff]  ;;  %6631 = vmatprep.subr.bf16.mxu0 %v8024_v3  ;;  %v527_v18 = vld [vmem:[#allocation2 + $0x51] sm:$0xff] }
  0x62   : > { %1531 = vmatmul.mubr.bf16.gmra.mxu0 %v8558_v33  ;;  %v469_v1 = vld [vmem:[#allocation2 + $0xaf] sm:$0xff]  ;;  %v8620_v12 = vpack.c.bf16 %v525_v0, %v524_v63  ;;  %v470_v20 = vld [vmem:[#allocation2 + $0xc7] sm:$0xff] }
  0x63   : > { %1538 = vmatprep.mubr.bf16.mxu0 %v8592_v53  ;;  %v502_v2 = vld [vmem:[#allocation2 + $0xc8] sm:$0xff]  ;;  %v8025_v4 = vld [vmem:[%s11174_s1 + $0x110] sm:$0xff]   ;;  %v8618_v11 = vpack.c.bf16 %v469_v1, %v468_v62 }
  0x64   : > { %6520 = vmatpush3.bf16.msra.mxu1 %v8013_v21  ;;  %v503_v5 = vld [vmem:[#allocation2 + $0xd0] sm:$0xff]  ;;  %6632 = vmatpush3.bf16.msra.mxu0 %v8025_v4  ;;  %v337_v10 = vld [vmem:[%s8420_s30 + $0x88] sm:$0xff] }
  0x65   : > { %6521 = vmatprep.subr.bf16.mxu1 %v8014_v29  ;;  %v334_v6 = vld [vmem:[%s8420_s30 + $0x70] sm:$0xff]  ;;  %443 = vst.msk [vmem:[#allocation2 + $0x130] sm:$0xff] %vm425_vm0, %v337_v10  ;;  %v8624_v13 = vpack.c.bf16 %v503_v5, %v502_v2  ;;  %v8026_v16 = vld [vmem:[%s11174_s1 + $0x148] sm:$0xff]   ;;  %v8028_v29 = vld [vmem:[%s11174_s1 + $0x140] sm:$0xff]  }
  0x66   : > { %440 = vst.msk [vmem:[#allocation2 + $0x108] sm:$0xff] %vm425_vm0, %v334_v6  ;;  %v526_v17 = vld [vmem:[#allocation2 + $0x49] sm:$0xff]  ;;  %6633 = vmatprep.subr.bf16.mxu0 %v8026_v16  ;;  %v529_v41 = vld [vmem:[#allocation2 + $0x71] sm:$0xff] }
  0x67   : > { %1627 = vmatmul.mubr.bf16.gmra.mxu1 %v8560_v34  ;;  %v8027_v19 = vld [vmem:[%s11174_s1 + $0x108] sm:$0xff]   ;;  %v338_v21 = vld [vmem:[%s8420_s30 + $0x90] sm:$0xff]  ;;  %v8642_v28 = vpack.c.bf16 %v527_v18, %v526_v17  ;;  %v8041_v17 = vld [vmem:[%s11174_s1 + $0x1d8] sm:$0xff]  }
  0x68   : > { %6522 = vmatpush3.bf16.msra.mxu1 %v8016_v31  ;;  %1667 = vmatprep.mubr.bf16.mxu1 %v8496_v56  ;;  %v332_v56 = vld [vmem:[%s8420_s30 + $0x60] sm:$0xff]  ;;  %v471_v24 = vld [vmem:[#allocation2 + $0xcf] sm:$0xff]  ;;  %444 = vst.msk [vmem:[#allocation2 + $0x148] sm:$0xff] %vm425_vm0, %v338_v21 }
  0x69   : > { %6523 = vmatprep.subr.bf16.mxu1 %v8018_v38  ;;  %438 = vst.msk [vmem:[#allocation2 + $0xe8] sm:$0xff] %vm425_vm0, %v332_v56  ;;  %v505_v26 = vld [vmem:[#allocation2 + $0xf0] sm:$0xff]  ;;  %6634 = vmatpush3.bf16.msra.mxu0 %v8027_v19  ;;  %v8640_v27 = vpack.c.bf16 %v471_v24, %v470_v20  ;;  %v8029_v31 = vld [vmem:[%s11174_s1 + $0x100] sm:$0xff]   ;;  %v508_v59 = vld [vmem:[#allocation2 + $0x128] sm:$0xff] }
  0x6a   : > { %1539 = vmatmul.mubr.bf16.gmra.mxu0 %v8594_v54  ;;  %6635 = vmatprep.subr.bf16.mxu0 %v8028_v29  ;;  %v528_v37 = vld [vmem:[#allocation2 + $0x69] sm:$0xff]  ;;  %v533_v6 = vld [vmem:[#allocation2 + $0xb1] sm:$0xff] }
  0x6b   : > { %1546 = vmatprep.mubr.bf16.mxu0 %v8601_v61  ;;  %v507_v44 = vld [vmem:[#allocation2 + $0x110] sm:$0xff]  ;;  %v8668_v47 = vpack.c.bf16 %v529_v41, %v528_v37  ;;  %v8036_v62 = vld [vmem:[%s11174_s1 + $0x1e8] sm:$0xff]   ;;  %v8043_v20 = vld [vmem:[%s11174_s1 + $0x198] sm:$0xff]  }
  0x6c   : > { %6524 = vmatpush3.bf16.msra.mxu1 %v8019_v42  ;;  %v8033_v50 = vld [vmem:[%s11174_s1 + $0x1f0] sm:$0xff]   ;;  %v8037_v1 = vld [vmem:[%s11174_s1 + $0x1a8] sm:$0xff]  }
  0x6d   : > { %6636 = vmatpush3.bf16.msra.mxu0 %v8029_v31  ;;  %v506_v42 = vld [vmem:[#allocation2 + $0x108] sm:$0xff]  ;;  %6733 = vmatprep.subr.bf16.mxu1 %v8030_v43  ;;  %v8034_v56 = vld [vmem:[%s11174_s1 + $0x1b0] sm:$0xff]  }
  0x6e   : > { %v8675_v49 = vpack.c.bf16 %v507_v44, %v506_v42  ;;  %7813 = vmatprep.subr.bf16.mxu0 %v8673_v48  ;;  %v530_v51 = vld [vmem:[#allocation2 + $0x89] sm:$0xff]  ;;  %v535_v31 = vld [vmem:[#allocation2 + $0xd1] sm:$0xff] }
  0x6f   : > { %1668 = vmatmul.mubr.bf16.vlgmr.msra.gmra.mxu1 %v749_v55  ;;  %v474_v52 = vld [vmem:[#allocation2 + $0x107] sm:$0xff]  ;;  %v531_v55 = vld [vmem:[#allocation2 + $0x91] sm:$0xff] }
  0x70   : > { %1675 = vmatprep.mubr.bf16.mxu1 %v8531_v14  ;;  %v504_v25 = vld [vmem:[#allocation2 + $0xe8] sm:$0xff]  ;;  %6734 = vmatpush3.bf16.msra.mxu1 %v8031_v45  ;;  %v509_v60 = vld [vmem:[#allocation2 + $0x130] sm:$0xff]  ;;  %v8693_v0 = vpack.c.bf16 %v531_v55, %v530_v51  ;;  %v8048_v45 = vld [vmem:[%s11174_s1 + $0x1c0] sm:$0xff]  }
  0x71   : > { %v8647_v30 = vpack.c.bf16 %v505_v26, %v504_v25  ;;  %v472_v38 = vld [vmem:[#allocation2 + $0xe7] sm:$0xff]  ;;  %v473_v39 = vld [vmem:[#allocation2 + $0xef] sm:$0xff]  ;;  %6735 = vmatprep.subr.bf16.mxu1 %v8033_v50  ;;  %v8698_v2 = vpack.c.bf16 %v509_v60, %v508_v59 }
  0x72   : > { %1547 = vmatmul.mubr.bf16.gmra.mxu0 %v8618_v11  ;;  %v8666_v46 = vpack.c.bf16 %v473_v39, %v472_v38  ;;  %v475_v58 = vld [vmem:[#allocation2 + $0x10f] sm:$0xff]  ;;  %v476_v3 = vld [vmem:[#allocation2 + $0x127] sm:$0xff] }
  0x73   : > { %1554 = vmatprep.mubr.bf16.mxu0 %v8624_v13  ;;  %v8691_v63 = vpack.c.bf16 %v475_v58, %v474_v52  ;;  %v477_v4 = vld [vmem:[#allocation2 + $0x12f] sm:$0xff]  ;;  %v478_v25 = vld [vmem:[#allocation2 + $0x147] sm:$0xff] }
  0x74   : > { %6736 = vmatpush3.bf16.msra.mxu1 %v8034_v56  ;;  %v532_v5 = vld [vmem:[#allocation2 + $0xa9] sm:$0xff]  ;;  %v8713_v18 = vpack.c.bf16 %v477_v4, %v476_v3  ;;  %v8049_v50 = vld [vmem:[%s11174_s1 + $0x180] sm:$0xff]   ;;  %v537_v56 = vld [vmem:[#allocation2 + $0xf1] sm:$0xff] }
  0x75   : > { %6737 = vmatprep.subr.bf16.mxu1 %v8036_v62  ;;  %v510_v10 = vld [vmem:[#allocation2 + $0x148] sm:$0xff]  ;;  %v511_v16 = vld [vmem:[#allocation2 + $0x150] sm:$0xff]  ;;  %v8715_v19 = vpack.c.bf16 %v533_v6, %v532_v5 }
  0x76   : > { %v8720_v21 = vpack.c.bf16 %v511_v16, %v510_v10  ;;  %v8044_v23 = vld [vmem:[%s11174_s1 + $0x1d0] sm:$0xff]   ;;  %v8046_v37 = vld [vmem:[%s11174_s1 + $0x1c8] sm:$0xff]  }
  0x77   : > { %1676 = vmatmul.mubr.bf16.gmra.mxu1 %v8620_v12  ;;  %v350_v24 = vld [vmem:[%s8420_s30 + $0xf0] sm:$0xff]  ;;  %v512_v38 = vld [vmem:[#allocation2 + $0x168] sm:$0xff]  ;;  %s11003_s30 = scalar_lea.vmem %s11181_s8, %s6331_s12 }
  0x78   : > { %1683 = vmatprep.mubr.bf16.mxu1 %v8558_v33  ;;  %6738 = vmatpush3.bf16.msra.mxu1 %v8037_v1  ;;  %v479_v26 = vld [vmem:[#allocation2 + $0x14f] sm:$0xff]  ;;  %456 = vst.msk [vmem:[#allocation2 + $0x208] sm:$0xff] %vm425_vm0, %v350_v24  ;;  %v480_v52 = vld [vmem:[#allocation2 + $0x167] sm:$0xff] }
  0x79   : > { %6739 = vmatprep.subr.bf16.mxu1 %v8039_v8  ;;  %v534_v29 = vld [vmem:[#allocation2 + $0xc9] sm:$0xff]  ;;  %v8742_v42 = vpack.c.bf16 %v479_v26, %v478_v25  ;;  %v539_v62 = vld [vmem:[#allocation2 + $0x111] sm:$0xff]  ;;  %v8042_v8 = vld [vmem:[%s11174_s1 + $0x220] sm:$0xff]  }
  0x7a   : > { %1555 = vmatmul.mubr.bf16.gmra.mxu0 %v8640_v27  ;;  %v8045_v32 = vld [vmem:[%s11174_s1 + $0x190] sm:$0xff]   ;;  %v8047_v41 = vld [vmem:[%s11174_s1 + $0x188] sm:$0xff]   ;;  %v8744_v43 = vpack.c.bf16 %v535_v31, %v534_v29 }
  0x7b   : > { %1562 = vmatprep.mubr.bf16.mxu0 %v8647_v30  ;;  %v513_v39 = vld [vmem:[#allocation2 + $0x170] sm:$0xff]  ;;  %v8038_v6 = vld [vmem:[%s11174_s1 + $0x228] sm:$0xff]  }
  0x7c   : > { %6740 = vmatpush3.bf16.msra.mxu1 %v8040_v9  ;;  %v8746_v44 = vpack.c.bf16 %v513_v39, %v512_v38  ;;  %v536_v51 = vld [vmem:[#allocation2 + $0xe9] sm:$0xff]  ;;  %v541_v5 = vld [vmem:[#allocation2 + $0x131] sm:$0xff] }
  0x7d   : > { %6741 = vmatprep.subr.bf16.mxu1 %v8041_v17  ;;  %v481_v55 = vld [vmem:[#allocation2 + $0x16f] sm:$0xff]  ;;  %v8760_v59 = vpack.c.bf16 %v537_v56, %v536_v51 }
  0x7e   : > { %v8758_v58 = vpack.c.bf16 %v481_v55, %v480_v52  ;;  %v538_v60 = vld [vmem:[#allocation2 + $0x109] sm:$0xff]  ;;  %v543_v9 = vld [vmem:[#allocation2 + $0x151] sm:$0xff] }
  0x7f   : > { %1684 = vmatmul.mubr.bf16.gmra.mxu1 %v8642_v28  ;;  %v8766_v1 = vpack.c.bf16 %v539_v62, %v538_v60  ;;  %v8035_v3 = vld [vmem:[%s11174_s1 + $0x230] sm:$0xff]  }
  0x80   : > { %1691 = vmatprep.mubr.bf16.mxu1 %v8594_v54  ;;  %6742 = vmatpush3.bf16.msra.mxu1 %v8043_v20  ;;  %v540_v4 = vld [vmem:[#allocation2 + $0x129] sm:$0xff]  ;;  %v545_v17 = vld [vmem:[#allocation2 + $0x171] sm:$0xff] }
  0x81   : > { %6743 = vmatprep.subr.bf16.mxu1 %v8044_v23  ;;  %v8051_v10 = vld [vmem:[%s11174_s1 + $0x210] sm:$0xff]   ;;  %v8053_v23 = vld [vmem:[%s11174_s1 + $0x200] sm:$0xff]  }
  0x82   : > { %1563 = vmatmul.mubr.bf16.gmra.mxu0 %v8666_v46  ;;  %v544_v16 = vld [vmem:[#allocation2 + $0x169] sm:$0xff]  ;;  %v547_v25 = vld [vmem:[#allocation2 + $0x191] sm:$0xff] }
  0x83   : > { %1570 = vmatprep.mubr.bf16.mxu0 %v8675_v49  ;;  %v8803_v20 = vpack.c.bf16 %v545_v17, %v544_v16  ;;  %v546_v24 = vld [vmem:[#allocation2 + $0x189] sm:$0xff]  ;;  %v549_v26 = vld [vmem:[#allocation2 + $0x1b1] sm:$0xff] }
  0x84   : > { %6744 = vmatpush3.bf16.msra.mxu1 %v8045_v32  ;;  %v551_v31 = vld [vmem:[#allocation2 + $0x1d1] sm:$0xff] }
  0x85   : > { %6745 = vmatprep.subr.bf16.mxu1 %v8046_v37  ;;  %v585_v32 = vld [vmem:[#allocation2 + $0x20f] sm:$0xff] }
  0x86   : > { %v553_v38 = vld [vmem:[#allocation2 + $0x1f1] sm:$0xff] }
  0x87   : > { %1692 = vmatmul.mubr.bf16.gmra.mxu1 %v8668_v47  ;;  %v649_v16 = vld [vmem:[#allocation2 + $0x211] sm:$0xff] }
  0x88   : > { %1699 = vmatprep.mubr.bf16.mxu1 %v8618_v11  ;;  %6746 = vmatpush3.bf16.msra.mxu1 %v8047_v41  ;;  %v609_v41 = vld [vmem:[#allocation2 + $0x190] sm:$0xff] }
  0x89   : > { %6747 = vmatprep.subr.bf16.mxu1 %v8048_v45  ;;  %v612_v45 = vld [vmem:[#allocation2 + $0x1c8] sm:$0xff] }
  0x8a   : > { %1571 = vmatmul.mubr.bf16.gmra.mxu0 %v8691_v63 }
  0x8b   : > { %1578 = vmatprep.mubr.bf16.mxu0 %v8698_v2 }
  0x8c   : > { %6748 = vmatpush3.bf16.msra.mxu1 %v8049_v50  ;;  %v613_v50 = vld [vmem:[#allocation2 + $0x1d0] sm:$0xff] }
  0x8d   : > { %v8872_v60 = vpack.c.bf16 %v613_v50, %v612_v45 }
  0x8f   : > { %1700 = vmatmul.mubr.bf16.gmra.mxu1 %v8693_v0 }
  0x90   : > { %1707 = vmatprep.mubr.bf16.mxu1 %v8640_v27 }
  0x92   : > { %1579 = vmatmul.mubr.bf16.gmra.mxu0 %v8713_v18 }
  0x93   : > { %1586 = vmatprep.mubr.bf16.mxu0 %v8720_v21 }
  0x97   : > { %1708 = vmatmul.mubr.bf16.gmra.mxu1 %v8715_v19 }
  0x98   : > { %1715 = vmatprep.mubr.bf16.mxu1 %v8666_v46 }
  0x9a   : > { %1587 = vmatmul.mubr.bf16.gmra.mxu0 %v8742_v42 }
  0x9b   : > { %1594 = vmatprep.mubr.bf16.mxu0 %v8746_v44 }
  0x9f   : > { %1716 = vmatmul.mubr.bf16.gmra.mxu1 %v8744_v43 }
  0xa0   : > { %1723 = vmatprep.mubr.bf16.mxu1 %v8691_v63 }
  0xa2   : > { %1595 = vmatmul.mubr.bf16.gmra.mxu0 %v8758_v58 }
  0xa3   : > { %1828 = vmatprep.mubr.bf16.mxu0 %v8620_v12  ;;  %v8779_v12 = vpack.c.bf16 %v541_v5, %v540_v4 }
  0xa7   : > { %1724 = vmatmul.mubr.bf16.gmra.mxu1 %v8760_v59 }
  0xa8   : > { %1731 = vmatprep.mubr.bf16.mxu1 %v8713_v18 }
  0xaa   : > { %1829 = vmatmul.mubr.bf16.vlgmr.msra.gmra.mxu0 %v8472_v40  ;;  %v542_v40 = vld [vmem:[#allocation2 + $0x149] sm:$0xff] }
  0xab   : > { %7814 = vmatpush3.bf16.msra.mxu0 %v8673_v48  ;;  %1836 = vmatprep.mubr.bf16.mxu0 %v8642_v28  ;;  %v8050_v28 = vld [vmem:[%s11174_s1 + $0x218] sm:$0xff]   ;;  %v8791_v48 = vpack.c.bf16 %v543_v9, %v542_v40  ;;  %v615_v40 = vld [vmem:[#allocation2 + $0x1f0] sm:$0xff] }
  0xac   : > { %7815 = vmatprep.subr.bf16.mxu0 %v8035_v3 }
  0xaf   : > { %1732 = vmatmul.mubr.bf16.gmra.mxu1 %v8766_v1  ;;  %7816 = vmatpush3.bf16.msra.mxu0 %v8035_v3 }
  0xb0   : > { %1739 = vmatprep.mubr.bf16.mxu1 %v8742_v42  ;;  %7817 = vmatprep.subr.bf16.mxu0 %v8038_v6 }
  0xb2   : > { %1837 = vmatmul.mubr.bf16.gmra.mxu0 %v8522_v7 }
  0xb3   : > { %1844 = vmatprep.mubr.bf16.mxu0 %v8668_v47  ;;  %7818 = vmatpush3.bf16.msra.mxu0 %v8038_v6  ;;  %v8052_v47 = vld [vmem:[%s11174_s1 + $0x208] sm:$0xff]  }
  0xb4   : > { %7819 = vmatprep.subr.bf16.mxu0 %v8042_v8 }
  0xb7   : > { %1740 = vmatmul.mubr.bf16.gmra.mxu1 %v8779_v12  ;;  %7820 = vmatpush3.bf16.msra.mxu0 %v8042_v8  ;;  %v614_v8 = vld [vmem:[#allocation2 + $0x1e8] sm:$0xff] }
  0xb8   : > { %1747 = vmatprep.mubr.bf16.mxu1 %v8758_v58  ;;  %7821 = vmatprep.subr.bf16.mxu0 %v8050_v28 }
  0xba   : > { %1845 = vmatmul.mubr.bf16.gmra.mxu0 %v8544_v22 }
  0xbb   : > { %1852 = vmatprep.mubr.bf16.mxu0 %v8693_v0  ;;  %7822 = vmatpush3.bf16.msra.mxu0 %v8050_v28  ;;  %v548_v0 = vld [vmem:[#allocation2 + $0x1a9] sm:$0xff] }
  0xbc   : > { %7823 = vmatprep.subr.bf16.mxu0 %v8051_v10  ;;  %v8818_v29 = vpack.c.bf16 %v549_v26, %v548_v0 }
  0xbf   : > { %1748 = vmatmul.mubr.bf16.gmra.mxu1 %v8791_v48  ;;  %7824 = vmatpush3.bf16.msra.mxu0 %v8051_v10  ;;  %v648_v10 = vld [vmem:[#allocation2 + $0x209] sm:$0xff] }
  0xc0   : > { %1755 = vmatprep.mubr.bf16.mxu1 %v8464_v35  ;;  %7825 = vmatprep.subr.bf16.mxu0 %v8052_v47  ;;  %v8812_v35 = vpack.c.bf16 %v547_v25, %v546_v24  ;;  %v8892_v25 = vpack.c.bf16 %v615_v40, %v614_v8  ;;  %v720_v8 = vld [vmem:[#allocation2 + $0x91] sm:$0xff] }
  0xc2   : > { %1853 = vmatmul.mubr.bf16.gmra.mxu0 %v8592_v53 }
  0xc3   : > { %1860 = vmatprep.mubr.bf16.mxu0 %v8715_v19  ;;  %7826 = vmatpush3.bf16.msra.mxu0 %v8052_v47  ;;  %v584_v19 = vld [vmem:[#allocation2 + $0x207] sm:$0xff] }
  0xc4   : > { %7827 = vmatprep.subr.bf16.mxu0 %v8053_v23  ;;  %v8826_v37 = vpack.c.bf16 %v585_v32, %v584_v19  ;;  %v616_v32 = vld [vmem:[#allocation2 + $0x208] sm:$0xff] }
  0xc7   : > { %1756 = vmatmul.mubr.bf16.gmra.mxu1 %v8803_v20  ;;  %7828 = vmatpush3.bf16.msra.mxu0 %v8053_v23 }
  0xc8   : > { %1763 = vmatprep.mubr.bf16.mxu1 %v8498_v57  ;;  %v550_v57 = vld [vmem:[#allocation2 + $0x1c9] sm:$0xff] }
  0xc9   : > { %v8824_v36 = vpack.c.bf16 %v551_v31, %v550_v57 }
  0xca   : > { %1861 = vmatmul.mubr.bf16.gmra.mxu0 %v8601_v61 }
  0xcb   : > { %1868 = vmatprep.mubr.bf16.mxu0 %v8744_v43 }
  0xcf   : > { %1764 = vmatmul.mubr.bf16.gmra.mxu1 %v8812_v35 }
  0xd0   : > { %1771 = vmatprep.mubr.bf16.mxu1 %v8533_v15  ;;  %v552_v15 = vld [vmem:[#allocation2 + $0x1e9] sm:$0xff] }
  0xd1   : > { %v8832_v39 = vpack.c.bf16 %v553_v38, %v552_v15  ;;  %v617_v15 = vld [vmem:[#allocation2 + $0x210] sm:$0xff] }
  0xd2   : > { %1869 = vmatmul.mubr.bf16.gmra.mxu0 %v8624_v13 }
  0xd3   : > { %1876 = vmatprep.mubr.bf16.mxu0 %v8760_v59 }
  0xd7   : > { %1772 = vmatmul.mubr.bf16.gmra.mxu1 %v8818_v29 }
  0xd8   : > { %1779 = vmatprep.mubr.bf16.mxu1 %v8560_v34  ;;  %v608_v34 = vld [vmem:[#allocation2 + $0x188] sm:$0xff] }
  0xda   : > { %1877 = vmatmul.mubr.bf16.gmra.mxu0 %v8647_v30 }
  0xdb   : > { %1884 = vmatprep.mubr.bf16.mxu0 %v8766_v1 }
  0xdf   : > { %1780 = vmatmul.mubr.bf16.gmra.mxu1 %v8824_v36 }
  0xe0   : > { %1787 = vmatprep.mubr.bf16.mxu1 %v8826_v37 }
  0xe2   : > { %1885 = vmatmul.mubr.bf16.gmra.mxu0 %v8675_v49 }
  0xe3   : > { %1892 = vmatprep.mubr.bf16.mxu0 %v8779_v12 }
  0xe7   : > { %1788 = vmatmul.mubr.bf16.gmra.mxu1 %v8832_v39 }
  0xe8   : > { %1989 = vmatprep.mubr.bf16.mxu1 %v8522_v7  ;;  %v8850_v7 = vpack.c.bf16 %v609_v41, %v608_v34  ;;  %v715_v41 = vld [vmem:[#allocation2 + $0x49] sm:$0xff] }
  0xea   : > { %1893 = vmatmul.mubr.bf16.gmra.mxu0 %v8698_v2 }
  0xeb   : > { %1900 = vmatprep.mubr.bf16.mxu0 %v8791_v48 }
  0xef   : > { %1990 = vmatmul.mubr.bf16.vlgmr.msra.gmra.mxu1 %v8531_v14  ;;  %v8054_v14 = vld [vmem:[%s11176_s3 + $0x78] sm:$0xff]  }
  0xf0   : > { %1997 = vmatprep.mubr.bf16.mxu1 %v8544_v22  ;;  %v8055_v22 = vld [vmem:[%s11176_s3 + $0x38] sm:$0xff]   ;;  %6869 = vmatprep.subr.bf16.mxu1 %v8054_v14 }
  0xf1   : > { %6870 = vmatpush3.bf16.msra.mxu1 %v8055_v22  ;;  %v716_v14 = vld [vmem:[#allocation2 + $0x51] sm:$0xff] }
  0xf2   : > { %1901 = vmatmul.mubr.bf16.gmra.mxu0 %v8720_v21  ;;  %v755_v45 = vpack.c.bf16 %v716_v14, %v715_v41  ;;  %v723_v41 = vld [vmem:[#allocation2 + $0xc9] sm:$0xff]  ;;  %v724_v14 = vld [vmem:[#allocation2 + $0xd1] sm:$0xff] }
  0xf3   : > { %1908 = vmatprep.mubr.bf16.mxu0 %v8803_v20 }
  0xf7   : > { %1998 = vmatmul.mubr.bf16.gmra.mxu1 %v8558_v33  ;;  %v610_v33 = vld [vmem:[#allocation2 + $0x1a8] sm:$0xff] }
  0xf8   : > { %2005 = vmatprep.mubr.bf16.mxu1 %v8592_v53  ;;  %v611_v53 = vld [vmem:[#allocation2 + $0x1b0] sm:$0xff] }
  0xfa   : > { %1909 = vmatmul.mubr.bf16.gmra.mxu0 %v8746_v44 }
  0xfb   : > { %1916 = vmatprep.mubr.bf16.mxu0 %v8812_v35 }
  0xff   : > { %2006 = vmatmul.mubr.bf16.gmra.mxu1 %v8594_v54  ;;  %v8862_v54 = vpack.c.bf16 %v611_v53, %v610_v33 }
 0x100   : > { %2013 = vmatprep.mubr.bf16.mxu1 %v8601_v61  ;;  %v6413_v61 = vpop.f32.mrf.mxu0 }
 0x102   : > { %1917 = vmatmul.mubr.bf16.gmra.mxu0 %v8850_v7 }
 0x103   : > { %1924 = vmatprep.mubr.bf16.mxu0 %v8818_v29 }
 0x107   : > { %2014 = vmatmul.mubr.bf16.gmra.mxu1 %v8618_v11  ;;  %v6414_v11 = vpop.f32.mrf.mxu0 }
 0x108   : > { %2021 = vmatprep.mubr.bf16.mxu1 %v8624_v13  ;;  %v8868_v52 = vadd.f32 %v6414_v11, %v6413_v61  ;;  %v8059_v11 = vld [vmem:[%s11176_s3 + $0x28] sm:$0xff]  }
 0x109   : > { %v6416_v55 = vpop.f32.mrf.mxu0 }
 0x10a   : > { %1925 = vmatmul.mubr.bf16.gmra.mxu0 %v8862_v54 }
 0x10b   : > { %1932 = vmatprep.mubr.bf16.mxu0 %v8824_v36  ;;  %v6417_v62 = vpop.f32.mrf.mxu0 }
 0x10c   : > { %v8880_v3 = vadd.f32 %v6417_v62, %v6416_v55  ;;  %v717_v62 = vld [vmem:[#allocation2 + $0x69] sm:$0xff] }
 0x10f   : > { %v6485_v43 = vpop.f32.mrf.mxu1  ;;  %2022 = vmatmul.mubr.bf16.gmra.mxu1 %v8640_v27  ;;  %v8056_v27 = vld [vmem:[%s11176_s3 + $0x70] sm:$0xff]  }
 0x110   : > { %2029 = vmatprep.mubr.bf16.mxu1 %v8647_v30  ;;  %v8057_v30 = vld [vmem:[%s11176_s3 + $0x30] sm:$0xff]   ;;  %6871 = vmatprep.subr.bf16.mxu1 %v8056_v27 }
 0x111   : > { %v6486_v51 = vpop.f32.mrf.mxu1  ;;  %6872 = vmatpush3.bf16.msra.mxu1 %v8057_v30 }
 0x112   : > { %v8870_v13 = vadd.f32 %v6486_v51, %v6485_v43  ;;  %v6419_v5 = vpop.f32.mrf.mxu0  ;;  %1933 = vmatmul.mubr.bf16.gmra.mxu0 %v8872_v60  ;;  %v8908_v43 = vpack.c.bf16 %v617_v15, %v616_v32  ;;  %v721_v32 = vld [vmem:[#allocation2 + $0xa9] sm:$0xff]  ;;  %v722_v15 = vld [vmem:[#allocation2 + $0xb1] sm:$0xff] }
 0x113   : > { %v6488_v56 = vpop.f32.mrf.mxu1  ;;  %1940 = vmatprep.mubr.bf16.mxu0 %v8832_v39 }
 0x114   : > { %v6420_v9 = vpop.f32.mrf.mxu0 }
 0x115   : > { %v6489_v1 = vpop.f32.mrf.mxu1  ;;  %v8888_v17 = vadd.f32 %v6420_v9, %v6419_v5 }
 0x116   : > { %v8882_v4 = vadd.f32 %v6489_v1, %v6488_v56  ;;  %v6422_v23 = vpop.f32.mrf.mxu0  ;;  %v718_v1 = vld [vmem:[#allocation2 + $0x71] sm:$0xff] }
 0x117   : > { %v6491_v6 = vpop.f32.mrf.mxu1  ;;  %2030 = vmatmul.mubr.bf16.gmra.mxu1 %v8666_v46  ;;  %v8894_v46 = vpack.c.bf16 %v649_v16, %v648_v10  ;;  %v764_v16 = vpack.c.bf16 %v718_v1, %v717_v62  ;;  %v8061_v62 = vld [vmem:[%s11176_s3 + $0x20] sm:$0xff]  }
 0x118   : > { %2037 = vmatprep.mubr.bf16.mxu1 %v8675_v49  ;;  %v6423_v0 = vpop.f32.mrf.mxu0 }
 0x119   : > { %v6492_v28 = vpop.f32.mrf.mxu1  ;;  %v8896_v49 = vadd.f32 %v6423_v0, %v6422_v23 }
 0x11a   : > { %v8890_v47 = vadd.f32 %v6492_v28, %v6491_v6  ;;  %v6425_v31 = vpop.f32.mrf.mxu0  ;;  %1941 = vmatmul.mubr.bf16.gmra.mxu0 %v8892_v25  ;;  %v719_v6 = vld [vmem:[#allocation2 + $0x89] sm:$0xff] }
 0x11b   : > { %v6494_v24 = vpop.f32.mrf.mxu1  ;;  %1948 = vmatprep.mubr.bf16.mxu0 %v8894_v46  ;;  %v773_v23 = vpack.c.bf16 %v720_v8, %v719_v6 }
 0x11c   : > { %v6426_v38 = vpop.f32.mrf.mxu0 }
 0x11d   : > { %v6495_v26 = vpop.f32.mrf.mxu1  ;;  %v8904_v22 = vadd.f32 %v6426_v38, %v6425_v31 }
 0x11e   : > { %v8898_v57 = vadd.f32 %v6495_v26, %v6494_v24  ;;  %v6428_v53 = vpop.f32.mrf.mxu0  ;;  %v8934_v26 = vld [vmem:[%s11175_s2] ss:$0 sm:$0xff] }
 0x11f   : > { %v6497_v19 = vpop.f32.mrf.mxu1  ;;  %2038 = vmatmul.mubr.bf16.gmra.mxu1 %v8691_v63  ;;  %v8058_v63 = vld [vmem:[%s11176_s3 + $0x68] sm:$0xff]  }
 0x120   : > { %2045 = vmatprep.mubr.bf16.mxu1 %v8698_v2  ;;  %v6429_v2 = vpop.f32.mrf.mxu0  ;;  %6873 = vmatprep.subr.bf16.mxu1 %v8058_v63 }
 0x121   : > { %v6498_v34 = vpop.f32.mrf.mxu1  ;;  %v8916_v51 = vadd.f32 %v6429_v2, %v6428_v53  ;;  %6874 = vmatpush3.bf16.msra.mxu1 %v8059_v11  ;;  %v1509_v53 = vadd.f32 %v8868_v52, %v8934_v26  ;;  %v791_v11 = vpack.c.bf16 %v724_v14, %v723_v41  ;;  %v1512_v52 = vadd.f32 %v8880_v3, %v8934_v26  ;;  %v728_v3 = vld [vmem:[#allocation2 + $0x111] sm:$0xff] }
 0x122   : > { %v8906_v33 = vadd.f32 %v6498_v34, %v6497_v19  ;;  %v6431_v56 = vpop.f32.mrf.mxu0  ;;  %1949 = vmatmul.mubr.bf16.gmra.mxu0 %v8908_v43  ;;  %v1520_v14 = vadd.f32 %v8896_v49, %v8934_v26  ;;  %v1525_v49 = vadd.f32 %v8904_v22, %v8934_v26 }
 0x123   : > { %v6500_v61 = vpop.f32.mrf.mxu1  ;;  %7829 = vmatprep.mubr.bf16.mxu0 %v755_v45  ;;  %v1528_v22 = vadd.f32 %v8916_v51, %v8934_v26  ;;  %v8064_v51 = vld [vmem:[%s11176_s3 + $0xf8] sm:$0xff]  }
 0x124   : > { %v6432_v30 = vpop.f32.mrf.mxu0  ;;  %6981 = vmatprep.subr.bf16.mxu0 %v8064_v51 }
 0x125   : > { %v6501_v50 = vpop.f32.mrf.mxu1  ;;  %v8923_v40 = vadd.f32 %v6432_v30, %v6431_v56 }
 0x126   : > { %v8918_v55 = vadd.f32 %v6501_v50, %v6500_v61  ;;  %v6434_v28 = vpop.f32.mrf.mxu0  ;;  %v782_v50 = vpack.c.bf16 %v722_v15, %v721_v32 }
 0x127   : > { %v6503_v27 = vpop.f32.mrf.mxu1  ;;  %2046 = vmatmul.mubr.bf16.gmra.mxu1 %v8713_v18 }
 0x128   : > { %2053 = vmatprep.mubr.bf16.mxu1 %v8720_v21  ;;  %v6435_v24 = vpop.f32.mrf.mxu0 }
 0x129   : > { %v6504_v5 = vpop.f32.mrf.mxu1  ;;  %v8927_v0 = vadd.f32 %v6435_v24, %v6434_v28  ;;  %v671_v28 = vld [vmem:[#allocation2 + $0x187] sm:$0xff] }
 0x12a   : > { %v8925_v9 = vadd.f32 %v6504_v5, %v6503_v27  ;;  %v6437_v31 = vpop.f32.mrf.mxu0  ;;  %7830 = vmatmul.mubr.bf16.vlgmr.msra.gmra.mxu0 %v764_v16  ;;  %v727_v24 = vld [vmem:[#allocation2 + $0x109] sm:$0xff] }
 0x12b   : > { %v6506_v10 = vpop.f32.mrf.mxu1  ;;  %7833 = vmatprep.mubr.bf16.mxu0 %v773_v23 }
 0x12c   : > { %v6438_v38 = vpop.f32.mrf.mxu0 }
 0x12d   : > { %v6507_v18 = vpop.f32.mrf.mxu1  ;;  %v8940_v61 = vadd.f32 %v6438_v38, %v6437_v31 }
 0x12e   : > { %v8929_v21 = vadd.f32 %v6507_v18, %v6506_v10  ;;  %v6440_v63 = vpop.f32.mrf.mxu0  ;;  %v672_v10 = vld [vmem:[#allocation2 + $0x18f] sm:$0xff]  ;;  %v1517_v18 = vadd.f32 %v8888_v17, %v8934_v26 }
 0x12f   : > { %v6525_v19 = vpop.f32.mrf.mxu1  ;;  %2054 = vmatmul.mubr.bf16.gmra.mxu1 %v8742_v42  ;;  %v843_v15 = vpack.c.bf16 %v672_v10, %v671_v28  ;;  %v8063_v10 = vld [vmem:[%s11176_s3 + $0x18] sm:$0xff]  }
 0x130   : > { %2061 = vmatprep.mubr.bf16.mxu1 %v8746_v44  ;;  %v8060_v44 = vld [vmem:[%s11176_s3 + $0x60] sm:$0xff]   ;;  %v6441_v56 = vpop.f32.mrf.mxu0 }
 0x131   : > { %v6526_v34 = vpop.f32.mrf.mxu1  ;;  %v8952_v1 = vadd.f32 %v6441_v56, %v6440_v63  ;;  %6875 = vmatprep.subr.bf16.mxu1 %v8060_v44 }
 0x132   : > { %v6527_v45 = vadd.f32 %v6526_v34, %v6525_v19  ;;  %v6443_v5 = vpop.f32.mrf.mxu0  ;;  %7834 = vmatmul.mubr.bf16.gmra.mxu0 %v782_v50  ;;  %6876 = vmatpush3.bf16.msra.mxu1 %v8061_v62  ;;  %v673_v50 = vld [vmem:[#allocation2 + $0x1a7] sm:$0xff] }
 0x133   : > { %v6528_v2 = vpop.f32.mrf.mxu1  ;;  %7837 = vmatprep.mubr.bf16.mxu0 %v791_v11  ;;  %v674_v11 = vld [vmem:[#allocation2 + $0x1af] sm:$0xff] }
 0x134   : > { %v8942_v42 = vadd.f32 %v6527_v45, %v1509_v53  ;;  %v6444_v16 = vpop.f32.mrf.mxu0 }
 0x135   : > { %v6529_v27 = vpop.f32.mrf.mxu1  ;;  %v8960_v31 = vadd.f32 %v6444_v16, %v6443_v5  ;;  %v852_v5 = vpack.c.bf16 %v674_v11, %v673_v50  ;;  %v1536_v50 = vadd.f32 %v8927_v0, %v8934_v26  ;;  %v8066_v0 = vld [vmem:[%s11176_s3 + $0xf0] sm:$0xff]  }
 0x136   : > { %v6530_v30 = vadd.f32 %v6529_v27, %v6528_v2 }
 0x137   : > { %v6531_v6 = vpop.f32.mrf.mxu1  ;;  %2062 = vmatmul.mubr.bf16.gmra.mxu1 %v8758_v58  ;;  %v6446_v58 = vpop.f32.mrf.mxu0 }
 0x138   : > { %v8955_v8 = vadd.f32 %v6530_v30, %v1512_v52  ;;  %2069 = vmatprep.mubr.bf16.mxu1 %v8850_v7  ;;  %v809_v7 = vpack.c.bf16 %v728_v3, %v727_v24 }
 0x139   : > { %v6532_v23 = vpop.f32.mrf.mxu1  ;;  %v6447_v34 = vpop.f32.mrf.mxu0 }
 0x13a   : > { %v6533_v19 = vadd.f32 %v6532_v23, %v6531_v6  ;;  %v8966_v53 = vadd.f32 %v6447_v34, %v6446_v58  ;;  %7838 = vmatmul.mubr.bf16.gmra.mxu0 %v8760_v59  ;;  %v8062_v59 = vld [vmem:[%s11176_s3 + $0x58] sm:$0xff]   ;;  %v676_v58 = vld [vmem:[#allocation2 + $0x1cf] sm:$0xff] }
 0x13b   : > { %v6534_v32 = vpop.f32.mrf.mxu1  ;;  %v6449_v63 = vpop.f32.mrf.mxu0  ;;  %7841 = vmatprep.mubr.bf16.mxu0 %v809_v7  ;;  %6877 = vmatprep.subr.bf16.mxu1 %v8062_v59 }
 0x13c   : > { %v8962_v38 = vadd.f32 %v6533_v19, %v1517_v18  ;;  %v675_v18 = vld [vmem:[#allocation2 + $0x1c7] sm:$0xff]  ;;  %6878 = vmatpush3.bf16.msra.mxu1 %v8063_v10 }
 0x13d   : > { %v6535_v41 = vpop.f32.mrf.mxu1  ;;  %v6450_v44 = vpop.f32.mrf.mxu0 }
 0x13e   : > { %v6536_v45 = vadd.f32 %v6535_v41, %v6534_v32  ;;  %v8974_v27 = vadd.f32 %v6450_v44, %v6449_v63  ;;  %v8065_v32 = vld [vmem:[%s11176_s3 + $0xb8] sm:$0xff]  }
 0x13f   : > { %v6537_v2 = vpop.f32.mrf.mxu1  ;;  %2070 = vmatmul.mubr.bf16.gmra.mxu1 %v843_v15  ;;  %v6452_v52 = vpop.f32.mrf.mxu0  ;;  %6982 = vmatpush3.bf16.msra.mxu0 %v8065_v32 }
 0x140   : > { %v8969_v17 = vadd.f32 %v6536_v45, %v1520_v14  ;;  %2077 = vmatprep.mubr.bf16.mxu1 %v8862_v54  ;;  %v861_v14 = vpack.c.bf16 %v676_v58, %v675_v18  ;;  %6983 = vmatprep.subr.bf16.mxu0 %v8066_v0  ;;  %v1544_v18 = vadd.f32 %v8952_v1, %v8934_v26  ;;  %v8071_v1 = vld [vmem:[%s11176_s3 + $0xa8] sm:$0xff]  }
 0x141   : > { %v6538_v56 = vpop.f32.mrf.mxu1  ;;  %v6453_v54 = vpop.f32.mrf.mxu0  ;;  %v682_v0 = vld [vmem:[#allocation2 + $0x22f] sm:$0xff] }
 0x142   : > { %v6539_v62 = vadd.f32 %v6538_v56, %v6537_v2  ;;  %v8986_v16 = vadd.f32 %v6453_v54, %v6452_v52  ;;  %7842 = vmatmul.mubr.bf16.gmra.mxu0 %v8779_v12  ;;  %v1533_v12 = vadd.f32 %v8923_v40, %v8934_v26  ;;  %v678_v52 = vld [vmem:[#allocation2 + $0x1ef] sm:$0xff] }
 0x143   : > { %v6540_v30 = vpop.f32.mrf.mxu1  ;;  %v6455_v24 = vpop.f32.mrf.mxu0  ;;  %7845 = vmatprep.mubr.bf16.mxu0 %v8791_v48 }
 0x144   : > { %v8976_v6 = vadd.f32 %v6539_v62, %v1525_v49  ;;  %v677_v49 = vld [vmem:[#allocation2 + $0x1e7] sm:$0xff] }
 0x145   : > { %v6541_v28 = vpop.f32.mrf.mxu1  ;;  %v6456_v15 = vpop.f32.mrf.mxu0  ;;  %v870_v10 = vpack.c.bf16 %v678_v52, %v677_v49  ;;  %v681_v52 = vld [vmem:[#allocation2 + $0x227] sm:$0xff] }
 0x146   : > { %v6542_v23 = vadd.f32 %v6541_v28, %v6540_v30  ;;  %v9001_v34 = vadd.f32 %v6456_v15, %v6455_v24  ;;  %v8067_v30 = vld [vmem:[%s11176_s3 + $0xb0] sm:$0xff]  }
 0x147   : > { %v6543_v3 = vpop.f32.mrf.mxu1  ;;  %2078 = vmatmul.mubr.bf16.gmra.mxu1 %v852_v5  ;;  %v6458_v48 = vpop.f32.mrf.mxu0  ;;  %6984 = vmatpush3.bf16.msra.mxu0 %v8067_v30  ;;  %v745_v30 = vld [vmem:[#allocation2 + $0x229] sm:$0xff] }
 0x148   : > { %v8989_v19 = vadd.f32 %v6542_v23, %v1528_v22  ;;  %2085 = vmatprep.mubr.bf16.mxu1 %v8872_v60  ;;  %v8068_v23 = vld [vmem:[%s11176_s3 + $0x50] sm:$0xff]  }
 0x149   : > { %v6544_v7 = vpop.f32.mrf.mxu1  ;;  %v6459_v63 = vpop.f32.mrf.mxu0  ;;  %6879 = vmatprep.subr.bf16.mxu1 %v8068_v23 }
 0x14a   : > { %v6545_v60 = vadd.f32 %v6544_v7, %v6543_v3  ;;  %v9007_v11 = vadd.f32 %v6459_v63, %v6458_v48  ;;  %7846 = vmatmul.mubr.bf16.gmra.mxu0 %v8803_v20  ;;  %v1541_v20 = vadd.f32 %v8940_v61, %v8934_v26  ;;  %v8069_v61 = vld [vmem:[%s11176_s3 + $0x10] sm:$0xff]   ;;  %v8070_v7 = vld [vmem:[%s11176_s3 + $0xe8] sm:$0xff]  }
 0x14b   : > { %v6546_v41 = vpop.f32.mrf.mxu1  ;;  %v6461_v56 = vpop.f32.mrf.mxu0  ;;  %7849 = vmatprep.mubr.bf16.mxu0 %v8812_v35  ;;  %6880 = vmatpush3.bf16.msra.mxu1 %v8069_v61  ;;  %v8198_v63 = vld [vmem:[#allocation2 + $0x8] sm:$0xff] }
 0x14c   : > { %v9003_v45 = vadd.f32 %v6545_v60, %v1533_v12  ;;  %6985 = vmatprep.subr.bf16.mxu0 %v8070_v7  ;;  %v1560_v7 = vadd.f32 %v8986_v16, %v8934_v26 }
 0x14d   : > { %v6547_v2 = vpop.f32.mrf.mxu1  ;;  %v6462_v5 = vpop.f32.mrf.mxu0  ;;  %6986 = vmatpush3.bf16.msra.mxu0 %v8071_v1 }
 0x14e   : > { %v6548_v44 = vadd.f32 %v6547_v2, %v6546_v41  ;;  %v9022_v54 = vadd.f32 %v6462_v5, %v6461_v56  ;;  %v9057_v2 = vpack.c.bf16 %v8198_v63, %v8198_v63  ;;  %v1552_v56 = vadd.f32 %v8966_v53, %v8934_v26  ;;  %v8072_v53 = vld [vmem:[%s11176_s3 + $0xe0] sm:$0xff]  }
 0x14f   : > { %v6549_v40 = vpop.f32.mrf.mxu1  ;;  %2086 = vmatmul.mubr.bf16.gmra.mxu1 %v861_v14  ;;  %6987 = vmatprep.subr.bf16.mxu0 %v8072_v53 }
 0x150   : > { %v9010_v62 = vadd.f32 %v6548_v44, %v1536_v50  ;;  %2093 = vmatprep.mubr.bf16.mxu1 %v8892_v25  ;;  %v9024_v25 = vpop.f32.mrf.mxu0  ;;  %11276 = vst [vmem:[#allocation4_spill] sm:$0xff] %v9057_v2 }
 0x151   : > { %v6550_v59 = vpop.f32.mrf.mxu1 }
 0x152   : > { %v6551_v28 = vadd.f32 %v6550_v59, %v6549_v40  ;;  %v9031_v24 = vpop.f32.mrf.mxu0  ;;  %7850 = vmatmul.mubr.bf16.gmra.mxu0 %v8818_v29  ;;  %v1549_v29 = vadd.f32 %v8960_v31, %v8934_v26  ;;  %v746_v59 = vld [vmem:[#allocation2 + $0x231] sm:$0xff] }
 0x153   : > { %v6552_v35 = vpop.f32.mrf.mxu1  ;;  %7853 = vmatprep.mubr.bf16.mxu0 %v8824_v36  ;;  %v890_v61 = vpack.c.bf16 %v746_v59, %v745_v30  ;;  %v1568_v59 = vadd.f32 %v9007_v11, %v8934_v26  ;;  %v6466_v11 = vadd.f32 %v9031_v24, %v9024_v25 }
 0x154   : > { %v9026_v22 = vadd.f32 %v6551_v28, %v1541_v20  ;;  %v6467_v51 = vpop.f32.mrf.mxu0  ;;  %v1557_v28 = vadd.f32 %v8974_v27, %v8934_v26  ;;  %v8075_v27 = vld [vmem:[%s11176_s3 + $0x8] sm:$0xff]  }
 0x155   : > { %v6553_v3 = vpop.f32.mrf.mxu1 }
 0x156   : > { %v6554_v58 = vadd.f32 %v6553_v3, %v6552_v35  ;;  %v6468_v12 = vpop.f32.mrf.mxu0  ;;  %v888_v3 = vpack.c.bf16 %v682_v0, %v681_v52 }
 0x157   : > { %v6555_v32 = vpop.f32.mrf.mxu1  ;;  %2094 = vmatmul.mubr.bf16.gmra.mxu1 %v870_v10  ;;  %v9051_v48 = vadd.f32 %v6468_v12, %v6467_v51 }
 0x158   : > { %v9039_v15 = vadd.f32 %v6554_v58, %v1544_v18  ;;  %2101 = vmatprep.mubr.bf16.mxu1 %v8908_v43  ;;  %v9053_v43 = vpop.f32.mrf.mxu0  ;;  %v8074_v58 = vld [vmem:[%s11176_s3 + $0x48] sm:$0xff]  }
 0x159   : > { %v6556_v60 = vpop.f32.mrf.mxu1  ;;  %6881 = vmatprep.subr.bf16.mxu1 %v8074_v58 }
 0x15a   : > { %v6557_v41 = vadd.f32 %v6556_v60, %v6555_v32  ;;  %v9059_v50 = vpop.f32.mrf.mxu0  ;;  %7854 = vmatmul.mubr.bf16.gmra.mxu0 %v8832_v39  ;;  %6882 = vmatpush3.bf16.msra.mxu1 %v8075_v27 }
 0x15b   : > { %v6558_v36 = vpop.f32.mrf.mxu1  ;;  %7857 = vmatprep.mubr.bf16.mxu0 %v8894_v46 }
 0x15c   : > { %v9055_v14 = vadd.f32 %v6557_v41, %v1549_v29  ;;  %v6473_v40 = vpop.f32.mrf.mxu0  ;;  %v8076_v41 = vld [vmem:[%s11176_s3 + $0xd8] sm:$0xff]  }
 0x15d   : > { %v6559_v44 = vpop.f32.mrf.mxu1 }
 0x15e   : > { %v6560_v31 = vadd.f32 %v6559_v44, %v6558_v36  ;;  %v6474_v20 = vpop.f32.mrf.mxu0  ;;  %v8077_v36 = vld [vmem:[%s11176_s3 + $0x98] sm:$0xff]   ;;  %v1565_v44 = vadd.f32 %v9001_v34, %v8934_v26 }
 0x15f   : > { %v6561_v49 = vpop.f32.mrf.mxu1  ;;  %2102 = vmatmul.mubr.bf16.gmra.mxu1 %v8826_v37  ;;  %v8073_v37 = vld [vmem:[%s11176_s3 + $0xa0] sm:$0xff]   ;;  %v9077_v35 = vadd.f32 %v6474_v20, %v6473_v40 }
 0x160   : > { %v9065_v5 = vadd.f32 %v6560_v31, %v1552_v56  ;;  %2109 = vmatprep.mubr.bf16.mxu1 %v9057_v2  ;;  %v9079_v23 = vpop.f32.mrf.mxu0  ;;  %6988 = vmatpush3.bf16.msra.mxu0 %v8073_v37 }
 0x161   : > { %v6562_v39 = vpop.f32.mrf.mxu1  ;;  %6989 = vmatprep.subr.bf16.mxu0 %v8076_v41  ;;  %v1576_v41 = vadd.f32 %v6466_v11, %v8934_v26 }
 0x162   : > { %v6563_v10 = vadd.f32 %v6562_v39, %v6561_v49  ;;  %v9089_v51 = vpop.f32.mrf.mxu0  ;;  %7858 = vmatmul.mubr.bf16.gmra.mxu0 %v890_v61  ;;  %v8078_v39 = vld [vmem:[%s11176_s3 + $0xd0] sm:$0xff]  }
 0x163   : > { %v6564_v46 = vpop.f32.mrf.mxu1 }
 0x164   : > { %v9081_v18 = vadd.f32 %v6563_v10, %v1557_v28  ;;  %v6479_v12 = vpop.f32.mrf.mxu0  ;;  %6990 = vmatpush3.bf16.msra.mxu0 %v8077_v36  ;;  %v8079_v28 = vld [vmem:[%s11176_s3 + $0x90] sm:$0xff]   ;;  %v8081_v36 = vld [vmem:[%s11176_s3] sm:$0xff]  }
 0x165   : > { %v6565_v32 = vpop.f32.mrf.mxu1  ;;  %6991 = vmatprep.subr.bf16.mxu0 %v8078_v39 }
 0x166   : > { %v6566_v1 = vadd.f32 %v6565_v32, %v6564_v46  ;;  %v6480_v16 = vpop.f32.mrf.mxu0 }
 0x167   : > { %v6567_v60 = vpop.f32.mrf.mxu1  ;;  %2110 = vmatmul.mubr.bf16.gmra.mxu1 %v888_v3  ;;  %v9104_v56 = vadd.f32 %v6480_v16, %v6479_v12  ;;  %v1573_v3 = vadd.f32 %v9022_v54, %v8934_v26  ;;  %v8080_v54 = vld [vmem:[%s11176_s3 + $0x40] sm:$0xff]  }
 0x168   : > { %v9093_v29 = vadd.f32 %v6566_v1, %v1560_v7  ;;  %3608 = vmatprep.mubr.bf16.mxu1 %v9057_v2  ;;  %v9106_v40 = vpop.f32.mrf.mxu0  ;;  %6992 = vmatpush3.bf16.msra.mxu0 %v8079_v28 }
 0x169   : > { %v6568_v63 = vpop.f32.mrf.mxu1  ;;  %6883 = vmatprep.subr.bf16.mxu1 %v8080_v54 }
 0x16a   : > { %v6569_v31 = vadd.f32 %v6568_v63, %v6567_v60  ;;  %v9110_v0 = vpop.f32.mrf.mxu0  ;;  %6884 = vmatpush3.bf16.msra.mxu1 %v8081_v36  ;;  %v1589_v36 = vadd.f32 %v9077_v35, %v8934_v26  ;;  %v8086_v35 = vld [vmem:[%s11176_s3 + $0x178] sm:$0xff]  }
 0x16b   : > { %v6570_v49 = vpop.f32.mrf.mxu1  ;;  %7093 = vmatprep.subr.bf16.mxu1 %v8086_v35 }
 0x16c   : > { %v9108_v52 = vadd.f32 %v6569_v31, %v1565_v44  ;;  %v6637_v20 = vpop.f32.mrf.mxu0  ;;  %v2416_v31 = vld [vmem:[#allocation3 + $0x7] sm:$0xff] }
 0x16d   : > { %v6571_v30 = vpop.f32.mrf.mxu1 }
 0x16e   : > { %v6572_v53 = vadd.f32 %v6571_v30, %v6570_v49  ;;  %v6638_v46 = vpop.f32.mrf.mxu0  ;;  %v2417_v49 = vld [vmem:[#allocation3 + $0xf] sm:$0xff] }
 0x16f   : > { %v6573_v37 = vpop.f32.mrf.mxu1  ;;  %v6639_v58 = vadd.f32 %v6638_v46, %v6637_v20  ;;  %v6472_v20 = vadd.f32 %v9059_v50, %v9053_v43 }
 0x170   : > { %v9114_v34 = vadd.f32 %v6572_v53, %v1568_v59  ;;  %v6640_v32 = vpop.f32.mrf.mxu0  ;;  %v9143_v53 = vpack.c.bf16 %v2417_v49, %v2416_v31 }
 0x171   : > { %v6574_v10 = vpop.f32.mrf.mxu1  ;;  %v9129_v1 = vadd.f32 %v6639_v58, %v8942_v42 }
 0x172   : > { %v6575_v61 = vadd.f32 %v6574_v10, %v6573_v37  ;;  %v6641_v60 = vpop.f32.mrf.mxu0  ;;  %11277 = vst [vmem:[#allocation5_spill] sm:$0xff] %v9143_v53  ;;  %v1581_v37 = vadd.f32 %v9051_v48, %v8934_v26  ;;  %v8083_v10 = vld [vmem:[%s11176_s3 + $0x88] sm:$0xff]   ;;  %3609 = vmatmul.mubr.bf16.vlgmr.msra.gmra.mxu1 %v9143_v53 }
 0x173   : > { %v6576_v27 = vpop.f32.mrf.mxu1  ;;  %v6642_v24 = vadd.f32 %v6641_v60, %v6640_v32  ;;  %v8084_v60 = vld [vmem:[%s11176_s3 + $0xc0] sm:$0xff]  }
 0x174   : > { %v9126_v7 = vadd.f32 %v6575_v61, %v1573_v3  ;;  %v6643_v63 = vpop.f32.mrf.mxu0  ;;  %v1584_v61 = vadd.f32 %v6472_v20, %v8934_v26 }
 0x175   : > { %v6577_v12 = vpop.f32.mrf.mxu1  ;;  %v9141_v42 = vadd.f32 %v6642_v24, %v8955_v8  ;;  %v8082_v8 = vld [vmem:[%s11176_s3 + $0xc8] sm:$0xff]  }
 0x176   : > { %v6578_v25 = vadd.f32 %v6577_v12, %v6576_v27  ;;  %v6644_v59 = vpop.f32.mrf.mxu0  ;;  %6993 = vmatprep.subr.bf16.mxu0 %v8082_v8 }
 0x177   : > { %v6579_v16 = vpop.f32.mrf.mxu1  ;;  %v6645_v28 = vadd.f32 %v6644_v59, %v6643_v63  ;;  %6994 = vmatpush3.bf16.msra.mxu0 %v8083_v10 }
 0x178   : > { %v9138_v44 = vadd.f32 %v6578_v25, %v1576_v41  ;;  %v6646_v3 = vpop.f32.mrf.mxu0  ;;  %6995 = vmatprep.subr.bf16.mxu0 %v8084_v60 }
 0x179   : > { %v6580_v30 = vpop.f32.mrf.mxu1  ;;  %v9159_v48 = vadd.f32 %v6645_v28, %v8962_v38  ;;  %v8085_v38 = vld [vmem:[%s11176_s3 + $0x80] sm:$0xff]  }
 0x17a   : > { %v6581_v39 = vadd.f32 %v6580_v30, %v6579_v16  ;;  %v6647_v50 = vpop.f32.mrf.mxu0  ;;  %v6478_v16 = vadd.f32 %v9089_v51, %v9079_v23  ;;  %v8087_v23 = vld [vmem:[%s11176_s3 + $0x138] sm:$0xff]  }
 0x17b   : > { %v6582_v46 = vpop.f32.mrf.mxu1  ;;  %v6648_v27 = vadd.f32 %v6647_v50, %v6646_v3  ;;  %6996 = vmatpush3.bf16.msra.mxu0 %v8085_v38  ;;  %7094 = vmatpush3.bf16.msra.mxu1 %v8087_v23  ;;  %v1597_v50 = vadd.f32 %v9104_v56, %v8934_v26 }
 0x17c   : > { %v9156_v11 = vadd.f32 %v6581_v39, %v1581_v37  ;;  %v6649_v12 = vpop.f32.mrf.mxu0  ;;  %v1592_v39 = vadd.f32 %v6478_v16, %v8934_v26 }
 0x17d   : > { %v6583_v43 = vpop.f32.mrf.mxu1  ;;  %v9168_v41 = vadd.f32 %v6648_v27, %v8969_v17 }
 0x17e   : > { %v6584_v58 = vadd.f32 %v6583_v43, %v6582_v46  ;;  %v6650_v24 = vpop.f32.mrf.mxu0 }
 0x17f   : > { %v6585_v32 = vpop.f32.mrf.mxu1  ;;  %v6651_v31 = vadd.f32 %v6650_v24, %v6649_v12 }
 0x180   : > { %v9165_v54 = vadd.f32 %v6584_v58, %v1584_v61  ;;  %v6652_v30 = vpop.f32.mrf.mxu0  ;;  %v6484_v61 = vadd.f32 %v9110_v0, %v9106_v40 }
 0x181   : > { %v6586_v25 = vpop.f32.mrf.mxu1  ;;  %v9180_v59 = vadd.f32 %v6651_v31, %v8976_v6 }
 0x182   : > { %v6587_v63 = vadd.f32 %v6586_v25, %v6585_v32  ;;  %v6653_v20 = vpop.f32.mrf.mxu0  ;;  %v8088_v32 = vld [vmem:[%s11176_s3 + $0x1f8] sm:$0xff]   ;;  %v1600_v56 = vadd.f32 %v6484_v61, %v8934_v26 }
 0x183   : > { %v6588_v49 = vpop.f32.mrf.mxu1  ;;  %v6654_v8 = vadd.f32 %v6653_v20, %v6652_v30  ;;  %7205 = vmatprep.subr.bf16.mxu0 %v8088_v32  ;;  %v1613_v32 = vadd.f32 %v8890_v47, %v8934_v26 }
 0x184   : > { %v9177_v17 = vadd.f32 %v6587_v63, %v1589_v36  ;;  %v6655_v10 = vpop.f32.mrf.mxu0 }
 0x185   : > { %v6589_v37 = vpop.f32.mrf.mxu1  ;;  %v9192_v6 = vadd.f32 %v6654_v8, %v8989_v19 }
 0x186   : > { %v6590_v28 = vadd.f32 %v6589_v37, %v6588_v49  ;;  %v6656_v43 = vpop.f32.mrf.mxu0 }
 0x187   : > { %v6591_v51 = vpop.f32.mrf.mxu1  ;;  %v6657_v27 = vadd.f32 %v6656_v43, %v6655_v10  ;;  %v8091_v43 = vld [vmem:[%s11176_s3 + $0x130] sm:$0xff]  }
 0x188   : > { %v9189_v46 = vadd.f32 %v6590_v28, %v1592_v39  ;;  %v6658_v60 = vpop.f32.mrf.mxu0 }
 0x189   : > { %v6592_v3 = vpop.f32.mrf.mxu1  ;;  %v9204_v38 = vadd.f32 %v6657_v27, %v9003_v45  ;;  %v1605_v45 = vadd.f32 %v8870_v13, %v8934_v26  ;;  %v8090_v13 = vld [vmem:[%s11176_s3 + $0x170] sm:$0xff]  }
 0x18a   : > { %v6593_v58 = vadd.f32 %v6592_v3, %v6591_v51  ;;  %v6659_v24 = vpop.f32.mrf.mxu0  ;;  %7095 = vmatprep.subr.bf16.mxu1 %v8090_v13 }
 0x18b   : > { %v6594_v12 = vpop.f32.mrf.mxu1  ;;  %v6660_v40 = vadd.f32 %v6659_v24, %v6658_v60  ;;  %7096 = vmatpush3.bf16.msra.mxu1 %v8091_v43 }
 0x18c   : > { %v9201_v19 = vadd.f32 %v6593_v58, %v1597_v50  ;;  %v6661_v16 = vpop.f32.mrf.mxu0 }
 0x18d   : > { %v6595_v25 = vpop.f32.mrf.mxu1  ;;  %v9210_v31 = vadd.f32 %v6660_v40, %v9010_v62  ;;  %v1608_v62 = vadd.f32 %v8882_v4, %v8934_v26 }
 0x18e   : > { %v6596_v36 = vadd.f32 %v6595_v25, %v6594_v12  ;;  %v6662_v30 = vpop.f32.mrf.mxu0 }
 0x18f   : > { %v6597_v0 = vpop.f32.mrf.mxu1  ;;  %v6663_v20 = vadd.f32 %v6662_v30, %v6661_v16 }
 0x190   : > { %v9207_v63 = vadd.f32 %v6596_v36, %v1600_v56  ;;  %v6664_v28 = vpop.f32.mrf.mxu0 }
 0x191   : > { %v6598_v49 = vpop.f32.mrf.mxu1  ;;  %v9217_v35 = vadd.f32 %v6663_v20, %v9026_v22 }
 0x192   : > { %v6599_v37 = vadd.f32 %v6598_v49, %v6597_v0  ;;  %v6665_v51 = vpop.f32.mrf.mxu0 }
 0x193   : > { %v6600_v39 = vpop.f32.mrf.mxu1  ;;  %v6666_v3 = vadd.f32 %v6665_v51, %v6664_v28 }
 0x194   : > { %v9214_v8 = vadd.f32 %v6599_v37, %v1605_v45  ;;  %v6667_v61 = vpop.f32.mrf.mxu0 }
 0x195   : > { %v6601_v23 = vpop.f32.mrf.mxu1  ;;  %v9230_v22 = vadd.f32 %v6666_v3, %v9039_v15  ;;  %v1616_v15 = vadd.f32 %v8898_v57, %v8934_v26 }
 0x196   : > { %v6602_v10 = vadd.f32 %v6601_v23, %v6600_v39  ;;  %v6668_v4 = vpop.f32.mrf.mxu0 }
 0x197   : > { %v6603_v50 = vpop.f32.mrf.mxu1  ;;  %v6669_v60 = vadd.f32 %v6668_v4, %v6667_v61  ;;  %v8095_v61 = vld [vmem:[%s11176_s3 + $0x128] sm:$0xff]  }
 0x198   : > { %v9227_v58 = vadd.f32 %v6602_v10, %v1608_v62  ;;  %v6670_v24 = vpop.f32.mrf.mxu0 }
 0x199   : > { %v6604_v27 = vpop.f32.mrf.mxu1  ;;  %v9237_v36 = vadd.f32 %v6669_v60, %v9055_v14  ;;  %v1621_v14 = vadd.f32 %v8906_v33, %v8934_v26  ;;  %v8094_v33 = vld [vmem:[%s11176_s3 + $0x168] sm:$0xff]   ;;  %v1629_v60 = vadd.f32 %v8925_v9, %v8934_v26 }
 0x19a   : > { %v6605_v12 = vadd.f32 %v6604_v27, %v6603_v50  ;;  %v6671_v0 = vpop.f32.mrf.mxu0  ;;  %7097 = vmatprep.subr.bf16.mxu1 %v8094_v33 }
 0x19b   : > { %v6606_v25 = vpop.f32.mrf.mxu1  ;;  %v6672_v49 = vadd.f32 %v6671_v0, %v6670_v24  ;;  %7098 = vmatpush3.bf16.msra.mxu1 %v8095_v61 }
 0x19c   : > { %v9234_v56 = vadd.f32 %v6605_v12, %v1613_v32  ;;  %v6673_v45 = vpop.f32.mrf.mxu0 }
 0x19d   : > { %v6607_v40 = vpop.f32.mrf.mxu1  ;;  %v9244_v47 = vadd.f32 %v6672_v49, %v9065_v5  ;;  %v1624_v5 = vadd.f32 %v8918_v55, %v8934_v26 }
 0x19e   : > { %v6608_v16 = vadd.f32 %v6607_v40, %v6606_v25  ;;  %v6674_v39 = vpop.f32.mrf.mxu0 }
 0x19f   : > { %v6609_v30 = vpop.f32.mrf.mxu1  ;;  %v6675_v23 = vadd.f32 %v6674_v39, %v6673_v45 }
 0x1a0   : > { %v9241_v37 = vadd.f32 %v6608_v16, %v1616_v15  ;;  %v6676_v62 = vpop.f32.mrf.mxu0 }
 0x1a1   : > { %v6610_v20 = vpop.f32.mrf.mxu1  ;;  %v9251_v57 = vadd.f32 %v6675_v23, %v9081_v18 }
 0x1a2   : > { %v6611_v28 = vadd.f32 %v6610_v20, %v6609_v30  ;;  %v6677_v13 = vpop.f32.mrf.mxu0 }
 0x1a3   : > { %v6612_v51 = vpop.f32.mrf.mxu1  ;;  %v6678_v50 = vadd.f32 %v6677_v13, %v6676_v62 }
 0x1a4   : > { %v9248_v10 = vadd.f32 %v6611_v28, %v1621_v14  ;;  %v6679_v4 = vpop.f32.mrf.mxu0 }
 0x1a5   : > { %v6613_v3 = vpop.f32.mrf.mxu1  ;;  %v9264_v18 = vadd.f32 %v6678_v50, %v9093_v29  ;;  %v1632_v29 = vadd.f32 %v8929_v21, %v8934_v26 }
 0x1a6   : > { %v6614_v43 = vadd.f32 %v6613_v3, %v6612_v51  ;;  %v6680_v55 = vpop.f32.mrf.mxu0 }
 0x1a7   : > { %v6615_v27 = vpop.f32.mrf.mxu1  ;;  %v6681_v24 = vadd.f32 %v6680_v55, %v6679_v4 }
 0x1a8   : > { %v9261_v32 = vadd.f32 %v6614_v43, %v1624_v5  ;;  %v6682_v0 = vpop.f32.mrf.mxu0  ;;  %v8098_v43 = vld [vmem:[%s11176_s3 + $0x160] sm:$0xff]  }
 0x1a9   : > { %v6616_v12 = vpop.f32.mrf.mxu1  ;;  %v9271_v16 = vadd.f32 %v6681_v24, %v9108_v52  ;;  %7099 = vmatprep.subr.bf16.mxu1 %v8098_v43 }
 0x1aa   : > { %v6617_v25 = vadd.f32 %v6616_v12, %v6615_v27  ;;  %v6683_v30 = vpop.f32.mrf.mxu0 }
 0x1ab   : > { %v6618_v40 = vpop.f32.mrf.mxu1  ;;  %v6684_v20 = vadd.f32 %v6683_v30, %v6682_v0  ;;  %v8103_v0 = vld [vmem:[%s11176_s3 + $0x118] sm:$0xff]  }
 0x1ac   : > { %v9268_v15 = vadd.f32 %v6617_v25, %v1629_v60  ;;  %v6685_v39 = vpop.f32.mrf.mxu0 }
 0x1ad   : > { %v6619_v49 = vpop.f32.mrf.mxu1  ;;  %v9280_v28 = vadd.f32 %v6684_v20, %v9114_v34  ;;  %v8099_v34 = vld [vmem:[%s11176_s3 + $0x120] sm:$0xff]  }
 0x1ae   : > { %v6620_v45 = vadd.f32 %v6619_v49, %v6618_v40  ;;  %v6686_v23 = vpop.f32.mrf.mxu0  ;;  %7100 = vmatpush3.bf16.msra.mxu1 %v8099_v34 }
 0x1af   : > { %v9275_v14 = vpop.f32.mrf.mxu1  ;;  %v6687_v52 = vadd.f32 %v6686_v23, %v6685_v39 }
 0x1b0   : > { %v9277_v9 = vadd.f32 %v6620_v45, %v1632_v29  ;;  %v6688_v62 = vpop.f32.mrf.mxu0 }
 0x1b1   : > { %v9282_v51 = vpop.f32.mrf.mxu1  ;;  %v9287_v13 = vadd.f32 %v6687_v52, %v9126_v7 }
 0x1b2   : > { %v6689_v21 = vpop.f32.mrf.mxu0 }
 0x1b3   : > { %v9284_v3 = vpop.f32.mrf.mxu1  ;;  %v6690_v5 = vadd.f32 %v6689_v21, %v6688_v62 }
 0x1b4   : > { %v6691_v50 = vpop.f32.mrf.mxu0 }
 0x1b5   : > { %v9289_v26 = vpop.f32.mrf.mxu1  ;;  %v9300_v61 = vadd.f32 %v6690_v5, %v9138_v44  ;;  %v8102_v44 = vld [vmem:[%s11176_s3 + $0x158] sm:$0xff]  }
 0x1b6   : > { %v6692_v7 = vpop.f32.mrf.mxu0  ;;  %7101 = vmatprep.subr.bf16.mxu1 %v8102_v44 }
 0x1b7   : > { %v9297_v33 = vpop.f32.mrf.mxu1  ;;  %11278 = vst [vmem:[#allocation6_spill] sm:$0xff] %v9300_v61  ;;  %v6693_v4 = vadd.f32 %v6692_v7, %v6691_v50  ;;  %7102 = vmatpush3.bf16.msra.mxu1 %v8103_v0 }
 0x1b8   : > { %v6694_v12 = vpop.f32.mrf.mxu0 }
 0x1b9   : > { %v9302_v27 = vpop.f32.mrf.mxu1  ;;  %v9307_v60 = vadd.f32 %v6693_v4, %v9156_v11 }
 0x1ba   : > { %v6695_v25 = vpop.f32.mrf.mxu0 }
 0x1bb   : > { %v9304_v55 = vpop.f32.mrf.mxu1  ;;  %v6696_v40 = vadd.f32 %v6695_v25, %v6694_v12 }
 0x1bc   : > { %v6697_v49 = vpop.f32.mrf.mxu0 }
 0x1bd   : > { %v9309_v24 = vpop.f32.mrf.mxu1  ;;  %v9320_v29 = vadd.f32 %v6696_v40, %v9165_v54 }
 0x1be   : > { %v6698_v11 = vpop.f32.mrf.mxu0 }
 0x1bf   : > { %v9317_v30 = vpop.f32.mrf.mxu1  ;;  %11279 = vst [vmem:[#allocation7_spill] sm:$0xff] %v9320_v29  ;;  %v6699_v20 = vadd.f32 %v6698_v11, %v6697_v49  ;;  %v8106_v49 = vld [vmem:[%s11176_s3 + $0x150] sm:$0xff]  }
 0x1c0   : > { %v6700_v39 = vpop.f32.mrf.mxu0  ;;  %7103 = vmatprep.subr.bf16.mxu1 %v8106_v49 }
 0x1c1   : > { %v9322_v45 = vpop.f32.mrf.mxu1  ;;  %v9327_v52 = vadd.f32 %v6699_v20, %v9177_v17 }
 0x1c2   : > { %v6701_v62 = vpop.f32.mrf.mxu0 }
 0x1c3   : > { %v9324_v23 = vpop.f32.mrf.mxu1  ;;  %11280 = vst [vmem:[#allocation8_spill] sm:$0xff] %v9327_v52  ;;  %v6702_v5 = vadd.f32 %v6701_v62, %v6700_v39 }
 0x1c4   : > { %v6703_v43 = vpop.f32.mrf.mxu0 }
 0x1c5   : > { %v9329_v21 = vpop.f32.mrf.mxu1  ;;  %v9334_v54 = vadd.f32 %v6702_v5, %v9189_v46  ;;  %v8107_v46 = vld [vmem:[%s11176_s3 + $0x110] sm:$0xff]  }
 0x1c6   : > { %v6704_v50 = vpop.f32.mrf.mxu0  ;;  %7104 = vmatpush3.bf16.msra.mxu1 %v8107_v46 }
 0x1c7   : > { %v9331_v34 = vpop.f32.mrf.mxu1  ;;  %11281 = vst [vmem:[#allocation9_spill] sm:$0xff] %v9334_v54  ;;  %v6705_v4 = vadd.f32 %v6704_v50, %v6703_v43 }
 0x1c8   : > { %v6706_v12 = vpop.f32.mrf.mxu0 }
 0x1c9   : > { %v9336_v7 = vpop.f32.mrf.mxu1  ;;  %v9341_v17 = vadd.f32 %v6705_v4, %v9201_v19 }
 0x1ca   : > { %v6707_v40 = vpop.f32.mrf.mxu0 }
 0x1cb   : > { %v9338_v25 = vpop.f32.mrf.mxu1  ;;  %11282 = vst [vmem:[#allocation10_spill] sm:$0xff] %v9341_v17  ;;  %v6708_v0 = vadd.f32 %v6707_v40, %v6706_v12 }
 0x1cc   : > { %v6709_v11 = vpop.f32.mrf.mxu0 }
 0x1cd   : > { %v9343_v44 = vpop.f32.mrf.mxu1  ;;  %v9354_v39 = vadd.f32 %v6708_v0, %v9207_v63 }
 0x1ce   : > { %v6710_v19 = vpop.f32.mrf.mxu0 }
 0x1cf   : > { %v9351_v20 = vpop.f32.mrf.mxu1  ;;  %11283 = vst [vmem:[#allocation11_spill] sm:$0xff] %v9354_v39  ;;  %v6711_v5 = vadd.f32 %v6710_v19, %v6709_v11 }
 0x1d0   : > { %v6712_v43 = vpop.f32.mrf.mxu0 }
 0x1d1   : > { %v9356_v62 = vpop.f32.mrf.mxu1  ;;  %v9361_v4 = vadd.f32 %v6711_v5, %v9214_v8 }
 0x1d2   : > { %v6713_v12 = vpop.f32.mrf.mxu0 }
 0x1d3   : > { %v9358_v50 = vpop.f32.mrf.mxu1  ;;  %11284 = vst [vmem:[#allocation12_spill] sm:$0xff] %v9361_v4  ;;  %v6714_v53 = vadd.f32 %v6713_v12, %v6712_v43  ;;  %v8110_v12 = vld [vmem:[%s11176_s3 + $0x148] sm:$0xff]  }
 0x1d4   : > { %v6715_v2 = vpop.f32.mrf.mxu0  ;;  %7105 = vmatprep.subr.bf16.mxu1 %v8110_v12 }
 0x1d5   : > { %v9363_v40 = vpop.f32.mrf.mxu1  ;;  %v9368_v63 = vadd.f32 %v6714_v53, %v9227_v58  ;;  %v8111_v53 = vld [vmem:[%s11176_s3 + $0x108] sm:$0xff]  }
 0x1d6   : > { %v6716_v0 = vpop.f32.mrf.mxu0  ;;  %7106 = vmatpush3.bf16.msra.mxu1 %v8111_v53  ;;  %v6757_v53 = vadd.f32 %v9302_v27, %v9297_v33  ;;  %v8114_v33 = vld [vmem:[%s11176_s3 + $0x140] sm:$0xff]  }
 0x1d7   : > { %v9365_v54 = vpop.f32.mrf.mxu1  ;;  %11285 = vst [vmem:[#allocation13_spill] sm:$0xff] %v9368_v63  ;;  %v6717_v46 = vadd.f32 %v6716_v0, %v6715_v2  ;;  %7107 = vmatprep.subr.bf16.mxu1 %v8114_v33 }
 0x1d8   : > { %v6718_v11 = vpop.f32.mrf.mxu0 }
 0x1d9   : > { %v9370_v49 = vpop.f32.mrf.mxu1  ;;  %v9375_v8 = vadd.f32 %v6717_v46, %v9234_v56 }
 0x1da   : > { %v6719_v5 = vpop.f32.mrf.mxu0 }
 0x1db   : > { %v9372_v19 = vpop.f32.mrf.mxu1  ;;  %11286 = vst [vmem:[#allocation14_spill] sm:$0xff] %v9375_v8  ;;  %v6720_v43 = vadd.f32 %v6719_v5, %v6718_v11 }
 0x1dc   : > { %v6721_v58 = vpop.f32.mrf.mxu0 }
 0x1dd   : > { %v9377_v4 = vpop.f32.mrf.mxu1  ;;  %v9388_v0 = vadd.f32 %v6720_v43, %v9241_v37 }
 0x1de   : > { %v6722_v56 = vpop.f32.mrf.mxu0 }
 0x1df   : > { %v9385_v2 = vpop.f32.mrf.mxu1  ;;  %v6723_v11 = vadd.f32 %v6722_v56, %v6721_v58 }
 0x1e0   : > { %v6724_v5 = vpop.f32.mrf.mxu0 }
 0x1e1   : > { %v9390_v46 = vpop.f32.mrf.mxu1  ;;  %v9395_v8 = vadd.f32 %v6723_v11, %v9248_v10  ;;  %v6751_v11 = vadd.f32 %v9282_v51, %v9275_v14  ;;  %v8115_v14 = vld [vmem:[%s11176_s3 + $0x100] sm:$0xff]  }
 0x1e2   : > { %v6725_v39 = vpop.f32.mrf.mxu0  ;;  %7108 = vmatpush3.bf16.msra.mxu1 %v8115_v14 }
 0x1e3   : > { %v9392_v63 = vpop.f32.mrf.mxu1  ;;  %11287 = vst [vmem:[#allocation15_spill] sm:$0xff] %v9395_v8  ;;  %v6726_v17 = vadd.f32 %v6725_v39, %v6724_v5 }
 0x1e4   : > { %v6727_v61 = vpop.f32.mrf.mxu0 }
 0x1e5   : > { %v9397_v52 = vpop.f32.mrf.mxu1  ;;  %v9402_v37 = vadd.f32 %v6726_v17, %v9261_v32  ;;  %v6760_v32 = vadd.f32 %v9309_v24, %v9304_v55 }
 0x1e6   : > { %v6728_v43 = vpop.f32.mrf.mxu0 }
 0x1e7   : > { %v9399_v29 = vpop.f32.mrf.mxu1  ;;  %11288 = vst [vmem:[#allocation16_spill] sm:$0xff] %v9402_v37  ;;  %v6729_v58 = vadd.f32 %v6728_v43, %v6727_v61  ;;  %v2000_v37 = vadd.f32 %v6757_v53, %v9159_v48  ;;  %v6754_v61 = vadd.f32 %v9289_v26, %v9284_v3  ;;  %v1992_v48 = vadd.f32 %v6751_v11, %v9129_v1 }
 0x1e8   : > { %v6730_v56 = vpop.f32.mrf.mxu0  ;;  %v6769_v53 = vadd.f32 %v9336_v7, %v9331_v34  ;;  %v6763_v3 = vadd.f32 %v9322_v45, %v9317_v30 }
 0x1e9   : > { %v9404_v12 = vpop.f32.mrf.mxu1  ;;  %v9413_v39 = vadd.f32 %v6729_v58, %v9268_v15  ;;  %v1995_v11 = vadd.f32 %v6754_v61, %v9141_v42 }
 0x1ea   : > { %v6731_v5 = vpop.f32.mrf.mxu0  ;;  %v2008_v14 = vadd.f32 %v6763_v3, %v9180_v59 }
 0x1eb   : > { %v9408_v10 = vpop.f32.mrf.mxu1  ;;  %v6732_v17 = vadd.f32 %v6731_v5, %v6730_v56  ;;  %v2003_v5 = vadd.f32 %v6760_v32, %v9168_v41  ;;  %v2016_v32 = vadd.f32 %v6769_v53, %v9204_v38  ;;  %v6781_v38 = vadd.f32 %v9370_v49, %v9365_v54 }
 0x1ec   : > { %v7831_v15 = vpop.f32.mrf.mxu0 }
 0x1ed   : > { %v9415_v8 = vpop.f32.mrf.mxu1  ;;  %v9431_v27 = vadd.f32 %v6732_v17, %v9277_v9  ;;  %v2161_v55 = vadd.f32 %v7831_v15, %v2000_v37  ;;  %v6772_v17 = vadd.f32 %v9343_v44, %v9338_v25  ;;  %v6766_v15 = vadd.f32 %v9329_v21, %v9324_v23 }
 0x1ee   : > { %v2152_v43 = vpop.f32.mrf.mxu0  ;;  %v6775_v21 = vadd.f32 %v9356_v62, %v9351_v20  ;;  %v2481_v20 = vld [vmem:[#allocation3 + $0x11] sm:$0xff] }
 0x1ef   : > { %v9426_v51 = vpop.f32.mrf.mxu1  ;;  %v2281_v58 = vmax.f32 %v2161_v55, 0.0  ;;  %v2153_v56 = vadd.f32 %v2152_v43, %v1992_v48  ;;  %v2019_v48 = vadd.f32 %v6772_v17, %v9210_v31  ;;  %v2011_v3 = vadd.f32 %v6766_v15, %v9192_v6  ;;  %v9477_v62 = vld [vmem:[%s11176_s3 + $0x238] sm:$0xff]  }
 0x1f0   : > { %v7832_v26 = vpop.f32.mrf.mxu0  ;;  %v6784_v31 = vadd.f32 %v9377_v4, %v9372_v19  ;;  %v6778_v6 = vadd.f32 %v9363_v40, %v9358_v50  ;;  %7861 = vmatprep.subr.bf16.mxu1 %v9477_v62 }
 0x1f1   : > { %v9434_v24 = vpop.f32.mrf.mxu1  ;;  %2386 = vst [vmem:[#allocation3 + $0x48] sm:$0xff] %v2281_v58  ;;  %v2279_v1 = vmax.f32 %v2153_v56, 0.0  ;;  %v2164_v37 = vadd.f32 %v7832_v26, %v2003_v5 }
 0x1f2   : > { %v2155_v34 = vpop.f32.mrf.mxu0 }
 0x1f3   : > { %v9441_v9 = vpop.f32.mrf.mxu1  ;;  %2384 = vst [vmem:[#allocation3 + $0x28] sm:$0xff] %v2279_v1  ;;  %v2282_v7 = vmax.f32 %v2164_v37, 0.0  ;;  %v2156_v41 = vadd.f32 %v2155_v34, %v1995_v11  ;;  %v2032_v37 = vadd.f32 %v6781_v38, %v9237_v36  ;;  %v2480_v11 = vld [vmem:[#allocation3 + $0x9] sm:$0xff] }
 0x1f4   : > { %v7835_v45 = vpop.f32.mrf.mxu0  ;;  %v9488_v15 = vpack.c.bf16 %v2481_v20, %v2480_v11 }
 0x1f5   : > { %v9446_v33 = vpop.f32.mrf.mxu1  ;;  %2387 = vst [vmem:[#allocation3 + $0x50] sm:$0xff] %v2282_v7  ;;  %v2280_v42 = vmax.f32 %v2156_v41, 0.0  ;;  %v2177_v61 = vadd.f32 %v7835_v45, %v2016_v32  ;;  %v9454_v25 = vpack.c.bf16 %v2282_v7, %v2281_v58  ;;  %v2024_v7 = vadd.f32 %v6775_v21, %v9217_v35 }
 0x1f6   : > { %v2168_v55 = vpop.f32.mrf.mxu0  ;;  %v2035_v32 = vadd.f32 %v6784_v31, %v9244_v47  ;;  %v6796_v31 = vadd.f32 %v9415_v8, %v9408_v10  ;;  %v8096_v8 = vld [vmem:[%s11176_s3 + $0x1e8] sm:$0xff]  }
 0x1f7   : > { %v9449_v30 = vpop.f32.mrf.mxu1  ;;  %2385 = vst [vmem:[#allocation3 + $0x30] sm:$0xff] %v2280_v42  ;;  %v2285_v43 = vmax.f32 %v2177_v61, 0.0  ;;  %v2169_v53 = vadd.f32 %v2168_v55, %v2008_v14  ;;  %v9461_v59 = vpack.c.bf16 %v2280_v42, %v2279_v1  ;;  %v6793_v42 = vadd.f32 %v9404_v12, %v9399_v29  ;;  %v8092_v29 = vld [vmem:[%s11176_s3 + $0x1f0] sm:$0xff]  }
 0x1f8   : > { %v7836_v23 = vpop.f32.mrf.mxu0  ;;  %v6787_v12 = vadd.f32 %v9390_v46, %v9385_v2 }
 0x1f9   : > { %v9456_v44 = vpop.f32.mrf.mxu1  ;;  %2390 = vst [vmem:[#allocation3 + $0x88] sm:$0xff] %v2285_v43  ;;  %v2283_v58 = vmax.f32 %v2169_v53, 0.0  ;;  %v2180_v5 = vadd.f32 %v7836_v23, %v2019_v48  ;;  %3616 = vmatprep.mubr.bf16.mxu1 %v9461_v59  ;;  %v8089_v48 = vld [vmem:[%s11176_s3 + $0x1b8] sm:$0xff]   ;;  %v2027_v53 = vadd.f32 %v6778_v6, %v9230_v22  ;;  %v2514_v23 = vld [vmem:[#allocation3 + $0x47] sm:$0xff] }
 0x1fa   : > { %v2171_v49 = vpop.f32.mrf.mxu0  ;;  %v2512_v45 = vld [vmem:[#allocation3 + $0x27] sm:$0xff]  ;;  %v2040_v6 = vadd.f32 %v6787_v12, %v9251_v57 }
 0x1fb   : > { %v9463_v56 = vpop.f32.mrf.mxu1  ;;  %2388 = vst [vmem:[#allocation3 + $0x68] sm:$0xff] %v2283_v58  ;;  %v2286_v26 = vmax.f32 %v2180_v5, 0.0  ;;  %v2172_v1 = vadd.f32 %v2171_v49, %v2011_v3  ;;  %v2048_v49 = vadd.f32 %v6793_v42, %v9271_v16  ;;  %v8097_v57 = vld [vmem:[%s11176_s3 + $0x1a8] sm:$0xff]  }
 0x1fc   : > { %v7839_v4 = vpop.f32.mrf.mxu0  ;;  %v2515_v50 = vld [vmem:[#allocation3 + $0x4f] sm:$0xff] }
 0x1fd   : > { %v9471_v54 = vpop.f32.mrf.mxu1  ;;  %2391 = vst [vmem:[#allocation3 + $0x90] sm:$0xff] %v2286_v26  ;;  %v2284_v19 = vmax.f32 %v2172_v1, 0.0  ;;  %v2193_v34 = vadd.f32 %v7839_v4, %v2032_v37  ;;  %v9490_v40 = vpack.c.bf16 %v2286_v26, %v2285_v43  ;;  %v9511_v3 = vpack.c.bf16 %v2515_v50, %v2514_v23  ;;  %v8093_v26 = vld [vmem:[%s11176_s3 + $0x1b0] sm:$0xff]  }
 0x1fe   : > { %v2184_v41 = vpop.f32.mrf.mxu0  ;;  %v2513_v14 = vld [vmem:[#allocation3 + $0x2f] sm:$0xff]  ;;  %v6790_v1 = vadd.f32 %v9397_v52, %v9392_v63  ;;  %v6805_v52 = vadd.f32 %v9456_v44, %v9449_v30  ;;  %v6799_v30 = vadd.f32 %v9434_v24, %v9426_v51  ;;  %v8101_v24 = vld [vmem:[%s11176_s3 + $0x1a0] sm:$0xff]  }
 0x1ff   : > { %v9481_v17 = vpop.f32.mrf.mxu1  ;;  %2389 = vst [vmem:[#allocation3 + $0x70] sm:$0xff] %v2284_v19  ;;  %v2289_v61 = vmax.f32 %v2193_v34, 0.0  ;;  %v2185_v35 = vadd.f32 %v2184_v41, %v2024_v7  ;;  %v9494_v55 = vpack.c.bf16 %v2513_v14, %v2512_v45  ;;  %v9502_v43 = vpack.c.bf16 %v2284_v19, %v2283_v58  ;;  %v2482_v16 = vld [vmem:[#allocation3 + $0x29] sm:$0xff]  ;;  %v2483_v4 = vld [vmem:[#allocation3 + $0x31] sm:$0xff] }
 0x200   : > { %v7840_v38 = vpop.f32.mrf.mxu0  ;;  %v2051_v45 = vadd.f32 %v6796_v31, %v9280_v28  ;;  %v2043_v42 = vadd.f32 %v6790_v1, %v9264_v18  ;;  %v8100_v28 = vld [vmem:[%s11176_s3 + $0x1e0] sm:$0xff]   ;;  %v2064_v51 = vadd.f32 %v6805_v52, %v9307_v60  ;;  %v2056_v60 = vadd.f32 %v6799_v30, %v9287_v13 }
 0x201   : > { %v9485_v36 = vpop.f32.mrf.mxu1  ;;  %2394 = vst [vmem:[#allocation3 + $0xc8] sm:$0xff] %v2289_v61  ;;  %v2287_v21 = vmax.f32 %v2185_v35, 0.0  ;;  %v2196_v5 = vadd.f32 %v7840_v38, %v2035_v32  ;;  %3769 = vmatprep.mubr.bf16.mxu0 %v9494_v55  ;;  %3617 = vmatmul.mubr.bf16.gmra.mxu1 %v9494_v55 }
 0x202   : > { %v2187_v58 = vpop.f32.mrf.mxu0  ;;  %3770 = vmatmul.mubr.bf16.vlgmr.msra.gmra.mxu0 %v9488_v15  ;;  %3624 = vmatprep.mubr.bf16.mxu1 %v9454_v25  ;;  %v2516_v35 = vld [vmem:[#allocation3 + $0x67] sm:$0xff] }
 0x203   : > { %v9499_v47 = vpop.f32.mrf.mxu1  ;;  %2392 = vst [vmem:[#allocation3 + $0xa8] sm:$0xff] %v2287_v21  ;;  %v2290_v2 = vmax.f32 %v2196_v5, 0.0  ;;  %v2188_v46 = vadd.f32 %v2187_v58, %v2027_v53  ;;  %3777 = vmatprep.mubr.bf16.mxu0 %v9511_v3  ;;  %7206 = vmatpush3.bf16.msra.mxu0 %v8089_v48  ;;  %v6802_v5 = vadd.f32 %v9446_v33, %v9441_v9 }
 0x204   : > { %v7843_v11 = vpop.f32.mrf.mxu0  ;;  %7207 = vmatprep.subr.bf16.mxu0 %v8092_v29  ;;  %v6808_v29 = vadd.f32 %v9471_v54, %v9463_v56  ;;  %v8104_v56 = vld [vmem:[%s11176_s3 + $0x1d8] sm:$0xff]  }
 0x205   : > { %v9513_v22 = vpop.f32.mrf.mxu1  ;;  %2395 = vst [vmem:[#allocation3 + $0xd0] sm:$0xff] %v2290_v2  ;;  %v2288_v10 = vmax.f32 %v2188_v46, 0.0  ;;  %v2209_v20 = vadd.f32 %v7843_v11, %v2048_v49  ;;  %v9530_v41 = vpack.c.bf16 %v2290_v2, %v2289_v61  ;;  %v9541_v61 = vpack.c.bf16 %v2483_v4, %v2482_v16  ;;  %v2484_v46 = vld [vmem:[#allocation3 + $0x49] sm:$0xff]  ;;  %v2485_v49 = vld [vmem:[#allocation3 + $0x51] sm:$0xff] }
 0x206   : > { %v2200_v34 = vpop.f32.mrf.mxu0  ;;  %v2517_v7 = vld [vmem:[#allocation3 + $0x6f] sm:$0xff]  ;;  %v8105_v16 = vld [vmem:[%s11176_s3 + $0x198] sm:$0xff]   ;;  %v9581_v52 = vpack.c.bf16 %v2485_v49, %v2484_v46 }
 0x207   : > { %v6815_v37 = vpop.f32.mrf.mxu1  ;;  %2393 = vst [vmem:[#allocation3 + $0xb0] sm:$0xff] %v2288_v10  ;;  %v2293_v63 = vmax.f32 %v2209_v20, 0.0  ;;  %v2201_v32 = vadd.f32 %v2200_v34, %v2040_v6  ;;  %7208 = vmatpush3.bf16.msra.mxu0 %v8093_v26  ;;  %v9543_v48 = vpack.c.bf16 %v2288_v10, %v2287_v21  ;;  %v9551_v53 = vpack.c.bf16 %v2517_v7, %v2516_v35  ;;  %v2519_v11 = vld [vmem:[#allocation3 + $0x8f] sm:$0xff]  ;;  %v11289_v20 = vld [vmem:[#allocation7_spill] sm:$0xff] }
 0x208   : > { %v7844_v50 = vpop.f32.mrf.mxu0  ;;  %7209 = vmatprep.subr.bf16.mxu0 %v8096_v8  ;;  %v2067_v6 = vadd.f32 %v6808_v29, %v11289_v20  ;;  %v11290_v34 = vld [vmem:[#allocation6_spill] sm:$0xff]  ;;  %v11293_v49 = vld [vmem:[#allocation11_spill] sm:$0xff]  ;;  %v11294_v20 = vld [vmem:[#allocation9_spill] sm:$0xff] }
 0x209   : > { %v6816_v19 = vpop.f32.mrf.mxu1  ;;  %2398 = vst [vmem:[#allocation3 + $0x108] sm:$0xff] %v2293_v63  ;;  %v2291_v44 = vmax.f32 %v2201_v32, 0.0  ;;  %v2212_v38 = vadd.f32 %v7844_v50, %v2051_v45  ;;  %3625 = vmatmul.mubr.bf16.gmra.mxu1 %v9511_v3  ;;  %v2059_v7 = vadd.f32 %v6802_v5, %v11290_v34  ;;  %v2486_v5 = vld [vmem:[#allocation3 + $0x69] sm:$0xff]  ;;  %v8116_v34 = vld [vmem:[%s11176_s3 + $0x1c0] sm:$0xff]  }
 0x20a   : > { %v2203_v23 = vpop.f32.mrf.mxu0  ;;  %3778 = vmatmul.mubr.bf16.gmra.mxu0 %v9541_v61  ;;  %3632 = vmatprep.mubr.bf16.mxu1 %v9502_v43  ;;  %v6817_v33 = vadd.f32 %v6816_v19, %v6815_v37  ;;  %v8108_v37 = vld [vmem:[%s11176_s3 + $0x1d0] sm:$0xff]   ;;  %v6811_v19 = vadd.f32 %v9485_v36, %v9481_v17 }
 0x20b   : > { %v9538_v14 = vpop.f32.mrf.mxu1  ;;  %2396 = vst [vmem:[#allocation3 + $0xe8] sm:$0xff] %v2291_v44  ;;  %v2294_v12 = vmax.f32 %v2212_v38, 0.0  ;;  %v2204_v21 = vadd.f32 %v2203_v23, %v2043_v42  ;;  %3785 = vmatprep.mubr.bf16.mxu0 %v9551_v53  ;;  %7210 = vmatpush3.bf16.msra.mxu0 %v8097_v57  ;;  %v11291_v17 = vld [vmem:[#allocation10_spill] sm:$0xff]  ;;  %v6814_v23 = vadd.f32 %v9513_v22, %v9499_v47 }
 0x20c   : > { %v7847_v31 = vpop.f32.mrf.mxu0  ;;  %7211 = vmatprep.subr.bf16.mxu0 %v8100_v28  ;;  %v2080_v36 = vadd.f32 %v6817_v33, %v11291_v17  ;;  %v8109_v38 = vld [vmem:[%s11176_s3 + $0x190] sm:$0xff]  }
 0x20d   : > { %v6819_v18 = vpop.f32.mrf.mxu1  ;;  %2399 = vst [vmem:[#allocation3 + $0x110] sm:$0xff] %v2294_v12  ;;  %v2292_v54 = vmax.f32 %v2204_v21, 0.0  ;;  %v2225_v2 = vadd.f32 %v7847_v31, %v2064_v51  ;;  %v9572_v9 = vpack.c.bf16 %v2294_v12, %v2293_v63  ;;  %v2518_v63 = vld [vmem:[#allocation3 + $0x87] sm:$0xff]  ;;  %v2487_v31 = vld [vmem:[#allocation3 + $0x71] sm:$0xff] }
 0x20e   : > { %v2216_v1 = vpop.f32.mrf.mxu0  ;;  %v9591_v50 = vpack.c.bf16 %v2519_v11, %v2518_v63  ;;  %v6820_v28 = vadd.f32 %v6819_v18, %v9538_v14  ;;  %v8112_v14 = vld [vmem:[%s11176_s3 + $0x1c8] sm:$0xff]   ;;  %v11292_v51 = vld [vmem:[#allocation8_spill] sm:$0xff] }
 0x20f   : > { %v9564_v58 = vpop.f32.mrf.mxu1  ;;  %2397 = vst [vmem:[#allocation3 + $0xf0] sm:$0xff] %v2292_v54  ;;  %v2297_v8 = vmax.f32 %v2225_v2, 0.0  ;;  %v2217_v10 = vadd.f32 %v2216_v1, %v2056_v60  ;;  %7212 = vmatpush3.bf16.msra.mxu0 %v8101_v24  ;;  %v9583_v32 = vpack.c.bf16 %v2292_v54, %v2291_v44  ;;  %v2072_v24 = vadd.f32 %v6811_v19, %v11292_v51  ;;  %v2521_v2 = vld [vmem:[#allocation3 + $0xaf] sm:$0xff] }
 0x210   : > { %v7848_v4 = vpop.f32.mrf.mxu0  ;;  %7213 = vmatprep.subr.bf16.mxu0 %v8104_v56  ;;  %v2083_v1 = vadd.f32 %v6820_v28, %v11293_v49  ;;  %v8113_v11 = vld [vmem:[%s11176_s3 + $0x188] sm:$0xff]   ;;  %v2489_v51 = vld [vmem:[#allocation3 + $0x91] sm:$0xff] }
 0x211   : > { %v9570_v26 = vpop.f32.mrf.mxu1  ;;  %2402 = vst [vmem:[#allocation3 + $0x148] sm:$0xff] %v2297_v8  ;;  %v2295_v45 = vmax.f32 %v2217_v10, 0.0  ;;  %v2228_v57 = vadd.f32 %v7848_v4, %v2067_v6  ;;  %3633 = vmatmul.mubr.bf16.gmra.mxu1 %v9551_v53  ;;  %v2075_v6 = vadd.f32 %v6814_v23, %v11294_v20  ;;  %v2520_v4 = vld [vmem:[#allocation3 + $0xa7] sm:$0xff] }
 0x212   : > { %v2219_v35 = vpop.f32.mrf.mxu0  ;;  %3786 = vmatmul.mubr.bf16.gmra.mxu0 %v9581_v52  ;;  %3640 = vmatprep.mubr.bf16.mxu1 %v9490_v40  ;;  %v9626_v19 = vpack.c.bf16 %v2521_v2, %v2520_v4  ;;  %v11297_v20 = vld [vmem:[#allocation13_spill] sm:$0xff] }
 0x213   : > { %v9578_v13 = vpop.f32.mrf.mxu1  ;;  %2400 = vst [vmem:[#allocation3 + $0x128] sm:$0xff] %v2295_v45  ;;  %v2298_v30 = vmax.f32 %v2228_v57, 0.0  ;;  %v2220_v44 = vadd.f32 %v2219_v35, %v2059_v7  ;;  %3793 = vmatprep.mubr.bf16.mxu0 %v9591_v50  ;;  %7214 = vmatpush3.bf16.msra.mxu0 %v8105_v16  ;;  %v9616_v16 = vpack.c.bf16 %v2487_v31, %v2486_v5 }
 0x214   : > { %v7851_v12 = vpop.f32.mrf.mxu0  ;;  %7215 = vmatprep.subr.bf16.mxu0 %v8108_v37  ;;  %v6823_v7 = vadd.f32 %v9570_v26, %v9564_v58  ;;  %v11295_v58 = vld [vmem:[#allocation14_spill] sm:$0xff] }
 0x215   : > { %v9593_v42 = vpop.f32.mrf.mxu1  ;;  %2403 = vst [vmem:[#allocation3 + $0x150] sm:$0xff] %v2298_v30  ;;  %v2296_v18 = vmax.f32 %v2220_v44, 0.0  ;;  %v2241_v21 = vadd.f32 %v7851_v12, %v2080_v36  ;;  %v9609_v60 = vpack.c.bf16 %v2298_v30, %v2297_v8  ;;  %v8117_v44 = vld [vmem:[%s11176_s3 + $0x180] sm:$0xff]  }
 0x216   : > { %v2232_v54 = vpop.f32.mrf.mxu0  ;;  %v6826_v23 = vadd.f32 %v9593_v42, %v9578_v13 }
 0x217   : > { %v6827_v29 = vpop.f32.mrf.mxu1  ;;  %2401 = vst [vmem:[#allocation3 + $0x130] sm:$0xff] %v2296_v18  ;;  %v2301_v47 = vmax.f32 %v2241_v21, 0.0  ;;  %v2233_v46 = vadd.f32 %v2232_v54, %v2072_v24  ;;  %7216 = vmatpush3.bf16.msra.mxu0 %v8109_v38  ;;  %v9618_v8 = vpack.c.bf16 %v2296_v18, %v2295_v45  ;;  %v8119_v38 = vld [vmem:[%s11177_s4 + $0x78] sm:$0xff]   ;;  %v2488_v21 = vld [vmem:[#allocation3 + $0x89] sm:$0xff] }
 0x218   : > { %v7852_v10 = vpop.f32.mrf.mxu0  ;;  %7217 = vmatprep.subr.bf16.mxu0 %v8112_v14  ;;  %v11296_v14 = vld [vmem:[#allocation12_spill] sm:$0xff]  ;;  %v2523_v24 = vld [vmem:[#allocation3 + $0xcf] sm:$0xff]  ;;  %v9644_v49 = vpack.c.bf16 %v2489_v51, %v2488_v21 }
 0x219   : > { %v6828_v56 = vpop.f32.mrf.mxu1  ;;  %2406 = vst [vmem:[#allocation3 + $0x188] sm:$0xff] %v2301_v47  ;;  %v2299_v63 = vmax.f32 %v2233_v46, 0.0  ;;  %v2244_v37 = vadd.f32 %v7852_v10, %v2083_v1  ;;  %3641 = vmatmul.mubr.bf16.gmra.mxu1 %v9591_v50  ;;  %v2088_v18 = vadd.f32 %v6823_v7, %v11296_v14  ;;  %v2522_v46 = vld [vmem:[#allocation3 + $0xc7] sm:$0xff] }
 0x21a   : > { %v6829_v22 = vadd.f32 %v6828_v56, %v6827_v29  ;;  %v2235_v35 = vpop.f32.mrf.mxu0  ;;  %3794 = vmatmul.mubr.bf16.gmra.mxu0 %v9616_v16  ;;  %3648 = vmatprep.mubr.bf16.mxu1 %v9543_v48  ;;  %v9646_v1 = vpack.c.bf16 %v2523_v24, %v2522_v46 }
 0x21b   : > { %v6830_v33 = vpop.f32.mrf.mxu1  ;;  %2404 = vst [vmem:[#allocation3 + $0x168] sm:$0xff] %v2299_v63  ;;  %v2302_v45 = vmax.f32 %v2244_v37, 0.0  ;;  %v2236_v30 = vadd.f32 %v2235_v35, %v2075_v6  ;;  %3801 = vmatprep.mubr.bf16.mxu0 %v9626_v19  ;;  %7218 = vmatpush3.bf16.msra.mxu0 %v8113_v11  ;;  %v2091_v6 = vadd.f32 %v6826_v23, %v11297_v20  ;;  %v2493_v20 = vld [vmem:[#allocation3 + $0xd1] sm:$0xff] }
 0x21c   : > { %v2096_v26 = vadd.f32 %v6829_v22, %v11295_v58  ;;  %v7855_v36 = vpop.f32.mrf.mxu0  ;;  %7219 = vmatprep.subr.bf16.mxu0 %v8116_v34  ;;  %v2491_v58 = vld [vmem:[#allocation3 + $0xb1] sm:$0xff] }
 0x21d   : > { %v6831_v57 = vpop.f32.mrf.mxu1  ;;  %2407 = vst [vmem:[#allocation3 + $0x190] sm:$0xff] %v2302_v45  ;;  %v2300_v29 = vmax.f32 %v2236_v30, 0.0  ;;  %v9641_v56 = vpack.c.bf16 %v2302_v45, %v2301_v47  ;;  %v11298_v45 = vld [vmem:[#allocation15_spill] sm:$0xff]  ;;  %v2490_v30 = vld [vmem:[#allocation3 + $0xa9] sm:$0xff] }
 0x21e   : > { %v6832_v28 = vadd.f32 %v6831_v57, %v6830_v33  ;;  %v2257_v12 = vadd.f32 %v7855_v36, %v2096_v26  ;;  %v2248_v31 = vpop.f32.mrf.mxu0  ;;  %v9658_v14 = vpack.c.bf16 %v2491_v58, %v2490_v30 }
 0x21f   : > { %v6833_v17 = vpop.f32.mrf.mxu1  ;;  %2405 = vst [vmem:[#allocation3 + $0x170] sm:$0xff] %v2300_v29  ;;  %v2249_v2 = vadd.f32 %v2248_v31, %v2088_v18  ;;  %7220 = vmatpush3.bf16.msra.mxu0 %v8117_v44  ;;  %v9648_v11 = vpack.c.bf16 %v2300_v29, %v2299_v63  ;;  %v2524_v18 = vld [vmem:[#allocation3 + $0xe7] sm:$0xff] }
 0x220   : > { %v2305_v54 = vmax.f32 %v2257_v12, 0.0  ;;  %v2099_v22 = vadd.f32 %v6832_v28, %v9388_v0  ;;  %v7856_v42 = vpop.f32.mrf.mxu0  ;;  %7341 = vmatprep.subr.bf16.mxu0 %v8119_v38 }
 0x221   : > { %v6834_v5 = vpop.f32.mrf.mxu1  ;;  %v2303_v47 = vmax.f32 %v2249_v2, 0.0  ;;  %3649 = vmatmul.mubr.bf16.gmra.mxu1 %v9626_v19 }
 0x222   : > { %2410 = vst [vmem:[#allocation3 + $0x1c8] sm:$0xff] %v2305_v54  ;;  %v6835_v33 = vadd.f32 %v6834_v5, %v6833_v17  ;;  %v2260_v10 = vadd.f32 %v7856_v42, %v2099_v22  ;;  %v2251_v4 = vpop.f32.mrf.mxu0  ;;  %3802 = vmatmul.mubr.bf16.gmra.mxu0 %v9644_v49  ;;  %3656 = vmatprep.mubr.bf16.mxu1 %v9530_v41  ;;  %v2525_v17 = vld [vmem:[#allocation3 + $0xef] sm:$0xff]  ;;  %v11301_v5 = vld [vmem:[#allocation16_spill] sm:$0xff] }
 0x223   : > { %v6836_v13 = vpop.f32.mrf.mxu1  ;;  %2408 = vst [vmem:[#allocation3 + $0x1a8] sm:$0xff] %v2303_v47  ;;  %v2252_v7 = vadd.f32 %v2251_v4, %v2091_v6  ;;  %3809 = vmatprep.mubr.bf16.mxu0 %v9646_v1  ;;  %v9665_v2 = vpack.c.bf16 %v2525_v17, %v2524_v18  ;;  %v2527_v6 = vld [vmem:[#allocation3 + $0x10f] sm:$0xff] }
 0x224   : > { %v2306_v34 = vmax.f32 %v2260_v10, 0.0  ;;  %v7859_v37 = vpop.f32.mrf.mxu0  ;;  %v2104_v28 = vadd.f32 %v6835_v33, %v11298_v45  ;;  %v2492_v10 = vld [vmem:[#allocation3 + $0xc9] sm:$0xff] }
 0x225   : > { %v6837_v0 = vpop.f32.mrf.mxu1  ;;  %v2304_v35 = vmax.f32 %v2252_v7, 0.0  ;;  %11302 = vst [vmem:[#allocation10_spill] sm:$0xff] %v9665_v2  ;;  %v2526_v7 = vld [vmem:[#allocation3 + $0x107] sm:$0xff] }
 0x226   : > { %2411 = vst [vmem:[#allocation3 + $0x1d0] sm:$0xff] %v2306_v34  ;;  %v6838_v57 = vadd.f32 %v6837_v0, %v6836_v13  ;;  %v2264_v44 = vpop.f32.mrf.mxu0  ;;  %v9656_v36 = vpack.c.bf16 %v2306_v34, %v2305_v54  ;;  %v9673_v34 = vpack.c.bf16 %v2493_v20, %v2492_v10  ;;  %v2496_v17 = vld [vmem:[#allocation3 + $0x109] sm:$0xff]  ;;  %v2503_v20 = vld [vmem:[#allocation3 + $0x171] sm:$0xff] }
 0x227   : > { %v6839_v63 = vpop.f32.mrf.mxu1  ;;  %2409 = vst [vmem:[#allocation3 + $0x1b0] sm:$0xff] %v2304_v35  ;;  %v2265_v23 = vadd.f32 %v2264_v44, %v2104_v28  ;;  %v9660_v21 = vpack.c.bf16 %v2304_v35, %v2303_v47  ;;  %v2529_v35 = vld [vmem:[#allocation3 + $0x12f] sm:$0xff]  ;;  %v2528_v28 = vld [vmem:[#allocation3 + $0x127] sm:$0xff] }
 0x228   : > { %11299 = vst [vmem:[#allocation7_spill] sm:$0xff] %v9656_v36  ;;  %v7860_v12 = vpop.f32.mrf.mxu0  ;;  %v2107_v31 = vadd.f32 %v6838_v57, %v11301_v5  ;;  %11304 = vst [vmem:[#allocation11_spill] sm:$0xff] %v9673_v34  ;;  %v2495_v57 = vld [vmem:[#allocation3 + $0xf1] sm:$0xff]  ;;  %v9684_v58 = vpack.c.bf16 %v2529_v35, %v2528_v28  ;;  %v2502_v10 = vld [vmem:[#allocation3 + $0x169] sm:$0xff] }
 0x229   : > { %v6840_v26 = vpop.f32.mrf.mxu1  ;;  %11300 = vst [vmem:[#allocation6_spill] sm:$0xff] %v9660_v21  ;;  %v2307_v24 = vmax.f32 %v2265_v23, 0.0  ;;  %3657 = vmatmul.mubr.bf16.gmra.mxu1 %v9646_v1  ;;  %v2531_v23 = vld [vmem:[#allocation3 + $0x14f] sm:$0xff] }
 0x22a   : > { %v6841_v38 = vadd.f32 %v6840_v26, %v6839_v63  ;;  %v2267_v22 = vpop.f32.mrf.mxu0  ;;  %3810 = vmatmul.mubr.bf16.gmra.mxu0 %v9658_v14  ;;  %3664 = vmatprep.mubr.bf16.mxu1 %v9583_v32  ;;  %11307 = vst [vmem:[#allocation12_spill] sm:$0xff] %v9684_v58  ;;  %v2533_v5 = vld [vmem:[#allocation3 + $0x16f] sm:$0xff] }
 0x22b   : > { %v6842_v29 = vpop.f32.mrf.mxu1  ;;  %2412 = vst [vmem:[#allocation3 + $0x1e8] sm:$0xff] %v2307_v24  ;;  %v2268_v42 = vadd.f32 %v2267_v22, %v2107_v31  ;;  %3817 = vmatprep.mubr.bf16.mxu0 %v9665_v2 }
 0x22c   : > { %v2112_v51 = vadd.f32 %v6841_v38, %v9413_v39  ;;  %v2497_v38 = vld [vmem:[#allocation3 + $0x111] sm:$0xff] }
 0x22d   : > { %v6843_v54 = vpop.f32.mrf.mxu1  ;;  %v2308_v47 = vmax.f32 %v2268_v42, 0.0  ;;  %v2535_v42 = vld [vmem:[#allocation3 + $0x18f] sm:$0xff] }
 0x22e   : > { %v2273_v46 = vadd.f32 %v7859_v37, %v2112_v51  ;;  %v6844_v13 = vadd.f32 %v6843_v54, %v6842_v29  ;;  %v9676_v37 = vpack.c.bf16 %v2527_v6, %v2526_v7  ;;  %v9691_v29 = vpack.c.bf16 %v2497_v38, %v2496_v17  ;;  %v2498_v51 = vld [vmem:[#allocation3 + $0x129] sm:$0xff]  ;;  %v2507_v38 = vld [vmem:[#allocation3 + $0x1b1] sm:$0xff] }
 0x22f   : > { %2413 = vst [vmem:[#allocation3 + $0x1f0] sm:$0xff] %v2308_v47  ;;  %v9671_v4 = vpack.c.bf16 %v2308_v47, %v2307_v24  ;;  %v2499_v24 = vld [vmem:[#allocation3 + $0x131] sm:$0xff]  ;;  %v2532_v54 = vld [vmem:[#allocation3 + $0x167] sm:$0xff] }
 0x230   : > { %v2309_v39 = vmax.f32 %v2273_v46, 0.0  ;;  %v2115_v33 = vadd.f32 %v6844_v13, %v9431_v27  ;;  %11305 = vst [vmem:[#allocation9_spill] sm:$0xff] %v9676_v37  ;;  %v2494_v27 = vld [vmem:[#allocation3 + $0xe9] sm:$0xff]  ;;  %11308 = vst [vmem:[#allocation13_spill] sm:$0xff] %v9691_v29  ;;  %v9699_v31 = vpack.c.bf16 %v2499_v24, %v2498_v51  ;;  %v9702_v22 = vpack.c.bf16 %v2533_v5, %v2532_v54  ;;  %v2501_v13 = vld [vmem:[#allocation3 + $0x151] sm:$0xff] }
 0x231   : > { %11303 = vst [vmem:[#allocation8_spill] sm:$0xff] %v9671_v4  ;;  %3665 = vmatmul.mubr.bf16.gmra.mxu1 %v9665_v2  ;;  %v9681_v45 = vpack.c.bf16 %v2495_v57, %v2494_v27  ;;  %v2500_v46 = vld [vmem:[#allocation3 + $0x149] sm:$0xff]  ;;  %v2505_v57 = vld [vmem:[#allocation3 + $0x191] sm:$0xff] }
 0x232   : > { %2414 = vst [vmem:[#allocation3 + $0x208] sm:$0xff] %v2309_v39  ;;  %v2276_v0 = vadd.f32 %v7860_v12, %v2115_v33  ;;  %3818 = vmatmul.mubr.bf16.gmra.mxu0 %v9673_v34  ;;  %3672 = vmatprep.mubr.bf16.mxu1 %v9572_v9  ;;  %v6885_v30 = vpop.f32.mrf.mxu1  ;;  %v2530_v12 = vld [vmem:[#allocation3 + $0x147] sm:$0xff]  ;;  %11310 = vst [vmem:[#allocation16_spill] sm:$0xff] %v9699_v31  ;;  %v9707_v39 = vpack.c.bf16 %v2501_v13, %v2500_v46  ;;  %v2537_v6 = vld [vmem:[#allocation3 + $0x1af] sm:$0xff] }
 0x233   : > { %3825 = vmatprep.mubr.bf16.mxu0 %v9676_v37  ;;  %11306 = vst [vmem:[#allocation14_spill] sm:$0xff] %v9681_v45  ;;  %v9694_v18 = vpack.c.bf16 %v2531_v23, %v2530_v12  ;;  %11311 = vst [vmem:[#allocation17_spill] sm:$0xff] %v9702_v22  ;;  %v2534_v33 = vld [vmem:[#allocation3 + $0x187] sm:$0xff]  ;;  %v2539_v35 = vld [vmem:[#allocation3 + $0x1cf] sm:$0xff] }
 0x234   : > { %v2310_v63 = vmax.f32 %v2276_v0, 0.0  ;;  %v6886_v26 = vpop.f32.mrf.mxu1  ;;  %11312 = vst [vmem:[#allocation18_spill] sm:$0xff] %v9707_v39  ;;  %v9710_v47 = vpack.c.bf16 %v2535_v42, %v2534_v33  ;;  %v9715_v0 = vpack.c.bf16 %v2503_v20, %v2502_v10  ;;  %v2536_v7 = vld [vmem:[#allocation3 + $0x1a7] sm:$0xff]  ;;  %v2509_v54 = vld [vmem:[#allocation3 + $0x1d1] sm:$0xff] }
 0x235   : > { %v9689_v44 = vadd.f32 %v6886_v26, %v6885_v30  ;;  %11309 = vst [vmem:[#allocation15_spill] sm:$0xff] %v9694_v18  ;;  %v2504_v27 = vld [vmem:[#allocation3 + $0x189] sm:$0xff] }
 0x236   : > { %2415 = vst [vmem:[#allocation3 + $0x210] sm:$0xff] %v2310_v63  ;;  %11313 = vst [vmem:[#allocation19_spill] sm:$0xff] %v9710_v47  ;;  %v9718_v63 = vpack.c.bf16 %v2537_v6, %v2536_v7  ;;  %v9723_v28 = vpack.c.bf16 %v2505_v57, %v2504_v27  ;;  %v2538_v30 = vld [vmem:[#allocation3 + $0x1c7] sm:$0xff]  ;;  %v2541_v23 = vld [vmem:[#allocation3 + $0x1ef] sm:$0xff] }
 0x237   : > { %11314 = vst [vmem:[#allocation20_spill] sm:$0xff] %v9715_v0  ;;  %v9726_v26 = vpack.c.bf16 %v2539_v35, %v2538_v30  ;;  %v2506_v17 = vld [vmem:[#allocation3 + $0x1a9] sm:$0xff]  ;;  %v2511_v6 = vld [vmem:[#allocation3 + $0x1f1] sm:$0xff] }
 0x238   : > { %11315 = vst [vmem:[#allocation21_spill] sm:$0xff] %v9718_v63  ;;  %11316 = vst [vmem:[#allocation22_spill] sm:$0xff] %v9723_v28  ;;  %v9731_v12 = vpack.c.bf16 %v2507_v38, %v2506_v17  ;;  %v2540_v51 = vld [vmem:[#allocation3 + $0x1e7] sm:$0xff]  ;;  %v2545_v10 = vld [vmem:[#allocation3 + $0x30] sm:$0xff] }
 0x239   : > { %3673 = vmatmul.mubr.bf16.gmra.mxu1 %v9676_v37  ;;  %11317 = vst [vmem:[#allocation23_spill] sm:$0xff] %v9726_v26  ;;  %v9734_v24 = vpack.c.bf16 %v2541_v23, %v2540_v51  ;;  %v2508_v5 = vld [vmem:[#allocation3 + $0x1c9] sm:$0xff] }
 0x23a   : > { %3826 = vmatmul.mubr.bf16.gmra.mxu0 %v9681_v45  ;;  %3680 = vmatprep.mubr.bf16.mxu1 %v9618_v8  ;;  %11318 = vst [vmem:[#allocation24_spill] sm:$0xff] %v9731_v12  ;;  %v9739_v13 = vpack.c.bf16 %v2509_v54, %v2508_v5  ;;  %v2542_v42 = vld [vmem:[#allocation3 + $0x207] sm:$0xff]  ;;  %v2642_v27 = vld [vmem:[#allocation3 + $0x50] sm:$0xff]  ;;  %v8120_v5 = vld [vmem:[%s11177_s4 + $0x38] sm:$0xff]  }
 0x23b   : > { %3833 = vmatprep.mubr.bf16.mxu0 %v9684_v58  ;;  %11319 = vst [vmem:[#allocation25_spill] sm:$0xff] %v9734_v24  ;;  %v2510_v20 = vld [vmem:[#allocation3 + $0x1e9] sm:$0xff] }
 0x23c   : > { %11320 = vst [vmem:[#allocation26_spill] sm:$0xff] %v9739_v13  ;;  %v2544_v7 = vld [vmem:[#allocation3 + $0x28] sm:$0xff]  ;;  %v9749_v35 = vpack.c.bf16 %v2511_v6, %v2510_v20  ;;  %v8121_v17 = vld [vmem:[%s11176_s3 + $0x230] sm:$0xff]   ;;  %v8130_v6 = vld [vmem:[%s11176_s3 + $0x218] sm:$0xff]  }
 0x23d   : > { %v2543_v46 = vld [vmem:[#allocation3 + $0x20f] sm:$0xff]  ;;  %v9747_v57 = vpack.c.bf16 %v2545_v10, %v2544_v7 }
 0x23e   : > { %v9742_v33 = vpack.c.bf16 %v2543_v46, %v2542_v42  ;;  %11323 = vst [vmem:[#allocation29_spill] sm:$0xff] %v9749_v35  ;;  %v2641_v30 = vld [vmem:[#allocation3 + $0x48] sm:$0xff]  ;;  %v2644_v51 = vld [vmem:[#allocation3 + $0x70] sm:$0xff]  ;;  %v8127_v42 = vld [vmem:[%s11176_s3 + $0x220] sm:$0xff]  }
 0x23f   : > { %11322 = vst [vmem:[#allocation28_spill] sm:$0xff] %v9747_v57  ;;  %v9755_v38 = vpack.c.bf16 %v2642_v27, %v2641_v30  ;;  %v8124_v23 = vld [vmem:[%s11176_s3 + $0x228] sm:$0xff]   ;;  %v8122_v46 = vld [vmem:[%s11177_s4 + $0x70] sm:$0xff]  }
 0x240   : > { %11321 = vst [vmem:[#allocation27_spill] sm:$0xff] %v9742_v33  ;;  %v2643_v54 = vld [vmem:[#allocation3 + $0x68] sm:$0xff]  ;;  %v8123_v10 = vld [vmem:[%s11177_s4 + $0x30] sm:$0xff]  }
 0x241   : > { %3681 = vmatmul.mubr.bf16.gmra.mxu1 %v9684_v58  ;;  %11324 = vst [vmem:[#allocation30_spill] sm:$0xff] %v9755_v38  ;;  %v8125_v20 = vld [vmem:[%s11177_s4 + $0x68] sm:$0xff]   ;;  %v2646_v7 = vld [vmem:[#allocation3 + $0x90] sm:$0xff] }
 0x242   : > { %3834 = vmatmul.mubr.bf16.gmra.mxu0 %v9691_v29  ;;  %3688 = vmatprep.mubr.bf16.mxu1 %v9609_v60  ;;  %v8126_v27 = vld [vmem:[%s11177_s4 + $0x28] sm:$0xff]  }
 0x243   : > { %3841 = vmatprep.mubr.bf16.mxu0 %v9694_v18  ;;  %v2645_v30 = vld [vmem:[#allocation3 + $0x88] sm:$0xff] }
 0x249   : > { %3689 = vmatmul.mubr.bf16.gmra.mxu1 %v9694_v18 }
 0x24a   : > { %3842 = vmatmul.mubr.bf16.gmra.mxu0 %v9699_v31  ;;  %3696 = vmatprep.mubr.bf16.mxu1 %v9648_v11 }
 0x24b   : > { %3849 = vmatprep.mubr.bf16.mxu0 %v9702_v22 }
 0x251   : > { %3697 = vmatmul.mubr.bf16.gmra.mxu1 %v9702_v22 }
 0x252   : > { %3850 = vmatmul.mubr.bf16.gmra.mxu0 %v9707_v39  ;;  %3704 = vmatprep.mubr.bf16.mxu1 %v9641_v56 }
 0x253   : > { %3857 = vmatprep.mubr.bf16.mxu0 %v9710_v47 }
 0x259   : > { %3705 = vmatmul.mubr.bf16.gmra.mxu1 %v9710_v47 }
 0x25a   : > { %3858 = vmatmul.mubr.bf16.gmra.mxu0 %v9715_v0  ;;  %3712 = vmatprep.mubr.bf16.mxu1 %v9660_v21 }
 0x25b   : > { %3865 = vmatprep.mubr.bf16.mxu0 %v9718_v63 }
 0x261   : > { %3713 = vmatmul.mubr.bf16.gmra.mxu1 %v9718_v63 }
 0x262   : > { %3866 = vmatmul.mubr.bf16.gmra.mxu0 %v9723_v28  ;;  %3720 = vmatprep.mubr.bf16.mxu1 %v9656_v36 }
 0x263   : > { %3873 = vmatprep.mubr.bf16.mxu0 %v9726_v26 }
 0x269   : > { %3721 = vmatmul.mubr.bf16.gmra.mxu1 %v9726_v26 }
 0x26a   : > { %3874 = vmatmul.mubr.bf16.gmra.mxu0 %v9731_v12  ;;  %3728 = vmatprep.mubr.bf16.mxu1 %v9671_v4  ;;  %v2661_v4 = vld [vmem:[#allocation3 + $0x188] sm:$0xff] }
 0x26b   : > { %3881 = vmatprep.mubr.bf16.mxu0 %v9734_v24 }
 0x271   : > { %3729 = vmatmul.mubr.bf16.gmra.mxu1 %v9734_v24 }
 0x272   : > { %3882 = vmatmul.mubr.bf16.gmra.mxu0 %v9739_v13  ;;  %3930 = vmatprep.mubr.bf16.mxu1 %v9541_v61 }
 0x273   : > { %3889 = vmatprep.mubr.bf16.mxu0 %v9742_v33 }
 0x279   : > { %3931 = vmatmul.mubr.bf16.vlgmr.msra.gmra.mxu1 %v9747_v57 }
 0x27a   : > { %3890 = vmatmul.mubr.bf16.gmra.mxu0 %v9749_v35  ;;  %3938 = vmatprep.mubr.bf16.mxu1 %v9581_v52 }
 0x27b   : > { %4091 = vmatprep.mubr.bf16.mxu0 %v9755_v38  ;;  %7862 = vmatpush3.bf16.msra.mxu1 %v9477_v62  ;;  %v9771_v62 = vpack.c.bf16 %v2644_v51, %v2643_v54  ;;  %v8133_v51 = vld [vmem:[%s11176_s3 + $0x210] sm:$0xff]   ;;  %v8131_v54 = vld [vmem:[%s11177_s4 + $0x58] sm:$0xff]  }
 0x27c   : > { %7863 = vmatprep.subr.bf16.mxu1 %v8121_v17 }
 0x27d   : > { %11325 = vst [vmem:[#allocation31_spill] sm:$0xff] %v9771_v62 }
 0x27f   : > { %7864 = vmatpush3.bf16.msra.mxu1 %v8121_v17  ;;  %v8128_v17 = vld [vmem:[%s11177_s4 + $0x60] sm:$0xff]  }
 0x280   : > { %7865 = vmatprep.subr.bf16.mxu1 %v8124_v23 }
 0x281   : > { %3939 = vmatmul.mubr.bf16.gmra.mxu1 %v9755_v38  ;;  %v2662_v38 = vld [vmem:[#allocation3 + $0x190] sm:$0xff] }
 0x282   : > { %4092 = vmatmul.mubr.bf16.vlgmr.msra.gmra.mxu0 %v9511_v3  ;;  %3946 = vmatprep.mubr.bf16.mxu1 %v9616_v16 }
 0x283   : > { %4099 = vmatprep.mubr.bf16.mxu0 %v9771_v62  ;;  %7342 = vmatpush3.bf16.msra.mxu0 %v8120_v5  ;;  %v8129_v5 = vld [vmem:[%s11177_s4 + $0x20] sm:$0xff]  }
 0x284   : > { %7343 = vmatprep.subr.bf16.mxu0 %v8122_v46  ;;  %7866 = vmatpush3.bf16.msra.mxu1 %v8124_v23  ;;  %v9795_v23 = vpack.c.bf16 %v2646_v7, %v2645_v30  ;;  %v8136_v46 = vld [vmem:[%s11176_s3 + $0x208] sm:$0xff]   ;;  %v8135_v30 = vld [vmem:[%s11177_s4 + $0x10] sm:$0xff]  }
 0x285   : > { %7867 = vmatprep.subr.bf16.mxu1 %v8127_v42 }
 0x286   : > { %11326 = vst [vmem:[#allocation32_spill] sm:$0xff] %v9795_v23 }
 0x287   : > { %7344 = vmatpush3.bf16.msra.mxu0 %v8123_v10  ;;  %v8132_v10 = vld [vmem:[%s11177_s4 + $0x18] sm:$0xff]  }
 0x288   : > { %7345 = vmatprep.subr.bf16.mxu0 %v8125_v20  ;;  %7868 = vmatpush3.bf16.msra.mxu1 %v8127_v42  ;;  %v2648_v42 = vld [vmem:[#allocation3 + $0xb0] sm:$0xff]  ;;  %v2647_v20 = vld [vmem:[#allocation3 + $0xa8] sm:$0xff] }
 0x289   : > { %3947 = vmatmul.mubr.bf16.gmra.mxu1 %v9771_v62  ;;  %7869 = vmatprep.subr.bf16.mxu1 %v8130_v6  ;;  %v9819_v7 = vpack.c.bf16 %v2648_v42, %v2647_v20  ;;  %v2649_v42 = vld [vmem:[#allocation3 + $0xc8] sm:$0xff]  ;;  %v8141_v20 = vld [vmem:[%s11177_s4] sm:$0xff]  }
 0x28a   : > { %4100 = vmatmul.mubr.bf16.gmra.mxu0 %v9551_v53  ;;  %3954 = vmatprep.mubr.bf16.mxu1 %v9644_v49 }
 0x28b   : > { %4107 = vmatprep.mubr.bf16.mxu0 %v9795_v23  ;;  %7346 = vmatpush3.bf16.msra.mxu0 %v8126_v27  ;;  %11327 = vst [vmem:[#allocation33_spill] sm:$0xff] %v9819_v7  ;;  %v8139_v27 = vld [vmem:[%s11176_s3 + $0x200] sm:$0xff]  }
 0x28c   : > { %7347 = vmatprep.subr.bf16.mxu0 %v8128_v17  ;;  %7870 = vmatpush3.bf16.msra.mxu1 %v8130_v6  ;;  %v8134_v6 = vld [vmem:[%s11177_s4 + $0x50] sm:$0xff]   ;;  %v8137_v17 = vld [vmem:[%s11177_s4 + $0x48] sm:$0xff]  }
 0x28d   : > { %7871 = vmatprep.subr.bf16.mxu1 %v8133_v51 }
 0x28f   : > { %7348 = vmatpush3.bf16.msra.mxu0 %v8129_v5  ;;  %v2650_v5 = vld [vmem:[#allocation3 + $0xd0] sm:$0xff] }
 0x290   : > { %7349 = vmatprep.subr.bf16.mxu0 %v8131_v54  ;;  %7872 = vmatpush3.bf16.msra.mxu1 %v8133_v51  ;;  %v8142_v51 = vld [vmem:[%s11177_s4 + $0xf8] sm:$0xff]   ;;  %v8138_v54 = vld [vmem:[%s11177_s4 + $0x8] sm:$0xff]  }
 0x291   : > { %3955 = vmatmul.mubr.bf16.gmra.mxu1 %v9795_v23  ;;  %7873 = vmatprep.subr.bf16.mxu1 %v8136_v46 }
 0x292   : > { %4108 = vmatmul.mubr.bf16.gmra.mxu0 %v9591_v50  ;;  %3962 = vmatprep.mubr.bf16.mxu1 %v9658_v14 }
 0x293   : > { %4115 = vmatprep.mubr.bf16.mxu0 %v9819_v7  ;;  %7350 = vmatpush3.bf16.msra.mxu0 %v8132_v10  ;;  %v9843_v10 = vpack.c.bf16 %v2650_v5, %v2649_v42  ;;  %v2653_v5 = vld [vmem:[#allocation3 + $0x108] sm:$0xff]  ;;  %v2656_v42 = vld [vmem:[#allocation3 + $0x130] sm:$0xff] }
 0x294   : > { %7351 = vmatprep.subr.bf16.mxu0 %v8134_v6  ;;  %7874 = vmatpush3.bf16.msra.mxu1 %v8136_v46  ;;  %v8140_v46 = vld [vmem:[%s11177_s4 + $0x40] sm:$0xff]   ;;  %v8144_v6 = vld [vmem:[%s11177_s4 + $0x178] sm:$0xff]  }
 0x295   : > { %7875 = vmatprep.subr.bf16.mxu1 %v8139_v27  ;;  %11328 = vst [vmem:[#allocation34_spill] sm:$0xff] %v9843_v10 }
 0x297   : > { %7352 = vmatpush3.bf16.msra.mxu0 %v8135_v30  ;;  %v2651_v30 = vld [vmem:[#allocation3 + $0xe8] sm:$0xff] }
 0x298   : > { %7353 = vmatprep.subr.bf16.mxu0 %v8137_v17  ;;  %7876 = vmatpush3.bf16.msra.mxu1 %v8139_v27  ;;  %v2652_v27 = vld [vmem:[#allocation3 + $0xf0] sm:$0xff] }
 0x299   : > { %3963 = vmatmul.mubr.bf16.gmra.mxu1 %v9819_v7  ;;  %7453 = vmatprep.subr.bf16.mxu1 %v8142_v51  ;;  %v9855_v17 = vpack.c.bf16 %v2652_v27, %v2651_v30  ;;  %v2654_v51 = vld [vmem:[#allocation3 + $0x110] sm:$0xff]  ;;  %v2657_v27 = vld [vmem:[#allocation3 + $0x148] sm:$0xff] }
 0x29a   : > { %4116 = vmatmul.mubr.bf16.gmra.mxu0 %v9626_v19  ;;  %3970 = vmatprep.mubr.bf16.mxu1 %v9673_v34 }
 0x29b   : > { %4123 = vmatprep.mubr.bf16.mxu0 %v9843_v10  ;;  %7354 = vmatpush3.bf16.msra.mxu0 %v8138_v54  ;;  %11329 = vst [vmem:[#allocation35_spill] sm:$0xff] %v9855_v17  ;;  %v9861_v54 = vpack.c.bf16 %v2654_v51, %v2653_v5  ;;  %v6888_v51 = vpop.f32.mrf.mxu1 }
 0x29c   : > { %7355 = vmatprep.subr.bf16.mxu0 %v8140_v46  ;;  %v2655_v46 = vld [vmem:[#allocation3 + $0x128] sm:$0xff] }
 0x29d   : > { %11330 = vst [vmem:[#allocation36_spill] sm:$0xff] %v9861_v54  ;;  %v6889_v5 = vpop.f32.mrf.mxu1 }
 0x29f   : > { %7356 = vmatpush3.bf16.msra.mxu0 %v8141_v20  ;;  %v9867_v20 = vpack.c.bf16 %v2656_v42, %v2655_v46  ;;  %v2660_v42 = vld [vmem:[#allocation3 + $0x170] sm:$0xff]  ;;  %v2659_v46 = vld [vmem:[#allocation3 + $0x168] sm:$0xff] }
 0x2a0   : > { %7565 = vmatprep.subr.bf16.mxu0 %v8144_v6  ;;  %v2658_v6 = vld [vmem:[#allocation3 + $0x150] sm:$0xff] }
 0x2a1   : > { %3971 = vmatmul.mubr.bf16.gmra.mxu1 %v9843_v10  ;;  %11331 = vst [vmem:[#allocation37_spill] sm:$0xff] %v9867_v20  ;;  %v9873_v30 = vpack.c.bf16 %v2658_v6, %v2657_v27  ;;  %v9884_v6 = vld [vmem:[%s11178_s5] ss:$0 sm:$0xff] }
 0x2a2   : > { %4124 = vmatmul.mubr.bf16.gmra.mxu0 %v9646_v1  ;;  %3978 = vmatprep.mubr.bf16.mxu1 %v9681_v45 }
 0x2a3   : > { %4131 = vmatprep.mubr.bf16.mxu0 %v9855_v17  ;;  %11332 = vst [vmem:[#allocation38_spill] sm:$0xff] %v9873_v30 }
 0x2a9   : > { %3979 = vmatmul.mubr.bf16.gmra.mxu1 %v9855_v17  ;;  %v9879_v17 = vpack.c.bf16 %v2660_v42, %v2659_v46  ;;  %v6890_v42 = vadd.f32 %v6889_v5, %v6888_v51  ;;  %v2664_v5 = vld [vmem:[#allocation3 + $0x1b0] sm:$0xff] }
 0x2aa   : > { %4132 = vmatmul.mubr.bf16.gmra.mxu0 %v9665_v2  ;;  %3986 = vmatprep.mubr.bf16.mxu1 %v9691_v29 }
 0x2ab   : > { %4139 = vmatprep.mubr.bf16.mxu0 %v9861_v54  ;;  %11333 = vst [vmem:[#allocation39_spill] sm:$0xff] %v9879_v17 }
 0x2b1   : > { %3987 = vmatmul.mubr.bf16.gmra.mxu1 %v9861_v54 }
 0x2b2   : > { %4140 = vmatmul.mubr.bf16.gmra.mxu0 %v9676_v37  ;;  %3994 = vmatprep.mubr.bf16.mxu1 %v9699_v31 }
 0x2b3   : > { %4147 = vmatprep.mubr.bf16.mxu0 %v9867_v20 }
 0x2b9   : > { %3995 = vmatmul.mubr.bf16.gmra.mxu1 %v9867_v20 }
 0x2ba   : > { %4148 = vmatmul.mubr.bf16.gmra.mxu0 %v9684_v58  ;;  %4002 = vmatprep.mubr.bf16.mxu1 %v9707_v39 }
 0x2bb   : > { %4155 = vmatprep.mubr.bf16.mxu0 %v9873_v30 }
 0x2c1   : > { %v6891_v54 = vpop.f32.mrf.mxu1  ;;  %4003 = vmatmul.mubr.bf16.gmra.mxu1 %v9873_v30  ;;  %v3611_v30 = vadd.f32 %v9689_v44, %v9884_v6 }
 0x2c2   : > { %v6997_v27 = vpop.f32.mrf.mxu0  ;;  %4156 = vmatmul.mubr.bf16.gmra.mxu0 %v9694_v18  ;;  %4010 = vmatprep.mubr.bf16.mxu1 %v9715_v0  ;;  %v3614_v0 = vadd.f32 %v6890_v42, %v9884_v6 }
 0x2c3   : > { %4163 = vmatprep.mubr.bf16.mxu0 %v9879_v17  ;;  %v6892_v20 = vpop.f32.mrf.mxu1 }
 0x2c4   : > { %v6893_v10 = vadd.f32 %v6892_v20, %v6891_v54  ;;  %v6998_v7 = vpop.f32.mrf.mxu0  ;;  %v9895_v54 = vpack.c.bf16 %v2662_v38, %v2661_v4 }
 0x2c5   : > { %v6999_v46 = vadd.f32 %v6998_v7, %v6997_v27  ;;  %v6894_v23 = vpop.f32.mrf.mxu1 }
 0x2c6   : > { %v7000_v62 = vpop.f32.mrf.mxu0  ;;  %11334 = vst [vmem:[#allocation40_spill] sm:$0xff] %v9895_v54 }
 0x2c7   : > { %v9891_v39 = vadd.f32 %v6999_v46, %v3611_v30  ;;  %v6895_v57 = vpop.f32.mrf.mxu1  ;;  %v3619_v30 = vadd.f32 %v6893_v10, %v9884_v6  ;;  %v2663_v46 = vld [vmem:[#allocation3 + $0x1a8] sm:$0xff] }
 0x2c8   : > { %v6896_v31 = vadd.f32 %v6895_v57, %v6894_v23  ;;  %v7001_v29 = vpop.f32.mrf.mxu0 }
 0x2c9   : > { %v7002_v45 = vadd.f32 %v7001_v29, %v7000_v62  ;;  %v6897_v36 = vpop.f32.mrf.mxu1  ;;  %4011 = vmatmul.mubr.bf16.gmra.mxu1 %v9879_v17 }
 0x2ca   : > { %v7003_v44 = vpop.f32.mrf.mxu0  ;;  %4164 = vmatmul.mubr.bf16.gmra.mxu0 %v9702_v22  ;;  %4018 = vmatprep.mubr.bf16.mxu1 %v9723_v28  ;;  %v2665_v28 = vld [vmem:[#allocation3 + $0x1c8] sm:$0xff] }
 0x2cb   : > { %v9899_v7 = vadd.f32 %v7002_v45, %v3614_v0  ;;  %4171 = vmatprep.mubr.bf16.mxu0 %v9895_v54  ;;  %v6898_v57 = vpop.f32.mrf.mxu1  ;;  %v3622_v45 = vadd.f32 %v6896_v31, %v9884_v6 }
 0x2cc   : > { %v6899_v23 = vadd.f32 %v6898_v57, %v6897_v36  ;;  %v7004_v20 = vpop.f32.mrf.mxu0  ;;  %v9907_v36 = vpack.c.bf16 %v2664_v5, %v2663_v46 }
 0x2cd   : > { %v7005_v29 = vadd.f32 %v7004_v20, %v7003_v44  ;;  %v6900_v62 = vpop.f32.mrf.mxu1 }
 0x2ce   : > { %v7006_v51 = vpop.f32.mrf.mxu0  ;;  %11335 = vst [vmem:[#allocation41_spill] sm:$0xff] %v9907_v36  ;;  %v3627_v31 = vadd.f32 %v6899_v23, %v9884_v6 }
 0x2cf   : > { %v9903_v4 = vadd.f32 %v7005_v29, %v3619_v30  ;;  %v6901_v38 = vpop.f32.mrf.mxu1 }
 0x2d0   : > { %v6902_v27 = vadd.f32 %v6901_v38, %v6900_v62  ;;  %v7007_v42 = vpop.f32.mrf.mxu0  ;;  %v2666_v38 = vld [vmem:[#allocation3 + $0x1d0] sm:$0xff] }
 0x2d1   : > { %v7008_v0 = vadd.f32 %v7007_v42, %v7006_v51  ;;  %v6903_v17 = vpop.f32.mrf.mxu1  ;;  %4019 = vmatmul.mubr.bf16.gmra.mxu1 %v9895_v54 }
 0x2d2   : > { %v7009_v57 = vpop.f32.mrf.mxu0  ;;  %4172 = vmatmul.mubr.bf16.gmra.mxu0 %v9710_v47  ;;  %4026 = vmatprep.mubr.bf16.mxu1 %v9731_v12 }
 0x2d3   : > { %v9911_v10 = vadd.f32 %v7008_v0, %v3622_v45  ;;  %4179 = vmatprep.mubr.bf16.mxu0 %v9907_v36  ;;  %v6904_v44 = vpop.f32.mrf.mxu1  ;;  %v3630_v45 = vadd.f32 %v6902_v27, %v9884_v6 }
 0x2d4   : > { %v6905_v20 = vadd.f32 %v6904_v44, %v6903_v17  ;;  %v7010_v30 = vpop.f32.mrf.mxu0  ;;  %v9919_v17 = vpack.c.bf16 %v2666_v38, %v2665_v28 }
 0x2d5   : > { %v7011_v29 = vadd.f32 %v7010_v30, %v7009_v57  ;;  %v6906_v62 = vpop.f32.mrf.mxu1 }
 0x2d6   : > { %v7012_v51 = vpop.f32.mrf.mxu0  ;;  %11336 = vst [vmem:[#allocation42_spill] sm:$0xff] %v9919_v17  ;;  %v3635_v27 = vadd.f32 %v6905_v20, %v9884_v6 }
 0x2d7   : > { %v9915_v5 = vadd.f32 %v7011_v29, %v3627_v31  ;;  %v6907_v42 = vpop.f32.mrf.mxu1 }
 0x2d8   : > { %v6908_v46 = vadd.f32 %v6907_v42, %v6906_v62  ;;  %v7013_v54 = vpop.f32.mrf.mxu0 }
 0x2d9   : > { %v7014_v0 = vadd.f32 %v7013_v54, %v7012_v51  ;;  %v6909_v12 = vpop.f32.mrf.mxu1  ;;  %4027 = vmatmul.mubr.bf16.gmra.mxu1 %v9907_v36  ;;  %v2668_v51 = vld [vmem:[#allocation3 + $0x1f0] sm:$0xff] }
 0x2da   : > { %v7015_v44 = vpop.f32.mrf.mxu0  ;;  %4180 = vmatmul.mubr.bf16.gmra.mxu0 %v9718_v63  ;;  %4034 = vmatprep.mubr.bf16.mxu1 %v9739_v13  ;;  %v2667_v63 = vld [vmem:[#allocation3 + $0x1e8] sm:$0xff] }
 0x2db   : > { %v9923_v23 = vadd.f32 %v7014_v0, %v3630_v45  ;;  %4187 = vmatprep.mubr.bf16.mxu0 %v9919_v17  ;;  %v6910_v57 = vpop.f32.mrf.mxu1  ;;  %v3638_v45 = vadd.f32 %v6908_v46, %v9884_v6 }
 0x2dc   : > { %v6911_v30 = vadd.f32 %v6910_v57, %v6909_v12  ;;  %v7016_v31 = vpop.f32.mrf.mxu0  ;;  %v9931_v12 = vpack.c.bf16 %v2668_v51, %v2667_v63  ;;  %v2670_v51 = vld [vmem:[#allocation3 + $0x210] sm:$0xff] }
 0x2dd   : > { %v7017_v54 = vadd.f32 %v7016_v31, %v7015_v44  ;;  %v6912_v29 = vpop.f32.mrf.mxu1 }
 0x2de   : > { %v7018_v62 = vpop.f32.mrf.mxu0  ;;  %11337 = vst [vmem:[#allocation43_spill] sm:$0xff] %v9931_v12  ;;  %v3643_v46 = vadd.f32 %v6911_v30, %v9884_v6 }
 0x2df   : > { %v9927_v28 = vadd.f32 %v7017_v54, %v3635_v27  ;;  %v6913_v38 = vpop.f32.mrf.mxu1 }
 0x2e0   : > { %v6914_v42 = vadd.f32 %v6913_v38, %v6912_v29  ;;  %v7019_v36 = vpop.f32.mrf.mxu0  ;;  %v2606_v29 = vld [vmem:[#allocation3 + $0x209] sm:$0xff] }
 0x2e1   : > { %v7020_v0 = vadd.f32 %v7019_v36, %v7018_v62  ;;  %v6915_v13 = vpop.f32.mrf.mxu1  ;;  %4035 = vmatmul.mubr.bf16.gmra.mxu1 %v9919_v17  ;;  %v2607_v62 = vld [vmem:[#allocation3 + $0x211] sm:$0xff] }
 0x2e2   : > { %v7021_v57 = vpop.f32.mrf.mxu0  ;;  %4188 = vmatmul.mubr.bf16.gmra.mxu0 %v9726_v26  ;;  %4042 = vmatprep.mubr.bf16.mxu1 %v9749_v35  ;;  %v3646_v34 = vadd.f32 %v6914_v42, %v9884_v6 }
 0x2e3   : > { %v9935_v20 = vadd.f32 %v7020_v0, %v3638_v45  ;;  %4195 = vmatprep.mubr.bf16.mxu0 %v9931_v12  ;;  %v6916_v44 = vpop.f32.mrf.mxu1  ;;  %v9941_v45 = vpack.c.bf16 %v2607_v62, %v2606_v29  ;;  %v2669_v0 = vld [vmem:[#allocation3 + $0x208] sm:$0xff]  ;;  %v2674_v62 = vld [vmem:[#allocation3 + $0x51] sm:$0xff] }
 0x2e4   : > { %v6917_v31 = vadd.f32 %v6916_v44, %v6915_v13  ;;  %v7022_v27 = vpop.f32.mrf.mxu0  ;;  %v9945_v30 = vpack.c.bf16 %v2670_v51, %v2669_v0  ;;  %v2673_v29 = vld [vmem:[#allocation3 + $0x49] sm:$0xff] }
 0x2e5   : > { %v7023_v36 = vadd.f32 %v7022_v27, %v7021_v57  ;;  %v6918_v54 = vpop.f32.mrf.mxu1  ;;  %11338 = vst [vmem:[#allocation44_spill] sm:$0xff] %v9941_v45  ;;  %v9957_v21 = vpack.c.bf16 %v2674_v62, %v2673_v29  ;;  %v2675_v29 = vld [vmem:[#allocation3 + $0x69] sm:$0xff] }
 0x2e6   : > { %v7024_v63 = vpop.f32.mrf.mxu0  ;;  %11339 = vst [vmem:[#allocation45_spill] sm:$0xff] %v9945_v30  ;;  %v3651_v42 = vadd.f32 %v6917_v31, %v9884_v6 }
 0x2e7   : > { %v9939_v38 = vadd.f32 %v7023_v36, %v3643_v46  ;;  %v6919_v17 = vpop.f32.mrf.mxu1  ;;  %11342 = vst [vmem:[#allocation48_spill] sm:$0xff] %v9957_v21 }
 0x2e8   : > { %v6920_v26 = vadd.f32 %v6919_v17, %v6918_v54  ;;  %v7025_v35 = vpop.f32.mrf.mxu0 }
 0x2e9   : > { %v7026_v13 = vadd.f32 %v7025_v35, %v7024_v63  ;;  %v6921_v44 = vpop.f32.mrf.mxu1  ;;  %4043 = vmatmul.mubr.bf16.gmra.mxu1 %v9931_v12  ;;  %v8199_v12 = vld [vmem:[#allocation2 + $0x8] sm:$0xff] }
 0x2ea   : > { %v7027_v57 = vpop.f32.mrf.mxu0  ;;  %4196 = vmatmul.mubr.bf16.gmra.mxu0 %v9734_v24  ;;  %4050 = vmatprep.mubr.bf16.mxu1 %v9941_v45  ;;  %v9955_v24 = vpack.c.bf16 %v8199_v12, %v8199_v12  ;;  %v2639_v12 = vld [vmem:[#allocation3 + $0x227] sm:$0xff] }
 0x2eb   : > { %v9949_v27 = vadd.f32 %v7026_v13, %v3646_v34  ;;  %4203 = vmatprep.mubr.bf16.mxu0 %v9945_v30  ;;  %v6922_v17 = vpop.f32.mrf.mxu1 }
 0x2ec   : > { %v6923_v46 = vadd.f32 %v6922_v17, %v6921_v44  ;;  %v7028_v36 = vpop.f32.mrf.mxu0  ;;  %11341 = vst [vmem:[#allocation47_spill] sm:$0xff] %v9955_v24  ;;  %v3654_v44 = vadd.f32 %v6920_v26, %v9884_v6  ;;  %v2676_v26 = vld [vmem:[#allocation3 + $0x71] sm:$0xff] }
 0x2ed   : > { %v7029_v35 = vadd.f32 %v7028_v36, %v7027_v57  ;;  %v6924_v54 = vpop.f32.mrf.mxu1 }
 0x2ee   : > { %v7030_v63 = vpop.f32.mrf.mxu0  ;;  %v3659_v62 = vadd.f32 %v6923_v46, %v9884_v6  ;;  %v8146_v46 = vld [vmem:[%s11177_s4 + $0xf0] sm:$0xff]  }
 0x2ef   : > { %v9953_v51 = vadd.f32 %v7029_v35, %v3651_v42  ;;  %v6925_v0 = vpop.f32.mrf.mxu1  ;;  %v2640_v42 = vld [vmem:[#allocation3 + $0x22f] sm:$0xff] }
 0x2f0   : > { %v6926_v34 = vadd.f32 %v6925_v0, %v6924_v54  ;;  %v7031_v13 = vpop.f32.mrf.mxu0 }
 0x2f1   : > { %11340 = vst [vmem:[#allocation46_spill] sm:$0xff] %v9953_v51  ;;  %v7032_v17 = vadd.f32 %v7031_v13, %v7030_v63  ;;  %v6927_v47 = vpop.f32.mrf.mxu1  ;;  %4051 = vmatmul.mubr.bf16.gmra.mxu1 %v9945_v30  ;;  %v2677_v13 = vld [vmem:[#allocation3 + $0x89] sm:$0xff]  ;;  %v2678_v30 = vld [vmem:[#allocation3 + $0x91] sm:$0xff]  ;;  %v9967_v51 = vpack.c.bf16 %v2640_v42, %v2639_v12 }
 0x2f2   : > { %v7033_v31 = vpop.f32.mrf.mxu0  ;;  %4204 = vmatmul.mubr.bf16.gmra.mxu0 %v9742_v33  ;;  %7877 = vmatprep.mubr.bf16.mxu1 %v9957_v21  ;;  %v9971_v21 = vpack.c.bf16 %v2676_v26, %v2675_v29 }
 0x2f3   : > { %v9963_v57 = vadd.f32 %v7032_v17, %v3654_v44  ;;  %v6928_v36 = vpop.f32.mrf.mxu1  ;;  %4211 = vmatprep.mubr.bf16.mxu0 %v9955_v24  ;;  %11344 = vst [vmem:[#allocation50_spill] sm:$0xff] %v9967_v51 }
 0x2f4   : > { %v6929_v35 = vadd.f32 %v6928_v36, %v6927_v47  ;;  %v7034_v54 = vpop.f32.mrf.mxu0  ;;  %11345 = vst [vmem:[#allocation51_spill] sm:$0xff] %v9971_v21  ;;  %v8143_v47 = vld [vmem:[%s11177_s4 + $0xb8] sm:$0xff]  }
 0x2f5   : > { %11343 = vst [vmem:[#allocation49_spill] sm:$0xff] %v9963_v57  ;;  %v7035_v63 = vadd.f32 %v7034_v54, %v7033_v31  ;;  %v6930_v0 = vpop.f32.mrf.mxu1  ;;  %v9976_v57 = vpack.c.bf16 %v2678_v30, %v2677_v13  ;;  %v3662_v31 = vadd.f32 %v6926_v34, %v9884_v6  ;;  %v11348_v30 = vld [vmem:[#allocation4_spill] sm:$0xff] }
 0x2f6   : > { %v7036_v33 = vpop.f32.mrf.mxu0  ;;  %v3667_v13 = vadd.f32 %v6929_v35, %v9884_v6  ;;  %v8149_v35 = vld [vmem:[%s11177_s4 + $0xa8] sm:$0xff]  }
 0x2f7   : > { %v9969_v44 = vadd.f32 %v7035_v63, %v3659_v62  ;;  %v6931_v17 = vpop.f32.mrf.mxu1  ;;  %11346 = vst [vmem:[#allocation52_spill] sm:$0xff] %v9976_v57  ;;  %v8147_v62 = vld [vmem:[%s11177_s4 + $0xb0] sm:$0xff]  }
 0x2f8   : > { %v6932_v36 = vadd.f32 %v6931_v17, %v6930_v0  ;;  %v7037_v24 = vpop.f32.mrf.mxu0  ;;  %v2680_v63 = vld [vmem:[#allocation3 + $0xb1] sm:$0xff]  ;;  %v8148_v0 = vld [vmem:[%s11177_s4 + $0xe8] sm:$0xff]  }
 0x2f9   : > { %v7038_v12 = vadd.f32 %v7037_v24, %v7036_v33  ;;  %v6933_v42 = vpop.f32.mrf.mxu1  ;;  %7878 = vmatmul.mubr.bf16.vlgmr.msra.gmra.mxu1 %v9971_v21  ;;  %v2679_v33 = vld [vmem:[#allocation3 + $0xa9] sm:$0xff] }
 0x2fa   : > { %v7039_v54 = vpop.f32.mrf.mxu0  ;;  %4212 = vmatmul.mubr.bf16.gmra.mxu0 %v9967_v51  ;;  %7881 = vmatprep.mubr.bf16.mxu1 %v9976_v57  ;;  %v9997_v21 = vpack.c.bf16 %v2680_v63, %v2679_v33 }
 0x2fb   : > { %v9985_v29 = vadd.f32 %v7038_v12, %v3662_v31  ;;  %v6934_v26 = vpop.f32.mrf.mxu1  ;;  %7454 = vmatpush3.bf16.msra.mxu1 %v8143_v47  ;;  %4852 = vmatprep.mubr.bf16.mxu0 %v11348_v30  ;;  %v2681_v47 = vld [vmem:[#allocation3 + $0xc9] sm:$0xff]  ;;  %v2682_v12 = vld [vmem:[#allocation3 + $0xd1] sm:$0xff] }
 0x2fc   : > { %v6935_v34 = vadd.f32 %v6934_v26, %v6933_v42  ;;  %v7040_v24 = vpop.f32.mrf.mxu0  ;;  %7455 = vmatprep.subr.bf16.mxu1 %v8146_v46  ;;  %11349 = vst [vmem:[#allocation4_spill] sm:$0xff] %v9997_v21  ;;  %v8145_v46 = vld [vmem:[%s11177_s4 + $0x138] sm:$0xff]  }
 0x2fd   : > { %11347 = vst [vmem:[#allocation53_spill] sm:$0xff] %v9985_v29  ;;  %v7041_v17 = vadd.f32 %v7040_v24, %v7039_v54  ;;  %v6936_v31 = vpop.f32.mrf.mxu1  ;;  %v10002_v29 = vpack.c.bf16 %v2682_v12, %v2681_v47  ;;  %v8150_v54 = vld [vmem:[%s11177_s4 + $0x170] sm:$0xff]   ;;  %v3670_v24 = vadd.f32 %v6932_v36, %v9884_v6 }
 0x2fe   : > { %v7042_v30 = vpop.f32.mrf.mxu0  ;;  %v2683_v36 = vld [vmem:[#allocation3 + $0xe9] sm:$0xff] }
 0x2ff   : > { %v9995_v51 = vadd.f32 %v7041_v17, %v3667_v13  ;;  %v6937_v57 = vpop.f32.mrf.mxu1  ;;  %7456 = vmatpush3.bf16.msra.mxu1 %v8147_v62  ;;  %11350 = vst [vmem:[#allocation54_spill] sm:$0xff] %v10002_v29 }
 0x300   : > { %v6938_v42 = vadd.f32 %v6937_v57, %v6936_v31  ;;  %v7043_v26 = vpop.f32.mrf.mxu0  ;;  %7457 = vmatprep.subr.bf16.mxu1 %v8148_v0  ;;  %v8152_v57 = vld [vmem:[%s11177_s4 + $0xe0] sm:$0xff]   ;;  %v11351_v0 = vld [vmem:[#allocation5_spill] sm:$0xff]  ;;  %v8151_v31 = vld [vmem:[%s11177_s4 + $0x130] sm:$0xff]  }
 0x301   : > { %v7044_v33 = vadd.f32 %v7043_v26, %v7042_v30  ;;  %v6939_v63 = vpop.f32.mrf.mxu1  ;;  %7882 = vmatmul.mubr.bf16.gmra.mxu1 %v9997_v21  ;;  %v2684_v30 = vld [vmem:[#allocation3 + $0xf1] sm:$0xff]  ;;  %v8153_v26 = vld [vmem:[%s11177_s4 + $0xa0] sm:$0xff]  }
 0x302   : > { %v7045_v62 = vpop.f32.mrf.mxu0  ;;  %4853 = vmatmul.mubr.bf16.vlgmr.msra.gmra.mxu0 %v11351_v0  ;;  %7885 = vmatprep.mubr.bf16.mxu1 %v10002_v29  ;;  %v2685_v0 = vld [vmem:[#allocation3 + $0x109] sm:$0xff]  ;;  %v2686_v29 = vld [vmem:[#allocation3 + $0x111] sm:$0xff]  ;;  %v10035_v21 = vpack.c.bf16 %v2684_v30, %v2683_v36  ;;  %v8162_v36 = vld [vmem:[%s11177_s4 + $0x160] sm:$0xff]  }
 0x303   : > { %v10017_v13 = vadd.f32 %v7044_v33, %v3670_v24  ;;  %4860 = vmatprep.mubr.bf16.mxu0 %v9461_v59  ;;  %7566 = vmatpush3.bf16.msra.mxu0 %v8145_v46  ;;  %v6940_v17 = vpop.f32.mrf.mxu1  ;;  %v8156_v59 = vld [vmem:[%s11177_s4 + $0x168] sm:$0xff]   ;;  %v3675_v46 = vadd.f32 %v6935_v34, %v9884_v6 }
 0x304   : > { %v6941_v47 = vadd.f32 %v6940_v17, %v6939_v63  ;;  %v7046_v12 = vpop.f32.mrf.mxu0  ;;  %7458 = vmatpush3.bf16.msra.mxu1 %v8149_v35  ;;  %7567 = vmatprep.subr.bf16.mxu0 %v8150_v54  ;;  %v8154_v35 = vld [vmem:[%s11177_s4 + $0xd8] sm:$0xff]   ;;  %11353 = vst [vmem:[#allocation55_spill] sm:$0xff] %v10035_v21  ;;  %v8157_v34 = vld [vmem:[%s11177_s4 + $0x128] sm:$0xff]  }
 0x305   : > { %11352 = vst [vmem:[#allocation5_spill] sm:$0xff] %v10017_v13  ;;  %v7047_v24 = vadd.f32 %v7046_v12, %v7045_v62  ;;  %v6942_v33 = vpop.f32.mrf.mxu1  ;;  %7459 = vmatprep.subr.bf16.mxu1 %v8152_v57  ;;  %v10040_v13 = vpack.c.bf16 %v2686_v29, %v2685_v0  ;;  %v8155_v57 = vld [vmem:[%s11177_s4 + $0x98] sm:$0xff]   ;;  %v8158_v29 = vld [vmem:[%s11177_s4 + $0xd0] sm:$0xff]  }
 0x306   : > { %v7048_v54 = vpop.f32.mrf.mxu0 }
 0x307   : > { %v10033_v63 = vadd.f32 %v7047_v24, %v3675_v46  ;;  %v6943_v17 = vpop.f32.mrf.mxu1  ;;  %7568 = vmatpush3.bf16.msra.mxu0 %v8151_v31  ;;  %11354 = vst [vmem:[#allocation56_spill] sm:$0xff] %v10040_v13  ;;  %v3678_v31 = vadd.f32 %v6938_v42, %v9884_v6  ;;  %v2687_v42 = vld [vmem:[#allocation3 + $0x129] sm:$0xff] }
 0x308   : > { %v6944_v62 = vadd.f32 %v6943_v17, %v6942_v33  ;;  %v7049_v12 = vpop.f32.mrf.mxu0  ;;  %7460 = vmatpush3.bf16.msra.mxu1 %v8153_v26  ;;  %7569 = vmatprep.subr.bf16.mxu0 %v8156_v59  ;;  %v8163_v33 = vld [vmem:[%s11177_s4 + $0x120] sm:$0xff]   ;;  %v8159_v17 = vld [vmem:[%s11177_s4 + $0x90] sm:$0xff]  }
 0x309   : > { %v7050_v30 = vadd.f32 %v7049_v12, %v7048_v54  ;;  %v6945_v46 = vpop.f32.mrf.mxu1  ;;  %7886 = vmatmul.mubr.bf16.gmra.mxu1 %v10035_v21  ;;  %7461 = vmatprep.subr.bf16.mxu1 %v8154_v35  ;;  %v2688_v54 = vld [vmem:[#allocation3 + $0x131] sm:$0xff]  ;;  %v3683_v12 = vadd.f32 %v6941_v47, %v9884_v6 }
 0x30a   : > { %v7051_v26 = vpop.f32.mrf.mxu0  ;;  %4861 = vmatmul.mubr.bf16.gmra.mxu0 %v9494_v55  ;;  %7889 = vmatprep.mubr.bf16.mxu1 %v10040_v13  ;;  %v2690_v13 = vld [vmem:[#allocation3 + $0x151] sm:$0xff] }
 0x30b   : > { %v10055_v59 = vadd.f32 %v7050_v30, %v3678_v31  ;;  %4868 = vmatprep.mubr.bf16.mxu0 %v9454_v25  ;;  %v6946_v24 = vpop.f32.mrf.mxu1  ;;  %7570 = vmatpush3.bf16.msra.mxu0 %v8157_v34  ;;  %v8168_v25 = vld [vmem:[%s11177_s4 + $0x158] sm:$0xff]   ;;  %v2689_v30 = vld [vmem:[#allocation3 + $0x149] sm:$0xff] }
 0x30c   : > { %v6947_v0 = vadd.f32 %v6946_v24, %v6945_v46  ;;  %v7052_v35 = vpop.f32.mrf.mxu0  ;;  %7462 = vmatpush3.bf16.msra.mxu1 %v8155_v57  ;;  %7571 = vmatprep.subr.bf16.mxu0 %v8162_v36  ;;  %v8160_v57 = vld [vmem:[%s11177_s4 + $0xc8] sm:$0xff]   ;;  %v10073_v36 = vpack.c.bf16 %v2688_v54, %v2687_v42  ;;  %v8169_v47 = vld [vmem:[%s11177_s4 + $0x118] sm:$0xff]   ;;  %v8172_v42 = vld [vmem:[%s11177_s4 + $0x150] sm:$0xff]  }
 0x30d   : > { %11355 = vst [vmem:[#allocation57_spill] sm:$0xff] %v10055_v59  ;;  %v7053_v34 = vadd.f32 %v7052_v35, %v7051_v26  ;;  %v6948_v31 = vpop.f32.mrf.mxu1  ;;  %7463 = vmatprep.subr.bf16.mxu1 %v8158_v29  ;;  %v10078_v59 = vpack.c.bf16 %v2690_v13, %v2689_v30  ;;  %v8161_v29 = vld [vmem:[%s11177_s4 + $0x88] sm:$0xff]  }
 0x30e   : > { %v7054_v46 = vpop.f32.mrf.mxu0  ;;  %11356 = vst [vmem:[#allocation58_spill] sm:$0xff] %v10073_v36 }
 0x30f   : > { %v10071_v24 = vadd.f32 %v7053_v34, %v3683_v12  ;;  %v6949_v21 = vpop.f32.mrf.mxu1  ;;  %7572 = vmatpush3.bf16.msra.mxu0 %v8163_v33  ;;  %11357 = vst [vmem:[#allocation59_spill] sm:$0xff] %v10078_v59  ;;  %v3686_v33 = vadd.f32 %v6944_v62, %v9884_v6  ;;  %v2691_v62 = vld [vmem:[#allocation3 + $0x169] sm:$0xff] }
 0x310   : > { %v6950_v26 = vadd.f32 %v6949_v21, %v6948_v31  ;;  %v7055_v35 = vpop.f32.mrf.mxu0  ;;  %7464 = vmatpush3.bf16.msra.mxu1 %v8159_v17  ;;  %7573 = vmatprep.subr.bf16.mxu0 %v8168_v25  ;;  %v8164_v21 = vld [vmem:[%s11177_s4 + $0xc0] sm:$0xff]   ;;  %v8173_v34 = vld [vmem:[%s11177_s4 + $0x110] sm:$0xff]  }
 0x311   : > { %v7056_v54 = vadd.f32 %v7055_v35, %v7054_v46  ;;  %v6951_v12 = vpop.f32.mrf.mxu1  ;;  %7890 = vmatmul.mubr.bf16.gmra.mxu1 %v10073_v36  ;;  %7465 = vmatprep.subr.bf16.mxu1 %v8160_v57  ;;  %v2692_v57 = vld [vmem:[#allocation3 + $0x171] sm:$0xff]  ;;  %v8165_v46 = vld [vmem:[%s11177_s4 + $0x80] sm:$0xff]   ;;  %v3691_v35 = vadd.f32 %v6947_v0, %v9884_v6  ;;  %v8177_v0 = vld [vmem:[%s11177_s4 + $0x108] sm:$0xff]  }
 0x312   : > { %v7057_v13 = vpop.f32.mrf.mxu0  ;;  %4869 = vmatmul.mubr.bf16.gmra.mxu0 %v9511_v3  ;;  %7893 = vmatprep.mubr.bf16.mxu1 %v10078_v59  ;;  %v2694_v59 = vld [vmem:[#allocation3 + $0x191] sm:$0xff] }
 0x313   : > { %v10093_v17 = vadd.f32 %v7056_v54, %v3686_v33  ;;  %4876 = vmatprep.mubr.bf16.mxu0 %v9502_v43  ;;  %v6952_v25 = vpop.f32.mrf.mxu1  ;;  %7574 = vmatpush3.bf16.msra.mxu0 %v8169_v47  ;;  %v8176_v43 = vld [vmem:[%s11177_s4 + $0x148] sm:$0xff]  }
 0x314   : > { %v6953_v31 = vadd.f32 %v6952_v25, %v6951_v12  ;;  %v7058_v30 = vpop.f32.mrf.mxu0  ;;  %7466 = vmatpush3.bf16.msra.mxu1 %v8161_v29  ;;  %7575 = vmatprep.subr.bf16.mxu0 %v8172_v42  ;;  %v2693_v54 = vld [vmem:[#allocation3 + $0x189] sm:$0xff]  ;;  %v8166_v29 = vld [vmem:[%s11177_s4 + $0x1f8] sm:$0xff]   ;;  %v10111_v42 = vpack.c.bf16 %v2692_v57, %v2691_v62 }
 0x315   : > { %11358 = vst [vmem:[#allocation60_spill] sm:$0xff] %v10093_v17  ;;  %v7059_v47 = vadd.f32 %v7058_v30, %v7057_v13  ;;  %v6954_v33 = vpop.f32.mrf.mxu1  ;;  %7467 = vmatprep.subr.bf16.mxu1 %v8164_v21  ;;  %v10116_v17 = vpack.c.bf16 %v2694_v59, %v2693_v54  ;;  %v8180_v21 = vld [vmem:[%s11177_s4 + $0x140] sm:$0xff]   ;;  %v10134_v54 = vld [vmem:[%s11177_s4 + $0x238] sm:$0xff]  }
 0x316   : > { %v7060_v12 = vpop.f32.mrf.mxu0  ;;  %11359 = vst [vmem:[#allocation61_spill] sm:$0xff] %v10111_v42 }
 0x317   : > { %v10109_v25 = vadd.f32 %v7059_v47, %v3691_v35  ;;  %v6955_v36 = vpop.f32.mrf.mxu1  ;;  %7576 = vmatpush3.bf16.msra.mxu0 %v8173_v34  ;;  %11360 = vst [vmem:[#allocation62_spill] sm:$0xff] %v10116_v17  ;;  %v3694_v35 = vadd.f32 %v6950_v26, %v9884_v6  ;;  %v8181_v26 = vld [vmem:[%s11177_s4 + $0x100] sm:$0xff]  }
 0x318   : > { %v6956_v13 = vadd.f32 %v6955_v36, %v6954_v33  ;;  %v7061_v30 = vpop.f32.mrf.mxu0  ;;  %7468 = vmatpush3.bf16.msra.mxu1 %v8165_v46  ;;  %7577 = vmatprep.subr.bf16.mxu0 %v8176_v43  ;;  %v2695_v43 = vld [vmem:[#allocation3 + $0x1a9] sm:$0xff]  ;;  %v2696_v33 = vld [vmem:[#allocation3 + $0x1b1] sm:$0xff] }
 0x319   : > { %v7062_v47 = vadd.f32 %v7061_v30, %v7060_v12  ;;  %v6957_v62 = vpop.f32.mrf.mxu1  ;;  %7894 = vmatmul.mubr.bf16.gmra.mxu1 %v10111_v42  ;;  %7677 = vmatprep.subr.bf16.mxu1 %v8166_v29  ;;  %v3699_v29 = vadd.f32 %v6953_v31, %v9884_v6  ;;  %v2697_v30 = vld [vmem:[#allocation3 + $0x1c9] sm:$0xff] }
 0x31a   : > { %v7063_v34 = vpop.f32.mrf.mxu0  ;;  %4877 = vmatmul.mubr.bf16.gmra.mxu0 %v9551_v53  ;;  %7897 = vmatprep.mubr.bf16.mxu1 %v10116_v17 }
 0x31b   : > { %v10125_v59 = vadd.f32 %v7062_v47, %v3694_v35  ;;  %4884 = vmatprep.mubr.bf16.mxu0 %v9490_v40  ;;  %v6958_v36 = vpop.f32.mrf.mxu1  ;;  %7578 = vmatpush3.bf16.msra.mxu0 %v8177_v0  ;;  %v2698_v0 = vld [vmem:[#allocation3 + $0x1d1] sm:$0xff] }
 0x31c   : > { %v6959_v57 = vadd.f32 %v6958_v36, %v6957_v62  ;;  %v7064_v46 = vpop.f32.mrf.mxu0  ;;  %7579 = vmatprep.subr.bf16.mxu0 %v8180_v21  ;;  %v10139_v62 = vpack.c.bf16 %v2696_v33, %v2695_v43  ;;  %v10141_v42 = vpack.c.bf16 %v2698_v0, %v2697_v30 }
 0x31d   : > { %11361 = vst [vmem:[#allocation63_spill] sm:$0xff] %v10125_v59  ;;  %v7065_v12 = vadd.f32 %v7064_v46, %v7063_v34  ;;  %v6960_v40 = vpop.f32.mrf.mxu1  ;;  %v3702_v59 = vadd.f32 %v6956_v13, %v9884_v6 }
 0x31e   : > { %v7066_v35 = vpop.f32.mrf.mxu0  ;;  %11362 = vst [vmem:[#allocation64_spill] sm:$0xff] %v10139_v62  ;;  %11363 = vst [vmem:[#allocation65_spill] sm:$0xff] %v10141_v42  ;;  %v3707_v13 = vadd.f32 %v6959_v57, %v9884_v6  ;;  %v2703_v57 = vld [vmem:[#allocation3 + $0x229] sm:$0xff] }
 0x31f   : > { %v10137_v47 = vadd.f32 %v7065_v12, %v3699_v29  ;;  %v6961_v17 = vpop.f32.mrf.mxu1  ;;  %7580 = vmatpush3.bf16.msra.mxu0 %v8181_v26  ;;  %v2699_v29 = vld [vmem:[#allocation3 + $0x1e9] sm:$0xff]  ;;  %v2700_v12 = vld [vmem:[#allocation3 + $0x1f1] sm:$0xff] }
 0x320   : > { %v6962_v36 = vadd.f32 %v6961_v17, %v6960_v40  ;;  %v7067_v21 = vpop.f32.mrf.mxu0  ;;  %7909 = vmatprep.subr.bf16.mxu0 %v10134_v54 }
 0x321   : > { %v7068_v31 = vadd.f32 %v7067_v21, %v7066_v35  ;;  %v6963_v34 = vpop.f32.mrf.mxu1  ;;  %7898 = vmatmul.mubr.bf16.gmra.mxu1 %v10139_v62  ;;  %v10154_v62 = vpack.c.bf16 %v2700_v12, %v2699_v29 }
 0x322   : > { %v7069_v46 = vpop.f32.mrf.mxu0  ;;  %4885 = vmatmul.mubr.bf16.gmra.mxu0 %v9591_v50  ;;  %7901 = vmatprep.mubr.bf16.mxu1 %v10141_v42 }
 0x323   : > { %v10148_v43 = vadd.f32 %v7068_v31, %v3702_v59  ;;  %4892 = vmatprep.mubr.bf16.mxu0 %v9543_v48  ;;  %v6964_v17 = vpop.f32.mrf.mxu1  ;;  %11365 = vst [vmem:[#allocation67_spill] sm:$0xff] %v10154_v62  ;;  %v3710_v31 = vadd.f32 %v6962_v36, %v9884_v6 }
 0x324   : > { %v6965_v26 = vadd.f32 %v6964_v17, %v6963_v34  ;;  %v7070_v33 = vpop.f32.mrf.mxu0 }
 0x325   : > { %11364 = vst [vmem:[#allocation66_spill] sm:$0xff] %v10148_v43  ;;  %v7071_v40 = vadd.f32 %v7070_v33, %v7069_v46  ;;  %v6966_v30 = vpop.f32.mrf.mxu1  ;;  %v2704_v46 = vld [vmem:[#allocation3 + $0x231] sm:$0xff] }
 0x326   : > { %v7072_v0 = vpop.f32.mrf.mxu0  ;;  %v3715_v36 = vadd.f32 %v6965_v26, %v9884_v6 }
 0x327   : > { %v10152_v35 = vadd.f32 %v7071_v40, %v3707_v13  ;;  %v6967_v21 = vpop.f32.mrf.mxu1 }
 0x328   : > { %v6968_v42 = vadd.f32 %v6967_v21, %v6966_v30  ;;  %v7073_v59 = vpop.f32.mrf.mxu0  ;;  %v10164_v30 = vpack.c.bf16 %v2704_v46, %v2703_v57 }
 0x329   : > { %v7074_v48 = vadd.f32 %v7073_v59, %v7072_v0  ;;  %v6969_v43 = vpop.f32.mrf.mxu1  ;;  %7902 = vmatmul.mubr.bf16.gmra.mxu1 %v10154_v62 }
 0x32a   : > { %v7075_v34 = vpop.f32.mrf.mxu0  ;;  %4893 = vmatmul.mubr.bf16.gmra.mxu0 %v9626_v19  ;;  %7905 = vmatprep.mubr.bf16.mxu1 %v9941_v45  ;;  %11367 = vst [vmem:[#allocation69_spill] sm:$0xff] %v10164_v30 }
 0x32b   : > { %v10160_v17 = vadd.f32 %v7074_v48, %v3710_v31  ;;  %4900 = vmatprep.mubr.bf16.mxu0 %v9530_v41  ;;  %v6970_v33 = vpop.f32.mrf.mxu1  ;;  %v3718_v31 = vadd.f32 %v6968_v42, %v9884_v6 }
 0x32c   : > { %v6971_v29 = vadd.f32 %v6970_v33, %v6969_v43  ;;  %v7076_v12 = vpop.f32.mrf.mxu0 }
 0x32d   : > { %11366 = vst [vmem:[#allocation68_spill] sm:$0xff] %v10160_v17  ;;  %v7077_v13 = vadd.f32 %v7076_v12, %v7075_v34  ;;  %v6972_v40 = vpop.f32.mrf.mxu1 }
 0x32e   : > { %v7078_v0 = vpop.f32.mrf.mxu0  ;;  %v3723_v46 = vadd.f32 %v6971_v29, %v9884_v6 }
 0x32f   : > { %v10166_v21 = vadd.f32 %v7077_v13, %v3715_v36  ;;  %v6973_v59 = vpop.f32.mrf.mxu1  ;;  %v8167_v13 = vld [vmem:[%s11177_s4 + $0x1b8] sm:$0xff]  }
 0x330   : > { %v6974_v62 = vadd.f32 %v6973_v59, %v6972_v40  ;;  %v7079_v45 = vpop.f32.mrf.mxu0 }
 0x331   : > { %v7080_v48 = vadd.f32 %v7079_v45, %v7078_v0  ;;  %v6975_v17 = vpop.f32.mrf.mxu1  ;;  %7906 = vmatmul.mubr.bf16.gmra.mxu1 %v10164_v30 }
 0x332   : > { %v7081_v41 = vpop.f32.mrf.mxu0  ;;  %4901 = vmatmul.mubr.bf16.gmra.mxu0 %v9646_v1  ;;  %5013 = vmatprep.mubr.bf16.mxu1 %v9494_v55 }
 0x333   : > { %v10172_v43 = vadd.f32 %v7080_v48, %v3718_v31  ;;  %4908 = vmatprep.mubr.bf16.mxu0 %v9583_v32  ;;  %v6976_v26 = vpop.f32.mrf.mxu1  ;;  %v8170_v32 = vld [vmem:[%s11177_s4 + $0x1f0] sm:$0xff]  }
 0x334   : > { %v6977_v34 = vadd.f32 %v6976_v26, %v6975_v17  ;;  %v7082_v57 = vpop.f32.mrf.mxu0  ;;  %v3726_v17 = vadd.f32 %v6974_v62, %v9884_v6 }
 0x335   : > { %v7083_v33 = vadd.f32 %v7082_v57, %v7081_v41  ;;  %v6978_v42 = vpop.f32.mrf.mxu1  ;;  %v8171_v41 = vld [vmem:[%s11177_s4 + $0x1b0] sm:$0xff]  }
 0x336   : > { %v7084_v45 = vpop.f32.mrf.mxu0  ;;  %v3731_v57 = vadd.f32 %v6977_v34, %v9884_v6  ;;  %v8178_v34 = vld [vmem:[%s11177_s4 + $0x1e0] sm:$0xff]  }
 0x337   : > { %v10176_v12 = vadd.f32 %v7083_v33, %v3723_v46  ;;  %v6979_v36 = vpop.f32.mrf.mxu1 }
 0x338   : > { %v6980_v55 = vadd.f32 %v6979_v36, %v6978_v42  ;;  %v7085_v40 = vpop.f32.mrf.mxu0 }
 0x339   : > { %v7086_v0 = vadd.f32 %v7085_v40, %v7084_v45  ;;  %v7109_v29 = vpop.f32.mrf.mxu1  ;;  %5014 = vmatmul.mubr.bf16.vlgmr.msra.gmra.mxu1 %v9488_v15  ;;  %v8174_v15 = vld [vmem:[%s11177_s4 + $0x1e8] sm:$0xff]  }
 0x33a   : > { %v7087_v59 = vpop.f32.mrf.mxu0  ;;  %4909 = vmatmul.mubr.bf16.gmra.mxu0 %v9665_v2  ;;  %5021 = vmatprep.mubr.bf16.mxu1 %v9511_v3 }
 0x33b   : > { %v10188_v31 = vadd.f32 %v7086_v0, %v3726_v17  ;;  %4916 = vmatprep.mubr.bf16.mxu0 %v9572_v9  ;;  %v7110_v48 = vpop.f32.mrf.mxu1  ;;  %7678 = vmatpush3.bf16.msra.mxu1 %v8167_v13  ;;  %v8175_v13 = vld [vmem:[%s11177_s4 + $0x1a8] sm:$0xff]   ;;  %v3734_v17 = vadd.f32 %v6980_v55, %v9884_v6  ;;  %v8179_v6 = vld [vmem:[%s11177_s4 + $0x1a0] sm:$0xff]  }
 0x33c   : > { %v7088_v62 = vpop.f32.mrf.mxu0  ;;  %v7111_v26 = vadd.f32 %v7110_v48, %v7109_v29  ;;  %7679 = vmatprep.subr.bf16.mxu1 %v8170_v32 }
 0x33d   : > { %v7089_v46 = vadd.f32 %v7088_v62, %v7087_v59  ;;  %v7112_v33 = vpop.f32.mrf.mxu1 }
 0x33e   : > { %v3933_v42 = vadd.f32 %v7111_v26, %v9891_v39  ;;  %v7090_v9 = vpop.f32.mrf.mxu0 }
 0x33f   : > { %v10199_v45 = vadd.f32 %v7089_v46, %v3731_v57  ;;  %v7113_v36 = vpop.f32.mrf.mxu1  ;;  %7680 = vmatpush3.bf16.msra.mxu1 %v8171_v41 }
 0x340   : > { %v7091_v40 = vpop.f32.mrf.mxu0  ;;  %v7114_v32 = vadd.f32 %v7113_v36, %v7112_v33  ;;  %7681 = vmatprep.subr.bf16.mxu1 %v8174_v15 }
 0x341   : > { %11368 = vst [vmem:[#allocation70_spill] sm:$0xff] %v10199_v45  ;;  %v7092_v0 = vadd.f32 %v7091_v40, %v7090_v9  ;;  %v7115_v39 = vpop.f32.mrf.mxu1  ;;  %5022 = vmatmul.mubr.bf16.gmra.mxu1 %v9541_v61  ;;  %v8185_v40 = vld [vmem:[%s11177_s4 + $0x1d0] sm:$0xff]  }
 0x342   : > { %v3936_v29 = vadd.f32 %v7114_v32, %v9899_v7  ;;  %v7221_v59 = vpop.f32.mrf.mxu0  ;;  %4917 = vmatmul.mubr.bf16.gmra.mxu0 %v9676_v37  ;;  %5029 = vmatprep.mubr.bf16.mxu1 %v9551_v53  ;;  %v8182_v7 = vld [vmem:[%s11177_s4 + $0x1d8] sm:$0xff]  }
 0x343   : > { %v10212_v48 = vadd.f32 %v7092_v0, %v3734_v17  ;;  %4924 = vmatprep.mubr.bf16.mxu0 %v9618_v8  ;;  %v7116_v41 = vpop.f32.mrf.mxu1  ;;  %7682 = vmatpush3.bf16.msra.mxu1 %v8175_v13  ;;  %v8183_v8 = vld [vmem:[%s11177_s4 + $0x198] sm:$0xff]   ;;  %v8186_v0 = vld [vmem:[%s11177_s4 + $0x190] sm:$0xff]  }
 0x344   : > { %v7117_v55 = vadd.f32 %v7116_v41, %v7115_v39  ;;  %v7222_v62 = vpop.f32.mrf.mxu0  ;;  %7683 = vmatprep.subr.bf16.mxu1 %v8178_v34 }
 0x345   : > { %11369 = vst [vmem:[#allocation71_spill] sm:$0xff] %v10212_v48  ;;  %v7223_v26 = vadd.f32 %v7222_v62, %v7221_v59  ;;  %v7118_v15 = vpop.f32.mrf.mxu1 }
 0x346   : > { %v3941_v57 = vadd.f32 %v7117_v55, %v9903_v4  ;;  %v7224_v46 = vpop.f32.mrf.mxu0 }
 0x347   : > { %v7119_v33 = vpop.f32.mrf.mxu1  ;;  %7684 = vmatpush3.bf16.msra.mxu1 %v8179_v6  ;;  %v10225_v9 = vadd.f32 %v7223_v26, %v3933_v42  ;;  %v8189_v26 = vld [vmem:[%s11177_s4 + $0x188] sm:$0xff]  }
 0x348   : > { %v7120_v36 = vadd.f32 %v7119_v33, %v7118_v15  ;;  %v7225_v13 = vpop.f32.mrf.mxu0  ;;  %7685 = vmatprep.subr.bf16.mxu1 %v8182_v7  ;;  %v8191_v33 = vld [vmem:[%s11177_s4 + $0x1c0] sm:$0xff]  }
 0x349   : > { %v7226_v32 = vadd.f32 %v7225_v13, %v7224_v46  ;;  %v7121_v34 = vpop.f32.mrf.mxu1  ;;  %5030 = vmatmul.mubr.bf16.gmra.mxu1 %v9581_v52 }
 0x34a   : > { %v3944_v4 = vadd.f32 %v7120_v36, %v9911_v10  ;;  %v7227_v17 = vpop.f32.mrf.mxu0  ;;  %4925 = vmatmul.mubr.bf16.gmra.mxu0 %v9684_v58  ;;  %5037 = vmatprep.mubr.bf16.mxu1 %v9591_v50  ;;  %v8188_v10 = vld [vmem:[%s11177_s4 + $0x1c8] sm:$0xff]  }
 0x34b   : > { %4932 = vmatprep.mubr.bf16.mxu0 %v9609_v60  ;;  %v7122_v42 = vpop.f32.mrf.mxu1  ;;  %7686 = vmatpush3.bf16.msra.mxu1 %v8183_v8  ;;  %v10238_v39 = vadd.f32 %v7226_v32, %v3936_v29 }
 0x34c   : > { %v7123_v59 = vadd.f32 %v7122_v42, %v7121_v34  ;;  %v7228_v41 = vpop.f32.mrf.mxu0  ;;  %7687 = vmatprep.subr.bf16.mxu1 %v8185_v40  ;;  %v8192_v40 = vld [vmem:[%s11177_s4 + $0x180] sm:$0xff]  }
 0x34d   : > { %v7229_v6 = vadd.f32 %v7228_v41, %v7227_v17  ;;  %v7124_v55 = vpop.f32.mrf.mxu1 }
 0x34e   : > { %v3949_v62 = vadd.f32 %v7123_v59, %v9915_v5  ;;  %v7230_v60 = vpop.f32.mrf.mxu0 }
 0x34f   : > { %v7125_v7 = vpop.f32.mrf.mxu1  ;;  %7688 = vmatpush3.bf16.msra.mxu1 %v8186_v0  ;;  %v10247_v29 = vadd.f32 %v7229_v6, %v3941_v57 }
 0x350   : > { %v7126_v15 = vadd.f32 %v7125_v7, %v7124_v55  ;;  %v7231_v46 = vpop.f32.mrf.mxu0  ;;  %7689 = vmatprep.subr.bf16.mxu1 %v8188_v10 }
 0x351   : > { %v7232_v8 = vadd.f32 %v7231_v46, %v7230_v60  ;;  %v7127_v36 = vpop.f32.mrf.mxu1  ;;  %5038 = vmatmul.mubr.bf16.gmra.mxu1 %v9616_v16 }
 0x352   : > { %v3952_v5 = vadd.f32 %v7126_v15, %v9923_v23  ;;  %v7233_v13 = vpop.f32.mrf.mxu0  ;;  %4933 = vmatmul.mubr.bf16.gmra.mxu0 %v9694_v18  ;;  %5045 = vmatprep.mubr.bf16.mxu1 %v9626_v19 }
 0x353   : > { %4940 = vmatprep.mubr.bf16.mxu0 %v9648_v11  ;;  %v7128_v57 = vpop.f32.mrf.mxu1  ;;  %7690 = vmatpush3.bf16.msra.mxu1 %v8189_v26  ;;  %v10260_v32 = vadd.f32 %v7232_v8, %v3944_v4 }
 0x354   : > { %v7129_v34 = vadd.f32 %v7128_v57, %v7127_v36  ;;  %v7234_v17 = vpop.f32.mrf.mxu0  ;;  %7691 = vmatprep.subr.bf16.mxu1 %v8191_v33 }
 0x355   : > { %v7235_v42 = vadd.f32 %v7234_v17, %v7233_v13  ;;  %v7130_v23 = vpop.f32.mrf.mxu1 }
 0x356   : > { %v3957_v0 = vadd.f32 %v7129_v34, %v9927_v28  ;;  %v7236_v59 = vpop.f32.mrf.mxu0 }
 0x357   : > { %v7131_v41 = vpop.f32.mrf.mxu1  ;;  %7692 = vmatpush3.bf16.msra.mxu1 %v8192_v40  ;;  %v10263_v10 = vadd.f32 %v7235_v42, %v3949_v62  ;;  %v11370_v42 = vld [vmem:[#allocation19_spill] sm:$0xff] }
 0x358   : > { %v7132_v11 = vadd.f32 %v7131_v41, %v7130_v23  ;;  %v7237_v6 = vpop.f32.mrf.mxu0  ;;  %v11371_v23 = vld [vmem:[#allocation6_spill] sm:$0xff] }
 0x359   : > { %v7238_v55 = vadd.f32 %v7237_v6, %v7236_v59  ;;  %v7133_v60 = vpop.f32.mrf.mxu1  ;;  %5046 = vmatmul.mubr.bf16.gmra.mxu1 %v9644_v49 }
 0x35a   : > { %v3960_v4 = vadd.f32 %v7132_v11, %v9935_v20  ;;  %v7239_v7 = vpop.f32.mrf.mxu0  ;;  %4941 = vmatmul.mubr.bf16.gmra.mxu0 %v9702_v22  ;;  %5053 = vmatprep.mubr.bf16.mxu1 %v9646_v1 }
 0x35b   : > { %4948 = vmatprep.mubr.bf16.mxu0 %v9641_v56  ;;  %v7134_v28 = vpop.f32.mrf.mxu1  ;;  %v10270_v26 = vadd.f32 %v7238_v55, %v3952_v5  ;;  %v11372_v55 = vld [vmem:[#allocation46_spill] sm:$0xff] }
 0x35c   : > { %v7135_v62 = vadd.f32 %v7134_v28, %v7133_v60  ;;  %v7240_v15 = vpop.f32.mrf.mxu0 }
 0x35d   : > { %v7241_v46 = vadd.f32 %v7240_v15, %v7239_v7  ;;  %v7136_v33 = vpop.f32.mrf.mxu1 }
 0x35e   : > { %v3965_v8 = vadd.f32 %v7135_v62, %v9939_v38  ;;  %v7242_v36 = vpop.f32.mrf.mxu0 }
 0x35f   : > { %v7137_v13 = vpop.f32.mrf.mxu1  ;;  %v10273_v57 = vadd.f32 %v7241_v46, %v3957_v0 }
 0x360   : > { %v7138_v20 = vadd.f32 %v7137_v13, %v7136_v33  ;;  %v7243_v40 = vpop.f32.mrf.mxu0  ;;  %v11374_v13 = vld [vmem:[#allocation49_spill] sm:$0xff] }
 0x361   : > { %v7244_v34 = vadd.f32 %v7243_v40, %v7242_v36  ;;  %v7139_v17 = vpop.f32.mrf.mxu1  ;;  %5054 = vmatmul.mubr.bf16.gmra.mxu1 %v9658_v14  ;;  %v11373_v36 = vld [vmem:[#allocation11_spill] sm:$0xff]  ;;  %v11375_v40 = vld [vmem:[#allocation21_spill] sm:$0xff] }
 0x362   : > { %v3968_v56 = vadd.f32 %v7138_v20, %v9949_v27  ;;  %v7245_v5 = vpop.f32.mrf.mxu0  ;;  %4949 = vmatmul.mubr.bf16.gmra.mxu0 %v11370_v42  ;;  %5061 = vmatprep.mubr.bf16.mxu1 %v9665_v2  ;;  %v11397_v2 = vld [vmem:[#allocation24_spill] sm:$0xff] }
 0x363   : > { %4956 = vmatprep.mubr.bf16.mxu0 %v11371_v23  ;;  %v7140_v38 = vpop.f32.mrf.mxu1  ;;  %v10280_v59 = vadd.f32 %v7244_v34, %v3960_v4  ;;  %v11376_v34 = vld [vmem:[#allocation7_spill] sm:$0xff] }
 0x364   : > { %v7141_v0 = vadd.f32 %v7140_v38, %v7139_v17  ;;  %v7246_v41 = vpop.f32.mrf.mxu0 }
 0x365   : > { %v7247_v11 = vadd.f32 %v7246_v41, %v7245_v5  ;;  %v7142_v6 = vpop.f32.mrf.mxu1 }
 0x366   : > { %v3973_v60 = vadd.f32 %v7141_v0, %v11372_v55  ;;  %v7248_v7 = vpop.f32.mrf.mxu0 }
 0x367   : > { %v7143_v28 = vpop.f32.mrf.mxu1  ;;  %v10283_v62 = vadd.f32 %v7247_v11, %v3965_v8 }
 0x368   : > { %v7144_v27 = vadd.f32 %v7143_v28, %v7142_v6  ;;  %v7249_v15 = vpop.f32.mrf.mxu0 }
 0x369   : > { %v7250_v46 = vadd.f32 %v7249_v15, %v7248_v7  ;;  %v7145_v33 = vpop.f32.mrf.mxu1  ;;  %5062 = vmatmul.mubr.bf16.gmra.mxu1 %v11373_v36 }
 0x36a   : > { %v3976_v20 = vadd.f32 %v7144_v27, %v11374_v13  ;;  %v7251_v4 = vpop.f32.mrf.mxu0  ;;  %4957 = vmatmul.mubr.bf16.gmra.mxu0 %v11375_v40  ;;  %5069 = vmatprep.mubr.bf16.mxu1 %v9676_v37  ;;  %v11377_v13 = vld [vmem:[#allocation14_spill] sm:$0xff] }
 0x36b   : > { %4964 = vmatprep.mubr.bf16.mxu0 %v11376_v34  ;;  %v7146_v17 = vpop.f32.mrf.mxu1  ;;  %v10290_v5 = vadd.f32 %v7250_v46, %v3968_v56  ;;  %v11378_v34 = vld [vmem:[#allocation53_spill] sm:$0xff]  ;;  %v11379_v46 = vld [vmem:[#allocation23_spill] sm:$0xff] }
 0x36c   : > { %v7147_v8 = vadd.f32 %v7146_v17, %v7145_v33  ;;  %v7252_v23 = vpop.f32.mrf.mxu0  ;;  %v11380_v33 = vld [vmem:[#allocation8_spill] sm:$0xff] }
 0x36d   : > { %v7253_v38 = vadd.f32 %v7252_v23, %v7251_v4  ;;  %v7148_v0 = vpop.f32.mrf.mxu1 }
 0x36e   : > { %v3981_v41 = vadd.f32 %v7147_v8, %v9969_v44  ;;  %v7254_v11 = vpop.f32.mrf.mxu0 }
 0x36f   : > { %v7149_v6 = vpop.f32.mrf.mxu1  ;;  %v10293_v55 = vadd.f32 %v7253_v38, %v3973_v60 }
 0x370   : > { %v7150_v7 = vadd.f32 %v7149_v6, %v7148_v0  ;;  %v7255_v28 = vpop.f32.mrf.mxu0 }
 0x371   : > { %v7256_v27 = vadd.f32 %v7255_v28, %v7254_v11  ;;  %v7151_v15 = vpop.f32.mrf.mxu1  ;;  %5070 = vmatmul.mubr.bf16.gmra.mxu1 %v11377_v13 }
 0x372   : > { %v3984_v30 = vadd.f32 %v7150_v7, %v11378_v34  ;;  %v7257_v56 = vpop.f32.mrf.mxu0  ;;  %4965 = vmatmul.mubr.bf16.gmra.mxu0 %v11379_v46  ;;  %5077 = vmatprep.mubr.bf16.mxu1 %v9684_v58  ;;  %v11381_v58 = vld [vmem:[#allocation13_spill] sm:$0xff] }
 0x373   : > { %4972 = vmatprep.mubr.bf16.mxu0 %v11380_v33  ;;  %v7152_v44 = vpop.f32.mrf.mxu1  ;;  %v10300_v4 = vadd.f32 %v7256_v27, %v3976_v20  ;;  %v11382_v33 = vld [vmem:[#allocation5_spill] sm:$0xff] }
 0x374   : > { %v7153_v60 = vadd.f32 %v7152_v44, %v7151_v15  ;;  %v7258_v17 = vpop.f32.mrf.mxu0  ;;  %v11383_v27 = vld [vmem:[#allocation25_spill] sm:$0xff] }
 0x375   : > { %v7259_v8 = vadd.f32 %v7258_v17, %v7257_v56  ;;  %v7154_v23 = vpop.f32.mrf.mxu1 }
 0x376   : > { %v3989_v38 = vadd.f32 %v7153_v60, %v9995_v51  ;;  %v7260_v0 = vpop.f32.mrf.mxu0 }
 0x377   : > { %v7155_v11 = vpop.f32.mrf.mxu1  ;;  %v10303_v6 = vadd.f32 %v7259_v8, %v3981_v41 }
 0x378   : > { %v7156_v7 = vadd.f32 %v7155_v11, %v7154_v23  ;;  %v7261_v28 = vpop.f32.mrf.mxu0 }
 0x379   : > { %v7262_v34 = vadd.f32 %v7261_v28, %v7260_v0  ;;  %v7157_v48 = vpop.f32.mrf.mxu1  ;;  %5078 = vmatmul.mubr.bf16.gmra.mxu1 %v11381_v58  ;;  %v8187_v28 = vld [vmem:[%s11177_s4 + $0x230] sm:$0xff]  }
 0x37a   : > { %v3992_v45 = vadd.f32 %v7156_v7, %v11382_v33  ;;  %v7263_v20 = vpop.f32.mrf.mxu0  ;;  %4973 = vmatmul.mubr.bf16.gmra.mxu0 %v11383_v27  ;;  %5085 = vmatprep.mubr.bf16.mxu1 %v9694_v18 }
 0x37b   : > { %5174 = vmatprep.mubr.bf16.mxu0 %v9541_v61  ;;  %v7158_v51 = vpop.f32.mrf.mxu1  ;;  %v10310_v15 = vadd.f32 %v7262_v34, %v3984_v30  ;;  %v11384_v30 = vld [vmem:[#allocation16_spill] sm:$0xff] }
 0x37c   : > { %v7159_v41 = vadd.f32 %v7158_v51, %v7157_v48  ;;  %v7264_v56 = vpop.f32.mrf.mxu0  ;;  %v11385_v48 = vld [vmem:[#allocation57_spill] sm:$0xff]  ;;  %v11386_v51 = vld [vmem:[#allocation28_spill] sm:$0xff] }
 0x37d   : > { %v7265_v44 = vadd.f32 %v7264_v56, %v7263_v20  ;;  %v7160_v60 = vpop.f32.mrf.mxu1 }
 0x37e   : > { %v3997_v17 = vadd.f32 %v7159_v41, %v10033_v63  ;;  %v7266_v8 = vpop.f32.mrf.mxu0 }
 0x37f   : > { %v7161_v23 = vpop.f32.mrf.mxu1  ;;  %v10313_v0 = vadd.f32 %v7265_v44, %v3989_v38  ;;  %v8190_v44 = vld [vmem:[%s11177_s4 + $0x228] sm:$0xff]  }
 0x380   : > { %v7162_v11 = vadd.f32 %v7161_v23, %v7160_v60  ;;  %v7267_v7 = vpop.f32.mrf.mxu0 }
 0x381   : > { %v7268_v61 = vadd.f32 %v7267_v7, %v7266_v8  ;;  %v7163_v33 = vpop.f32.mrf.mxu1  ;;  %5086 = vmatmul.mubr.bf16.gmra.mxu1 %v11384_v30 }
 0x382   : > { %v4000_v34 = vadd.f32 %v7162_v11, %v11385_v48  ;;  %v7269_v20 = vpop.f32.mrf.mxu0  ;;  %5175 = vmatmul.mubr.bf16.vlgmr.msra.gmra.mxu0 %v11386_v51  ;;  %5093 = vmatprep.mubr.bf16.mxu1 %v9702_v22  ;;  %v11387_v51 = vld [vmem:[#allocation18_spill] sm:$0xff] }
 0x383   : > { %5182 = vmatprep.mubr.bf16.mxu0 %v9581_v52  ;;  %7910 = vmatpush3.bf16.msra.mxu0 %v10134_v54  ;;  %v7164_v63 = vpop.f32.mrf.mxu1  ;;  %v10324_v38 = vadd.f32 %v7268_v61, %v3992_v45  ;;  %v8193_v45 = vld [vmem:[%s11177_s4 + $0x220] sm:$0xff]  }
 0x384   : > { %v7165_v41 = vadd.f32 %v7164_v63, %v7163_v33  ;;  %v7270_v56 = vpop.f32.mrf.mxu0  ;;  %7911 = vmatprep.subr.bf16.mxu0 %v8187_v28 }
 0x385   : > { %v7271_v60 = vadd.f32 %v7270_v56, %v7269_v20  ;;  %v7166_v8 = vpop.f32.mrf.mxu1  ;;  %v11388_v20 = vld [vmem:[#allocation60_spill] sm:$0xff] }
 0x386   : > { %v4005_v23 = vadd.f32 %v7165_v41, %v10071_v24  ;;  %v7272_v11 = vpop.f32.mrf.mxu0  ;;  %v11389_v24 = vld [vmem:[#allocation30_spill] sm:$0xff] }
 0x387   : > { %v7167_v7 = vpop.f32.mrf.mxu1  ;;  %7912 = vmatpush3.bf16.msra.mxu0 %v8187_v28  ;;  %v10330_v52 = vadd.f32 %v7271_v60, %v3997_v17 }
 0x388   : > { %v7168_v54 = vadd.f32 %v7167_v7, %v7166_v8  ;;  %v7273_v48 = vpop.f32.mrf.mxu0  ;;  %7913 = vmatprep.subr.bf16.mxu0 %v8190_v44  ;;  %v8194_v8 = vld [vmem:[%s11177_s4 + $0x218] sm:$0xff]  }
 0x389   : > { %v7274_v61 = vadd.f32 %v7273_v48, %v7272_v11  ;;  %v7169_v33 = vpop.f32.mrf.mxu1  ;;  %5094 = vmatmul.mubr.bf16.gmra.mxu1 %v11387_v51 }
 0x38a   : > { %v4008_v63 = vadd.f32 %v7168_v54, %v11388_v20  ;;  %v7275_v56 = vpop.f32.mrf.mxu0  ;;  %5183 = vmatmul.mubr.bf16.gmra.mxu0 %v11389_v24  ;;  %5101 = vmatprep.mubr.bf16.mxu1 %v11370_v42 }
 0x38b   : > { %5190 = vmatprep.mubr.bf16.mxu0 %v9616_v16  ;;  %v7170_v17 = vpop.f32.mrf.mxu1  ;;  %7914 = vmatpush3.bf16.msra.mxu0 %v8190_v44  ;;  %v10340_v28 = vadd.f32 %v7274_v61, %v4000_v34  ;;  %v8195_v34 = vld [vmem:[%s11177_s4 + $0x210] sm:$0xff]  }
 0x38c   : > { %v7171_v41 = vadd.f32 %v7170_v17, %v7169_v33  ;;  %v7276_v60 = vpop.f32.mrf.mxu0  ;;  %7915 = vmatprep.subr.bf16.mxu0 %v8193_v45  ;;  %v11390_v17 = vld [vmem:[#allocation20_spill] sm:$0xff] }
 0x38d   : > { %v7277_v11 = vadd.f32 %v7276_v60, %v7275_v56  ;;  %v7172_v7 = vpop.f32.mrf.mxu1  ;;  %v11391_v56 = vld [vmem:[#allocation63_spill] sm:$0xff] }
 0x38e   : > { %v4013_v54 = vadd.f32 %v7171_v41, %v10109_v25  ;;  %v7278_v48 = vpop.f32.mrf.mxu0  ;;  %v11392_v25 = vld [vmem:[#allocation31_spill] sm:$0xff] }
 0x38f   : > { %v7173_v20 = vpop.f32.mrf.mxu1  ;;  %7916 = vmatpush3.bf16.msra.mxu0 %v8193_v45  ;;  %v10346_v42 = vadd.f32 %v7277_v11, %v4005_v23 }
 0x390   : > { %v7174_v16 = vadd.f32 %v7173_v20, %v7172_v7  ;;  %v7279_v44 = vpop.f32.mrf.mxu0  ;;  %7917 = vmatprep.subr.bf16.mxu0 %v8194_v8  ;;  %v8196_v7 = vld [vmem:[%s11177_s4 + $0x208] sm:$0xff]  }
 0x391   : > { %v7280_v61 = vadd.f32 %v7279_v44, %v7278_v48  ;;  %v7175_v33 = vpop.f32.mrf.mxu1  ;;  %5102 = vmatmul.mubr.bf16.gmra.mxu1 %v11390_v17 }
 0x392   : > { %v4016_v60 = vadd.f32 %v7174_v16, %v11391_v56  ;;  %v7281_v22 = vpop.f32.mrf.mxu0  ;;  %5191 = vmatmul.mubr.bf16.gmra.mxu0 %v11392_v25  ;;  %5109 = vmatprep.mubr.bf16.mxu1 %v11375_v40 }
 0x393   : > { %5198 = vmatprep.mubr.bf16.mxu0 %v9644_v49  ;;  %v7176_v23 = vpop.f32.mrf.mxu1  ;;  %7918 = vmatpush3.bf16.msra.mxu0 %v8194_v8  ;;  %v10356_v45 = vadd.f32 %v7280_v61, %v4008_v63  ;;  %v8197_v63 = vld [vmem:[%s11177_s4 + $0x200] sm:$0xff]  }
 0x394   : > { %v7177_v41 = vadd.f32 %v7176_v23, %v7175_v33  ;;  %v7282_v11 = vpop.f32.mrf.mxu0  ;;  %7919 = vmatprep.subr.bf16.mxu0 %v8195_v34  ;;  %v11394_v23 = vld [vmem:[#allocation22_spill] sm:$0xff] }
 0x395   : > { %v7283_v48 = vadd.f32 %v7282_v11, %v7281_v22  ;;  %v7178_v20 = vpop.f32.mrf.mxu1  ;;  %v11395_v22 = vld [vmem:[#allocation66_spill] sm:$0xff] }
 0x396   : > { %v4021_v16 = vadd.f32 %v7177_v41, %v10137_v47  ;;  %v7284_v44 = vpop.f32.mrf.mxu0  ;;  %v11396_v47 = vld [vmem:[#allocation32_spill] sm:$0xff] }
 0x397   : > { %v7179_v56 = vpop.f32.mrf.mxu1  ;;  %7920 = vmatpush3.bf16.msra.mxu0 %v8195_v34  ;;  %v10362_v40 = vadd.f32 %v7283_v48, %v4013_v54 }
 0x398   : > { %v7180_v49 = vadd.f32 %v7179_v56, %v7178_v20  ;;  %v7285_v8 = vpop.f32.mrf.mxu0  ;;  %7921 = vmatprep.subr.bf16.mxu0 %v8196_v7 }
 0x399   : > { %11393 = vst [vmem:[#allocation6_spill] sm:$0xff] %v10362_v40  ;;  %v7286_v61 = vadd.f32 %v7285_v8, %v7284_v44  ;;  %v7181_v33 = vpop.f32.mrf.mxu1  ;;  %5110 = vmatmul.mubr.bf16.gmra.mxu1 %v11394_v23 }
 0x39a   : > { %v4024_v11 = vadd.f32 %v7180_v49, %v11395_v22  ;;  %v7287_v18 = vpop.f32.mrf.mxu0  ;;  %5199 = vmatmul.mubr.bf16.gmra.mxu0 %v11396_v47  ;;  %5117 = vmatprep.mubr.bf16.mxu1 %v11379_v46 }
 0x39b   : > { %5206 = vmatprep.mubr.bf16.mxu0 %v9658_v14  ;;  %v7182_v54 = vpop.f32.mrf.mxu1  ;;  %7922 = vmatpush3.bf16.msra.mxu0 %v8196_v7  ;;  %v10372_v34 = vadd.f32 %v7286_v61, %v4016_v60  ;;  %v11398_v60 = vld [vmem:[#allocation68_spill] sm:$0xff] }
 0x39c   : > { %v7183_v41 = vadd.f32 %v7182_v54, %v7181_v33  ;;  %v7288_v48 = vpop.f32.mrf.mxu0  ;;  %7923 = vmatprep.subr.bf16.mxu0 %v8197_v63  ;;  %v11399_v33 = vld [vmem:[#allocation33_spill] sm:$0xff] }
 0x39d   : > { %v7289_v20 = vadd.f32 %v7288_v48, %v7287_v18  ;;  %v7184_v44 = vpop.f32.mrf.mxu1 }
 0x39e   : > { %v4029_v56 = vadd.f32 %v7183_v41, %v10152_v35  ;;  %v7290_v8 = vpop.f32.mrf.mxu0 }
 0x39f   : > { %v7185_v49 = vpop.f32.mrf.mxu1  ;;  %v10375_v22 = vadd.f32 %v7289_v20, %v4021_v16  ;;  %7924 = vmatpush3.bf16.msra.mxu0 %v8197_v63 }
 0x3a0   : > { %v7186_v37 = vadd.f32 %v7185_v49, %v7184_v44  ;;  %v7291_v46 = vpop.f32.mrf.mxu0 }
 0x3a1   : > { %v7292_v40 = vadd.f32 %v7291_v46, %v7290_v8  ;;  %v7187_v14 = vpop.f32.mrf.mxu1  ;;  %5118 = vmatmul.mubr.bf16.gmra.mxu1 %v11397_v2 }
 0x3a2   : > { %v4032_v7 = vadd.f32 %v7186_v37, %v11398_v60  ;;  %v7293_v61 = vpop.f32.mrf.mxu0  ;;  %5207 = vmatmul.mubr.bf16.gmra.mxu0 %v11399_v33  ;;  %5125 = vmatprep.mubr.bf16.mxu1 %v11383_v27  ;;  %v11400_v27 = vld [vmem:[#allocation26_spill] sm:$0xff] }
 0x3a3   : > { %5214 = vmatprep.mubr.bf16.mxu0 %v11373_v36  ;;  %v7188_v18 = vpop.f32.mrf.mxu1  ;;  %v10382_v35 = vadd.f32 %v7292_v40, %v4024_v11  ;;  %v11401_v11 = vld [vmem:[#allocation34_spill] sm:$0xff] }
 0x3a4   : > { %v7189_v16 = vadd.f32 %v7188_v18, %v7187_v14  ;;  %v7294_v63 = vpop.f32.mrf.mxu0  ;;  %v11402_v14 = vld [vmem:[#allocation27_spill] sm:$0xff] }
 0x3a5   : > { %v7295_v54 = vadd.f32 %v7294_v63, %v7293_v61  ;;  %v7190_v41 = vpop.f32.mrf.mxu1 }
 0x3a6   : > { %v10385_v46 = vadd.f32 %v7189_v16, %v10166_v21  ;;  %v7296_v48 = vpop.f32.mrf.mxu0 }
 0x3a7   : > { %v7191_v20 = vpop.f32.mrf.mxu1  ;;  %v10387_v37 = vadd.f32 %v7295_v54, %v4029_v56 }
 0x3a8   : > { %v7192_v44 = vadd.f32 %v7191_v20, %v7190_v41  ;;  %v7297_v8 = vpop.f32.mrf.mxu0 }
 0x3a9   : > { %v7298_v49 = vadd.f32 %v7297_v8, %v7296_v48  ;;  %v7193_v60 = vpop.f32.mrf.mxu1  ;;  %5126 = vmatmul.mubr.bf16.gmra.mxu1 %v11400_v27  ;;  %v11407_v8 = vld [vmem:[#allocation35_spill] sm:$0xff] }
 0x3aa   : > { %v10391_v36 = vadd.f32 %v7192_v44, %v10172_v43  ;;  %v10393_v40 = vpop.f32.mrf.mxu0  ;;  %5215 = vmatmul.mubr.bf16.gmra.mxu0 %v11401_v11  ;;  %5133 = vmatprep.mubr.bf16.mxu1 %v11402_v14 }
 0x3ab   : > { %5222 = vmatprep.mubr.bf16.mxu0 %v11377_v13  ;;  %v7194_v21 = vpop.f32.mrf.mxu1  ;;  %v10398_v56 = vadd.f32 %v7298_v49, %v4032_v7  ;;  %v11405_v13 = vld [vmem:[#allocation29_spill] sm:$0xff] }
 0x3ac   : > { %v7195_v61 = vadd.f32 %v7194_v21, %v7193_v60  ;;  %v10400_v18 = vpop.f32.mrf.mxu0 }
 0x3ad   : > { %11403 = vst [vmem:[#allocation46_spill] sm:$0xff] %v10398_v56  ;;  %v7196_v16 = vpop.f32.mrf.mxu1 }
 0x3ae   : > { %v10403_v63 = vadd.f32 %v7195_v61, %v10176_v12  ;;  %v10405_v43 = vpop.f32.mrf.mxu0 }
 0x3af   : > { %v7197_v54 = vpop.f32.mrf.mxu1 }
 0x3b0   : > { %11404 = vst [vmem:[#allocation11_spill] sm:$0xff] %v10403_v63  ;;  %v7198_v41 = vadd.f32 %v7197_v54, %v7196_v16  ;;  %v10407_v48 = vpop.f32.mrf.mxu0 }
 0x3b1   : > { %v10409_v20 = vpop.f32.mrf.mxu1  ;;  %5134 = vmatmul.mubr.bf16.gmra.mxu1 %v11405_v13 }
 0x3b2   : > { %v10413_v7 = vadd.f32 %v7198_v41, %v10188_v31  ;;  %v10415_v44 = vpop.f32.mrf.mxu0  ;;  %5223 = vmatmul.mubr.bf16.gmra.mxu0 %v11407_v8  ;;  %5335 = vmatprep.mubr.bf16.mxu1 %v11389_v24  ;;  %v11410_v24 = vld [vmem:[#allocation36_spill] sm:$0xff] }
 0x3b3   : > { %5230 = vmatprep.mubr.bf16.mxu0 %v11381_v58  ;;  %v10420_v12 = vpop.f32.mrf.mxu1 }
 0x3b4   : > { %11406 = vst [vmem:[#allocation49_spill] sm:$0xff] %v10413_v7  ;;  %v10422_v49 = vpop.f32.mrf.mxu0 }
 0x3b5   : > { %v10424_v60 = vpop.f32.mrf.mxu1 }
 0x3b6   : > { %v10426_v21 = vpop.f32.mrf.mxu0 }
 0x3b7   : > { %11408 = vst [vmem:[#allocation7_spill] sm:$0xff] %v10426_v21  ;;  %v10428_v61 = vpop.f32.mrf.mxu1 }
 0x3b8   : > { %v10430_v31 = vpop.f32.mrf.mxu0 }
 0x3b9   : > { %11409 = vst [vmem:[#allocation14_spill] sm:$0xff] %v10430_v31  ;;  %v7879_v16 = vpop.f32.mrf.mxu1  ;;  %5336 = vmatmul.mubr.bf16.vlgmr.msra.gmra.mxu1 %v9511_v3 }
 0x3ba   : > { %v10434_v54 = vpop.f32.mrf.mxu0  ;;  %v4263_v58 = vadd.f32 %v7879_v16, %v10247_v29  ;;  %5231 = vmatmul.mubr.bf16.gmra.mxu0 %v11410_v24  ;;  %5343 = vmatprep.mubr.bf16.mxu1 %v11392_v25 }
 0x3bb   : > { %5238 = vmatprep.mubr.bf16.mxu0 %v11384_v30  ;;  %v4254_v3 = vpop.f32.mrf.mxu1 }
 0x3bc   : > { %v6335_v41 = vpack.c.bf16 %v4263_v58, %v4263_v58  ;;  %v10447_v14 = vpop.f32.mrf.mxu0  ;;  %v4255_v29 = vadd.f32 %v4254_v3, %v10225_v9 }
 0x3bd   : > { %v7880_v16 = vpop.f32.mrf.mxu1 }
 0x3be   : > { %5756 = vst.msk [vmem:[%s10444_s15 + $0x8] sm:$0xf] %vm5753_vm1, %v6335_v41  ;;  %v6333_v25 = vpack.c.bf16 %v4255_v29, %v4255_v29  ;;  %v10452_v7 = vpop.f32.mrf.mxu0  ;;  %v4266_v63 = vadd.f32 %v7880_v16, %v10260_v32  ;;  %v11411_v32 = vld [vmem:[#allocation37_spill] sm:$0xff] }
 0x3bf   : > { %v4257_v31 = vpop.f32.mrf.mxu1 }
 0x3c0   : > { %5754 = vst.msk [vmem:[%s10444_s15] sm:$0xf] %vm5753_vm1, %v6333_v25  ;;  %v6336_v30 = vpack.c.bf16 %v4266_v63, %v4266_v63  ;;  %v10457_v21 = vpop.f32.mrf.mxu0  ;;  %v4258_v58 = vadd.f32 %v4257_v31, %v10238_v39 }
 0x3c1   : > { %v7883_v56 = vpop.f32.mrf.mxu1  ;;  %5344 = vmatmul.mubr.bf16.gmra.mxu1 %v9551_v53 }
 0x3c2   : > { %5757 = vst.msk [vmem:[%s10444_s15 + $0xc] sm:$0xf] %vm5753_vm1, %v6336_v30  ;;  %v6334_v9 = vpack.c.bf16 %v4258_v58, %v4258_v58  ;;  %v4279_v3 = vadd.f32 %v7883_v56, %v10273_v57  ;;  %v7357_v41 = vpop.f32.mrf.mxu0  ;;  %5239 = vmatmul.mubr.bf16.gmra.mxu0 %v11411_v32  ;;  %5351 = vmatprep.mubr.bf16.mxu1 %v11396_v47 }
 0x3c3   : > { %5246 = vmatprep.mubr.bf16.mxu0 %v11387_v51  ;;  %v4270_v63 = vpop.f32.mrf.mxu1 }
 0x3c4   : > { %5755 = vst.msk [vmem:[%s10444_s15 + $0x4] sm:$0xf] %vm5753_vm1, %v6334_v9  ;;  %v6339_v39 = vpack.c.bf16 %v4279_v3, %v4279_v3  ;;  %v4271_v31 = vadd.f32 %v4270_v63, %v10263_v10  ;;  %v7358_v53 = vpop.f32.mrf.mxu0  ;;  %v11412_v63 = vld [vmem:[#allocation38_spill] sm:$0xff] }
 0x3c5   : > { %v10470_v29 = vadd.f32 %v7358_v53, %v7357_v41  ;;  %v7884_v16 = vpop.f32.mrf.mxu1 }
 0x3c6   : > { %5760 = vst.msk [vmem:[%s10444_s15 + $0x18] sm:$0xf] %vm5753_vm1, %v6339_v39  ;;  %v6337_v57 = vpack.c.bf16 %v4271_v31, %v4271_v31  ;;  %v4282_v56 = vadd.f32 %v7884_v16, %v10280_v59  ;;  %v7360_v25 = vpop.f32.mrf.mxu0 }
 0x3c7   : > { %v4273_v47 = vpop.f32.mrf.mxu1 }
 0x3c8   : > { %5758 = vst.msk [vmem:[%s10444_s15 + $0x10] sm:$0xf] %vm5753_vm1, %v6337_v57  ;;  %v6340_v51 = vpack.c.bf16 %v4282_v56, %v4282_v56  ;;  %v4274_v30 = vadd.f32 %v4273_v47, %v10270_v26  ;;  %v7361_v58 = vpop.f32.mrf.mxu0 }
 0x3c9   : > { %v10478_v10 = vadd.f32 %v7361_v58, %v7360_v25  ;;  %v7887_v9 = vpop.f32.mrf.mxu1  ;;  %5352 = vmatmul.mubr.bf16.gmra.mxu1 %v9591_v50 }
 0x3ca   : > { %5761 = vst.msk [vmem:[%s10444_s15 + $0x1c] sm:$0xf] %vm5753_vm1, %v6340_v51  ;;  %v6338_v3 = vpack.c.bf16 %v4274_v30, %v4274_v30  ;;  %v4295_v59 = vadd.f32 %v7887_v9, %v10293_v55  ;;  %v7363_v41 = vpop.f32.mrf.mxu0  ;;  %5247 = vmatmul.mubr.bf16.gmra.mxu0 %v11412_v63  ;;  %5359 = vmatprep.mubr.bf16.mxu1 %v11399_v33  ;;  %v11413_v9 = vld [vmem:[#allocation39_spill] sm:$0xff] }
 0x3cb   : > { %5254 = vmatprep.mubr.bf16.mxu0 %v11390_v17  ;;  %v4286_v26 = vpop.f32.mrf.mxu1 }
 0x3cc   : > { %5759 = vst.msk [vmem:[%s10444_s15 + $0x14] sm:$0xf] %vm5753_vm1, %v6338_v3  ;;  %v6343_v39 = vpack.c.bf16 %v4295_v59, %v4295_v59  ;;  %v4287_v31 = vadd.f32 %v4286_v26, %v10283_v62  ;;  %v7364_v50 = vpop.f32.mrf.mxu0 }
 0x3cd   : > { %v10490_v53 = vadd.f32 %v7364_v50, %v7363_v41  ;;  %v7888_v16 = vpop.f32.mrf.mxu1 }
 0x3ce   : > { %5764 = vst.msk [vmem:[%s10444_s15 + $0x28] sm:$0xf] %vm5753_vm1, %v6343_v39  ;;  %v6341_v55 = vpack.c.bf16 %v4287_v31, %v4287_v31  ;;  %v4298_v57 = vadd.f32 %v7888_v16, %v10300_v4  ;;  %v7366_v56 = vpop.f32.mrf.mxu0 }
 0x3cf   : > { %v4289_v33 = vpop.f32.mrf.mxu1 }
 0x3d0   : > { %5762 = vst.msk [vmem:[%s10444_s15 + $0x20] sm:$0xf] %vm5753_vm1, %v6341_v55  ;;  %v6344_v17 = vpack.c.bf16 %v4298_v57, %v4298_v57  ;;  %v4290_v25 = vadd.f32 %v4289_v33, %v10290_v5  ;;  %v7367_v47 = vpop.f32.mrf.mxu0  ;;  %v11414_v33 = vld [vmem:[#allocation40_spill] sm:$0xff] }
 0x3d1   : > { %v10498_v62 = vadd.f32 %v7367_v47, %v7366_v56  ;;  %v7891_v51 = vpop.f32.mrf.mxu1  ;;  %5360 = vmatmul.mubr.bf16.gmra.mxu1 %v9626_v19 }
 0x3d2   : > { %5765 = vst.msk [vmem:[%s10444_s15 + $0x2c] sm:$0xf] %vm5753_vm1, %v6344_v17  ;;  %v6342_v30 = vpack.c.bf16 %v4290_v25, %v4290_v25  ;;  %v4311_v4 = vadd.f32 %v7891_v51, %v10313_v0  ;;  %v7369_v58 = vpop.f32.mrf.mxu0  ;;  %5255 = vmatmul.mubr.bf16.gmra.mxu0 %v11413_v9  ;;  %5367 = vmatprep.mubr.bf16.mxu1 %v11401_v11 }
 0x3d3   : > { %5262 = vmatprep.mubr.bf16.mxu0 %v11394_v23  ;;  %v4302_v5 = vpop.f32.mrf.mxu1 }
 0x3d4   : > { %5763 = vst.msk [vmem:[%s10444_s15 + $0x24] sm:$0xf] %vm5753_vm1, %v6342_v30  ;;  %v6347_v3 = vpack.c.bf16 %v4311_v4, %v4311_v4  ;;  %v4303_v59 = vadd.f32 %v4302_v5, %v10303_v6  ;;  %v7370_v19 = vpop.f32.mrf.mxu0 }
 0x3d5   : > { %v10510_v41 = vadd.f32 %v7370_v19, %v7369_v58  ;;  %v7892_v26 = vpop.f32.mrf.mxu1 }
 0x3d6   : > { %5768 = vst.msk [vmem:[%s10444_s15 + $0x38] sm:$0xf] %vm5753_vm1, %v6347_v3  ;;  %v6345_v0 = vpack.c.bf16 %v4303_v59, %v4303_v59  ;;  %v4314_v39 = vadd.f32 %v7892_v26, %v10324_v38  ;;  %v7372_v31 = vpop.f32.mrf.mxu0  ;;  %v11415_v59 = vld [vmem:[#allocation10_spill] sm:$0xff] }
 0x3d7   : > { %v4305_v11 = vpop.f32.mrf.mxu1 }
 0x3d8   : > { %5766 = vst.msk [vmem:[%s10444_s15 + $0x30] sm:$0xf] %vm5753_vm1, %v6345_v0  ;;  %v6348_v23 = vpack.c.bf16 %v4314_v39, %v4314_v39  ;;  %v4306_v50 = vadd.f32 %v4305_v11, %v10310_v15  ;;  %v7373_v16 = vpop.f32.mrf.mxu0  ;;  %v11416_v0 = vld [vmem:[#allocation41_spill] sm:$0xff]  ;;  %v7301_v39 = vadd.f32 %v10400_v18, %v10393_v40  ;;  %v11417_v11 = vld [vmem:[#allocation6_spill] sm:$0xff]  ;;  %v7304_v40 = vadd.f32 %v10407_v48, %v10405_v43 }
 0x3d9   : > { %v10518_v6 = vadd.f32 %v7373_v16, %v7372_v31  ;;  %v7895_v55 = vpop.f32.mrf.mxu1  ;;  %5368 = vmatmul.mubr.bf16.gmra.mxu1 %v9646_v1 }
 0x3da   : > { %5769 = vst.msk [vmem:[%s10444_s15 + $0x3c] sm:$0xf] %vm5753_vm1, %v6348_v23  ;;  %v6346_v57 = vpack.c.bf16 %v4306_v50, %v4306_v50  ;;  %v4327_v38 = vadd.f32 %v7895_v55, %v10346_v42  ;;  %v7375_v56 = vpop.f32.mrf.mxu0  ;;  %5263 = vmatmul.mubr.bf16.gmra.mxu0 %v11414_v33  ;;  %5375 = vmatprep.mubr.bf16.mxu1 %v11407_v8 }
 0x3db   : > { %5270 = vmatprep.mubr.bf16.mxu0 %v11397_v2  ;;  %v4318_v15 = vpop.f32.mrf.mxu1 }
 0x3dc   : > { %5767 = vst.msk [vmem:[%s10444_s15 + $0x34] sm:$0xf] %vm5753_vm1, %v6346_v57  ;;  %v6351_v17 = vpack.c.bf16 %v4327_v38, %v4327_v38  ;;  %v4319_v25 = vadd.f32 %v4318_v15, %v10330_v52  ;;  %v7376_v1 = vpop.f32.mrf.mxu0  ;;  %v4198_v15 = vadd.f32 %v7301_v39, %v10385_v46  ;;  %v7313_v46 = vadd.f32 %v10447_v14, %v10434_v54 }
 0x3dd   : > { %v10530_v47 = vadd.f32 %v7376_v1, %v7375_v56  ;;  %v7896_v51 = vpop.f32.mrf.mxu1  ;;  %v11418_v1 = vld [vmem:[#allocation9_spill] sm:$0xff]  ;;  %v7204_v14 = vadd.f32 %v10428_v61, %v10424_v60  ;;  %v11423_v60 = vld [vmem:[#allocation14_spill] sm:$0xff] }
 0x3de   : > { %5772 = vst.msk [vmem:[%s10444_s15 + $0x48] sm:$0xf] %vm5753_vm1, %v6351_v17  ;;  %v6349_v42 = vpack.c.bf16 %v4319_v25, %v4319_v25  ;;  %v4330_v30 = vadd.f32 %v7896_v51, %v10356_v45  ;;  %v7378_v4 = vpop.f32.mrf.mxu0 }
 0x3df   : > { %v4321_v8 = vpop.f32.mrf.mxu1 }
 0x3e0   : > { %5770 = vst.msk [vmem:[%s10444_s15 + $0x40] sm:$0xf] %vm5753_vm1, %v6349_v42  ;;  %v6352_v2 = vpack.c.bf16 %v4330_v30, %v4330_v30  ;;  %v4322_v58 = vadd.f32 %v4321_v8, %v10340_v28  ;;  %v7379_v5 = vpop.f32.mrf.mxu0  ;;  %v11419_v42 = vld [vmem:[#allocation42_spill] sm:$0xff]  ;;  %v7307_v8 = vadd.f32 %v10422_v49, %v10415_v44 }
 0x3e1   : > { %v10538_v52 = vadd.f32 %v7379_v5, %v7378_v4  ;;  %v7899_v3 = vpop.f32.mrf.mxu1  ;;  %5376 = vmatmul.mubr.bf16.gmra.mxu1 %v11415_v59  ;;  %v4201_v4 = vadd.f32 %v7304_v40, %v10391_v36  ;;  %v7316_v36 = vadd.f32 %v10457_v21, %v10452_v7  ;;  %v11421_v49 = vld [vmem:[#allocation46_spill] sm:$0xff] }
 0x3e2   : > { %5773 = vst.msk [vmem:[%s10444_s15 + $0x4c] sm:$0xf] %vm5753_vm1, %v6352_v2  ;;  %v6350_v19 = vpack.c.bf16 %v4322_v58, %v4322_v58  ;;  %v4343_v45 = vadd.f32 %v7899_v3, %v10375_v22  ;;  %v7381_v26 = vpop.f32.mrf.mxu0  ;;  %5271 = vmatmul.mubr.bf16.gmra.mxu0 %v11416_v0  ;;  %5383 = vmatprep.mubr.bf16.mxu1 %v11410_v24 }
 0x3e3   : > { %5278 = vmatprep.mubr.bf16.mxu0 %v11400_v27  ;;  %v4334_v28 = vpop.f32.mrf.mxu1 }
 0x3e4   : > { %5771 = vst.msk [vmem:[%s10444_s15 + $0x44] sm:$0xf] %vm5753_vm1, %v6350_v19  ;;  %v6355_v31 = vpack.c.bf16 %v4343_v45, %v4343_v45  ;;  %v4335_v23 = vadd.f32 %v4334_v28, %v11417_v11  ;;  %v7382_v50 = vpop.f32.mrf.mxu0  ;;  %v11425_v11 = vld [vmem:[#allocation11_spill] sm:$0xff] }
 0x3e5   : > { %v10552_v16 = vadd.f32 %v7382_v50, %v7381_v26  ;;  %v7900_v22 = vpop.f32.mrf.mxu1  ;;  %v11422_v26 = vld [vmem:[#allocation7_spill] sm:$0xff] }
 0x3e6   : > { %5776 = vst.msk [vmem:[%s10444_s15 + $0x58] sm:$0xf] %vm5753_vm1, %v6355_v31  ;;  %v6353_v24 = vpack.c.bf16 %v4335_v23, %v4335_v23  ;;  %v4346_v55 = vadd.f32 %v7900_v22, %v10382_v35  ;;  %v7384_v27 = vpop.f32.mrf.mxu0  ;;  %v7201_v35 = vadd.f32 %v10420_v12, %v10409_v20  ;;  %v7310_v61 = vadd.f32 %v11423_v60, %v11422_v26  ;;  %v11424_v31 = vld [vmem:[#allocation12_spill] sm:$0xff]  ;;  %v11426_v50 = vld [vmem:[#allocation71_spill] sm:$0xff] }
 0x3e7   : > { %v4337_v57 = vpop.f32.mrf.mxu1  ;;  %v4206_v23 = vadd.f32 %v7307_v8, %v11425_v11  ;;  %v4056_v7 = vadd.f32 %v7204_v14, %v11426_v50  ;;  %v11430_v8 = vld [vmem:[#allocation15_spill] sm:$0xff]  ;;  %v11432_v14 = vld [vmem:[#allocation48_spill] sm:$0xff] }
 0x3e8   : > { %5774 = vst.msk [vmem:[%s10444_s15 + $0x50] sm:$0xf] %vm5753_vm1, %v6353_v24  ;;  %v6356_v18 = vpack.c.bf16 %v4346_v55, %v4346_v55  ;;  %v4338_v38 = vadd.f32 %v4337_v57, %v10372_v34  ;;  %v7385_v56 = vpop.f32.mrf.mxu0  ;;  %v11427_v55 = vld [vmem:[#allocation43_spill] sm:$0xff] }
 0x3e9   : > { %v10563_v17 = vadd.f32 %v7385_v56, %v7384_v27  ;;  %v7903_v25 = vpop.f32.mrf.mxu1  ;;  %5384 = vmatmul.mubr.bf16.gmra.mxu1 %v11418_v1  ;;  %v11428_v27 = vld [vmem:[#allocation44_spill] sm:$0xff]  ;;  %v4217_v56 = vadd.f32 %v7316_v36, %v4056_v7  ;;  %v11434_v11 = vld [vmem:[#allocation51_spill] sm:$0xff] }
 0x3ea   : > { %5777 = vst.msk [vmem:[%s10444_s15 + $0x5c] sm:$0xf] %vm5753_vm1, %v6356_v18  ;;  %v6354_v43 = vpack.c.bf16 %v4338_v38, %v4338_v38  ;;  %v4359_v48 = vadd.f32 %v7903_v25, %v4198_v15  ;;  %v7387_v51 = vpop.f32.mrf.mxu0  ;;  %5279 = vmatmul.mubr.bf16.gmra.mxu0 %v11419_v42  ;;  %5391 = vmatprep.mubr.bf16.mxu1 %v11411_v32 }
 0x3eb   : > { %5286 = vmatprep.mubr.bf16.mxu0 %v11405_v13  ;;  %v4350_v34 = vpop.f32.mrf.mxu1  ;;  %v11420_v13 = vld [vmem:[#allocation70_spill] sm:$0xff] }
 0x3ec   : > { %5775 = vst.msk [vmem:[%s10444_s15 + $0x54] sm:$0xf] %vm5753_vm1, %v6354_v43  ;;  %v6359_v20 = vpack.c.bf16 %v4359_v48, %v4359_v48  ;;  %v4351_v12 = vadd.f32 %v4350_v34, %v10387_v37  ;;  %v7388_v30 = vpop.f32.mrf.mxu0  ;;  %v4053_v58 = vadd.f32 %v7201_v35, %v11420_v13 }
 0x3ed   : > { %v10581_v2 = vadd.f32 %v7388_v30, %v7387_v51  ;;  %v7904_v32 = vpop.f32.mrf.mxu1 }
 0x3ee   : > { %5780 = vst.msk [vmem:[%s10444_s15 + $0x68] sm:$0xf] %vm5753_vm1, %v6359_v20  ;;  %v6357_v54 = vpack.c.bf16 %v4351_v12, %v4351_v12  ;;  %v4362_v5 = vadd.f32 %v7904_v32, %v4201_v4  ;;  %v7390_v37 = vpop.f32.mrf.mxu0  ;;  %v4214_v45 = vadd.f32 %v7313_v46, %v4053_v58  ;;  %v10617_v12 = vld [vmem:[%s11179_s6] ss:$0 sm:$0xff]  ;;  %v11431_v58 = vld [vmem:[#allocation45_spill] sm:$0xff] }
 0x3ef   : > { %v4353_v3 = vpop.f32.mrf.mxu1 }
 0x3f0   : > { %5778 = vst.msk [vmem:[%s10444_s15 + $0x60] sm:$0xf] %vm5753_vm1, %v6357_v54  ;;  %v6360_v44 = vpack.c.bf16 %v4362_v5, %v4362_v5  ;;  %v4354_v59 = vadd.f32 %v4353_v3, %v11421_v49  ;;  %v7391_v19 = vpop.f32.mrf.mxu0  ;;  %v4855_v5 = vadd.f32 %v10470_v29, %v10617_v12  ;;  %v11433_v29 = vld [vmem:[#allocation17_spill] sm:$0xff] }
 0x3f1   : > { %v10595_v28 = vadd.f32 %v7391_v19, %v7390_v37  ;;  %v7907_v39 = vpop.f32.mrf.mxu1  ;;  %5392 = vmatmul.mubr.bf16.gmra.mxu1 %v11424_v31 }
 0x3f2   : > { %5781 = vst.msk [vmem:[%s10444_s15 + $0x6c] sm:$0xf] %vm5753_vm1, %v6360_v44  ;;  %v6358_v21 = vpack.c.bf16 %v4354_v59, %v4354_v59  ;;  %v4375_v22 = vadd.f32 %v7907_v39, %v4214_v45  ;;  %v7393_v24 = vpop.f32.mrf.mxu0  ;;  %5287 = vmatmul.mubr.bf16.gmra.mxu0 %v11427_v55  ;;  %5399 = vmatprep.mubr.bf16.mxu1 %v11412_v63  ;;  %v11429_v63 = vld [vmem:[#allocation49_spill] sm:$0xff] }
 0x3f3   : > { %5294 = vmatprep.mubr.bf16.mxu0 %v11428_v27  ;;  %v4366_v57 = vpop.f32.mrf.mxu1  ;;  %v4209_v48 = vadd.f32 %v7310_v61, %v11429_v63  ;;  %v11437_v63 = vld [vmem:[#allocation4_spill] sm:$0xff] }
 0x3f4   : > { %5779 = vst.msk [vmem:[%s10444_s15 + $0x64] sm:$0xf] %vm5753_vm1, %v6358_v21  ;;  %v6363_v40 = vpack.c.bf16 %v4375_v22, %v4375_v22  ;;  %v4367_v18 = vadd.f32 %v4366_v57, %v4206_v23  ;;  %v7394_v38 = vpop.f32.mrf.mxu0  ;;  %v11435_v23 = vld [vmem:[#allocation52_spill] sm:$0xff] }
 0x3f5   : > { %v10607_v15 = vadd.f32 %v7394_v38, %v7393_v24  ;;  %v7908_v25 = vpop.f32.mrf.mxu1  ;;  %v4866_v38 = vadd.f32 %v10498_v62, %v10617_v12  ;;  %v4871_v62 = vadd.f32 %v10510_v41, %v10617_v12 }
 0x3f6   : > { %5784 = vst.msk [vmem:[%s10444_s15 + $0x78] sm:$0xf] %vm5753_vm1, %v6363_v40  ;;  %v6361_v1 = vpack.c.bf16 %v4367_v18, %v4367_v18  ;;  %v4378_v35 = vadd.f32 %v7908_v25, %v4217_v56  ;;  %v7396_v43 = vpop.f32.mrf.mxu0 }
 0x3f7   : > { %v4369_v51 = vpop.f32.mrf.mxu1 }
 0x3f8   : > { %5782 = vst.msk [vmem:[%s10444_s15 + $0x70] sm:$0xf] %vm5753_vm1, %v6361_v1  ;;  %v6364_v34 = vpack.c.bf16 %v4378_v35, %v4378_v35  ;;  %v4370_v46 = vadd.f32 %v4369_v51, %v4209_v48  ;;  %v7397_v20 = vpop.f32.mrf.mxu0  ;;  %v11436_v35 = vld [vmem:[#allocation19_spill] sm:$0xff]  ;;  %v11438_v48 = vld [vmem:[#allocation54_spill] sm:$0xff] }
 0x3f9   : > { %v10619_v30 = vadd.f32 %v7397_v20, %v7396_v43  ;;  %v7469_v4 = vpop.f32.mrf.mxu1  ;;  %5400 = vmatmul.mubr.bf16.gmra.mxu1 %v11430_v8 }
 0x3fa   : > { %5785 = vst.msk [vmem:[%s10444_s15 + $0x7c] sm:$0xf] %vm5753_vm1, %v6364_v34  ;;  %v6362_v32 = vpack.c.bf16 %v4370_v46, %v4370_v46  ;;  %v7399_v13 = vpop.f32.mrf.mxu0  ;;  %5295 = vmatmul.mubr.bf16.gmra.mxu0 %v11431_v58  ;;  %5407 = vmatprep.mubr.bf16.mxu1 %v11413_v9  ;;  %v4858_v9 = vadd.f32 %v10478_v10, %v10617_v12 }
 0x3fb   : > { %7925 = vmatprep.mubr.bf16.mxu0 %v11432_v14  ;;  %v7470_v54 = vpop.f32.mrf.mxu1  ;;  %v4863_v10 = vadd.f32 %v10490_v53, %v10617_v12  ;;  %v4874_v14 = vadd.f32 %v10518_v6, %v10617_v12  ;;  %v4879_v6 = vadd.f32 %v10530_v47, %v10617_v12 }
 0x3fc   : > { %5783 = vst.msk [vmem:[%s10444_s15 + $0x74] sm:$0xf] %vm5753_vm1, %v6362_v32  ;;  %v7400_v37 = vpop.f32.mrf.mxu0  ;;  %v7471_v3 = vadd.f32 %v7470_v54, %v7469_v4 }
 0x3fd   : > { %v10631_v36 = vadd.f32 %v7400_v37, %v7399_v13  ;;  %v7472_v44 = vpop.f32.mrf.mxu1 }
 0x3fe   : > { %v10633_v49 = vadd.f32 %v7471_v3, %v4855_v5  ;;  %v7402_v59 = vpop.f32.mrf.mxu0  ;;  %v11439_v3 = vld [vmem:[#allocation21_spill] sm:$0xff] }
 0x3ff   : > { %v7473_v19 = vpop.f32.mrf.mxu1 }
 0x400   : > { %v7403_v45 = vpop.f32.mrf.mxu0  ;;  %v7474_v26 = vadd.f32 %v7473_v19, %v7472_v44  ;;  %v11441_v19 = vld [vmem:[#allocation56_spill] sm:$0xff] }
 0x401   : > { %v10637_v60 = vadd.f32 %v7403_v45, %v7402_v59  ;;  %v7475_v61 = vpop.f32.mrf.mxu1  ;;  %5408 = vmatmul.mubr.bf16.gmra.mxu1 %v11433_v29  ;;  %v11440_v59 = vld [vmem:[#allocation55_spill] sm:$0xff] }
 0x402   : > { %v10640_v39 = vadd.f32 %v7474_v26, %v4858_v9  ;;  %v7405_v31 = vpop.f32.mrf.mxu0  ;;  %7926 = vmatmul.mubr.bf16.vlgmr.msra.gmra.mxu0 %v11434_v11  ;;  %5415 = vmatprep.mubr.bf16.mxu1 %v11414_v33 }
 0x403   : > { %7929 = vmatprep.mubr.bf16.mxu0 %v11435_v23  ;;  %v7476_v50 = vpop.f32.mrf.mxu1 }
 0x404   : > { %v7406_v7 = vpop.f32.mrf.mxu0  ;;  %v7477_v21 = vadd.f32 %v7476_v50, %v7475_v61  ;;  %v4882_v50 = vadd.f32 %v10538_v52, %v10617_v12  ;;  %v4887_v52 = vadd.f32 %v10552_v16, %v10617_v12 }
 0x405   : > { %v10647_v22 = vadd.f32 %v7406_v7, %v7405_v31  ;;  %v7478_v24 = vpop.f32.mrf.mxu1 }
 0x406   : > { %v10649_v57 = vadd.f32 %v7477_v21, %v4863_v10  ;;  %v7408_v40 = vpop.f32.mrf.mxu0 }
 0x407   : > { %v7479_v18 = vpop.f32.mrf.mxu1 }
 0x408   : > { %v7409_v56 = vpop.f32.mrf.mxu0  ;;  %v7480_v33 = vadd.f32 %v7479_v18, %v7478_v24  ;;  %v11442_v24 = vld [vmem:[#allocation23_spill] sm:$0xff]  ;;  %v11443_v18 = vld [vmem:[#allocation58_spill] sm:$0xff] }
 0x409   : > { %v10653_v25 = vadd.f32 %v7409_v56, %v7408_v40  ;;  %v7481_v1 = vpop.f32.mrf.mxu1  ;;  %5416 = vmatmul.mubr.bf16.gmra.mxu1 %v11436_v35 }
 0x40a   : > { %v10656_v53 = vadd.f32 %v7480_v33, %v4866_v38  ;;  %v7411_v43 = vpop.f32.mrf.mxu0  ;;  %7930 = vmatmul.mubr.bf16.gmra.mxu0 %v11437_v63  ;;  %5423 = vmatprep.mubr.bf16.mxu1 %v11416_v0  ;;  %v11444_v38 = vld [vmem:[#allocation59_spill] sm:$0xff] }
 0x40b   : > { %7933 = vmatprep.mubr.bf16.mxu0 %v11438_v48  ;;  %v7482_v51 = vpop.f32.mrf.mxu1 }
 0x40c   : > { %v7412_v34 = vpop.f32.mrf.mxu0  ;;  %v7483_v46 = vadd.f32 %v7482_v51, %v7481_v1 }
 0x40d   : > { %v10663_v20 = vadd.f32 %v7412_v34, %v7411_v43  ;;  %v7484_v4 = vpop.f32.mrf.mxu1 }
 0x40e   : > { %v10665_v8 = vadd.f32 %v7483_v46, %v4871_v62  ;;  %v7414_v32 = vpop.f32.mrf.mxu0  ;;  %v4890_v62 = vadd.f32 %v10563_v17, %v10617_v12  ;;  %v4895_v17 = vadd.f32 %v10581_v2, %v10617_v12 }
 0x40f   : > { %v7485_v13 = vpop.f32.mrf.mxu1 }
 0x410   : > { %v7415_v54 = vpop.f32.mrf.mxu0  ;;  %v7486_v0 = vadd.f32 %v7485_v13, %v7484_v4 }
 0x411   : > { %v10669_v5 = vadd.f32 %v7415_v54, %v7414_v32  ;;  %v7487_v37 = vpop.f32.mrf.mxu1  ;;  %5424 = vmatmul.mubr.bf16.gmra.mxu1 %v11439_v3  ;;  %v11445_v32 = vld [vmem:[#allocation25_spill] sm:$0xff]  ;;  %v11447_v54 = vld [vmem:[#allocation62_spill] sm:$0xff] }
 0x412   : > { %v10672_v41 = vadd.f32 %v7486_v0, %v4874_v14  ;;  %v7417_v44 = vpop.f32.mrf.mxu0  ;;  %7934 = vmatmul.mubr.bf16.gmra.mxu0 %v11440_v59  ;;  %5431 = vmatprep.mubr.bf16.mxu1 %v11419_v42  ;;  %v11446_v14 = vld [vmem:[#allocation61_spill] sm:$0xff] }
 0x413   : > { %7937 = vmatprep.mubr.bf16.mxu0 %v11441_v19  ;;  %v7488_v9 = vpop.f32.mrf.mxu1 }
 0x414   : > { %v7418_v45 = vpop.f32.mrf.mxu0  ;;  %v7489_v26 = vadd.f32 %v7488_v9, %v7487_v37 }
 0x415   : > { %v10679_v61 = vadd.f32 %v7418_v45, %v7417_v44  ;;  %v7490_v29 = vpop.f32.mrf.mxu1  ;;  %v4898_v45 = vadd.f32 %v10595_v28, %v10617_v12  ;;  %v4903_v28 = vadd.f32 %v10607_v15, %v10617_v12 }
 0x416   : > { %v10681_v31 = vadd.f32 %v7489_v26, %v4879_v6  ;;  %v7420_v11 = vpop.f32.mrf.mxu0 }
 0x417   : > { %v7491_v23 = vpop.f32.mrf.mxu1 }
 0x418   : > { %v7421_v10 = vpop.f32.mrf.mxu0  ;;  %v7492_v42 = vadd.f32 %v7491_v23, %v7490_v29  ;;  %v11448_v23 = vld [vmem:[#allocation27_spill] sm:$0xff] }
 0x419   : > { %v10685_v7 = vadd.f32 %v7421_v10, %v7420_v11  ;;  %v7493_v21 = vpop.f32.mrf.mxu1  ;;  %5432 = vmatmul.mubr.bf16.gmra.mxu1 %v11442_v24  ;;  %v11449_v10 = vld [vmem:[#allocation64_spill] sm:$0xff] }
 0x41a   : > { %v10688_v47 = vadd.f32 %v7492_v42, %v4882_v50  ;;  %v7423_v40 = vpop.f32.mrf.mxu0  ;;  %7938 = vmatmul.mubr.bf16.gmra.mxu0 %v11443_v18  ;;  %5439 = vmatprep.mubr.bf16.mxu1 %v11427_v55  ;;  %v11450_v42 = vld [vmem:[#allocation47_spill] sm:$0xff] }
 0x41b   : > { %7941 = vmatprep.mubr.bf16.mxu0 %v11444_v38  ;;  %v7494_v56 = vpop.f32.mrf.mxu1 }
 0x41c   : > { %v7424_v33 = vpop.f32.mrf.mxu0  ;;  %v7495_v1 = vadd.f32 %v7494_v56, %v7493_v21  ;;  %v11451_v21 = vld [vmem:[#allocation65_spill] sm:$0xff] }
 0x41d   : > { %v10695_v35 = vadd.f32 %v7424_v33, %v7423_v40  ;;  %v7496_v43 = vpop.f32.mrf.mxu1 }
 0x41e   : > { %v10697_v63 = vadd.f32 %v7495_v1, %v4887_v52  ;;  %v7426_v48 = vpop.f32.mrf.mxu0 }
 0x41f   : > { %v7497_v51 = vpop.f32.mrf.mxu1 }
 0x420   : > { %v7427_v34 = vpop.f32.mrf.mxu0  ;;  %v7498_v55 = vadd.f32 %v7497_v51, %v7496_v43  ;;  %v4906_v43 = vadd.f32 %v10619_v30, %v10617_v12 }
 0x421   : > { %v10701_v46 = vadd.f32 %v7427_v34, %v7426_v48  ;;  %v7499_v4 = vpop.f32.mrf.mxu1  ;;  %5440 = vmatmul.mubr.bf16.gmra.mxu1 %v11445_v32  ;;  %v11453_v32 = vld [vmem:[#allocation67_spill] sm:$0xff] }
 0x422   : > { %v10704_v16 = vadd.f32 %v7498_v55, %v4890_v62  ;;  %v7429_v13 = vpop.f32.mrf.mxu0  ;;  %7942 = vmatmul.mubr.bf16.gmra.mxu0 %v11446_v14  ;;  %5447 = vmatprep.mubr.bf16.mxu1 %v11431_v58  ;;  %v11452_v55 = vld [vmem:[#allocation50_spill] sm:$0xff]  ;;  %v4911_v14 = vadd.f32 %v10631_v36, %v10617_v12 }
 0x423   : > { %7945 = vmatprep.mubr.bf16.mxu0 %v11447_v54  ;;  %v7500_v0 = vpop.f32.mrf.mxu1 }
 0x424   : > { %v7430_v37 = vpop.f32.mrf.mxu0  ;;  %v7501_v3 = vadd.f32 %v7500_v0, %v7499_v4 }
 0x425   : > { %v10711_v44 = vadd.f32 %v7430_v37, %v7429_v13  ;;  %v7502_v59 = vpop.f32.mrf.mxu1 }
 0x426   : > { %v10713_v19 = vadd.f32 %v7501_v3, %v4895_v17  ;;  %v7432_v9 = vpop.f32.mrf.mxu0 }
 0x427   : > { %v7503_v6 = vpop.f32.mrf.mxu1 }
 0x428   : > { %v7433_v26 = vpop.f32.mrf.mxu0  ;;  %v7504_v58 = vadd.f32 %v7503_v6, %v7502_v59 }
 0x429   : > { %v10717_v29 = vadd.f32 %v7433_v26, %v7432_v9  ;;  %v7505_v11 = vpop.f32.mrf.mxu1  ;;  %5448 = vmatmul.mubr.bf16.gmra.mxu1 %v11448_v23  ;;  %v4914_v9 = vadd.f32 %v10637_v60, %v10617_v12 }
 0x42a   : > { %v10720_v2 = vadd.f32 %v7504_v58, %v4898_v45  ;;  %v7435_v50 = vpop.f32.mrf.mxu0  ;;  %7946 = vmatmul.mubr.bf16.gmra.mxu0 %v11449_v10  ;;  %5455 = vmatprep.mubr.bf16.mxu1 %v11450_v42 }
 0x42b   : > { %7949 = vmatprep.mubr.bf16.mxu0 %v11451_v21  ;;  %v7506_v24 = vpop.f32.mrf.mxu1 }
 0x42c   : > { %v7436_v40 = vpop.f32.mrf.mxu0  ;;  %v7507_v18 = vadd.f32 %v7506_v24, %v7505_v11  ;;  %v11454_v11 = vld [vmem:[#allocation69_spill] sm:$0xff] }
 0x42d   : > { %v10727_v38 = vadd.f32 %v7436_v40, %v7435_v50  ;;  %v7508_v56 = vpop.f32.mrf.mxu1  ;;  %v4919_v50 = vadd.f32 %v10647_v22, %v10617_v12 }
 0x42e   : > { %v10729_v52 = vadd.f32 %v7507_v18, %v4903_v28  ;;  %v7438_v33 = vpop.f32.mrf.mxu0  ;;  %v4922_v18 = vadd.f32 %v10653_v25, %v10617_v12 }
 0x42f   : > { %v7509_v1 = vpop.f32.mrf.mxu1 }
 0x430   : > { %v7439_v48 = vpop.f32.mrf.mxu0  ;;  %v7510_v51 = vadd.f32 %v7509_v1, %v7508_v56 }
 0x431   : > { %v10733_v62 = vadd.f32 %v7439_v48, %v7438_v33  ;;  %v7511_v34 = vpop.f32.mrf.mxu1  ;;  %5456 = vmatmul.mubr.bf16.gmra.mxu1 %v11452_v55 }
 0x432   : > { %v10736_v15 = vadd.f32 %v7510_v51, %v4906_v43  ;;  %v7441_v4 = vpop.f32.mrf.mxu0  ;;  %7950 = vmatmul.mubr.bf16.gmra.mxu0 %v11453_v32 }
 0x433   : > { %7953 = vmatprep.mubr.bf16.mxu0 %v11428_v27  ;;  %v7512_v13 = vpop.f32.mrf.mxu1 }
 0x434   : > { %v7442_v54 = vpop.f32.mrf.mxu0  ;;  %v7513_v30 = vadd.f32 %v7512_v13, %v7511_v34  ;;  %v4927_v34 = vadd.f32 %v10663_v20, %v10617_v12 }
 0x435   : > { %v10742_v0 = vadd.f32 %v7442_v54, %v7441_v4  ;;  %v7514_v17 = vpop.f32.mrf.mxu1 }
 0x436   : > { %v10744_v37 = vadd.f32 %v7513_v30, %v4911_v14  ;;  %v7444_v3 = vpop.f32.mrf.mxu0 }
 0x437   : > { %v7515_v59 = vpop.f32.mrf.mxu1 }
 0x438   : > { %v7445_v6 = vpop.f32.mrf.mxu0  ;;  %v7516_v45 = vadd.f32 %v7515_v59, %v7514_v17  ;;  %v4930_v17 = vadd.f32 %v10669_v5, %v10617_v12 }
 0x439   : > { %v10748_v26 = vadd.f32 %v7445_v6, %v7444_v3  ;;  %v7517_v27 = vpop.f32.mrf.mxu1 }
 0x43a   : > { %v10750_v58 = vadd.f32 %v7516_v45, %v4914_v9  ;;  %v7447_v36 = vpop.f32.mrf.mxu0  ;;  %7954 = vmatmul.mubr.bf16.gmra.mxu0 %v11454_v11  ;;  %v4935_v11 = vadd.f32 %v10679_v61, %v10617_v12 }
 0x43b   : > { %v7518_v23 = vpop.f32.mrf.mxu1 }
 0x43c   : > { %v7448_v10 = vpop.f32.mrf.mxu0  ;;  %v7519_v42 = vadd.f32 %v7518_v23, %v7517_v27 }
 0x43d   : > { %v10755_v21 = vadd.f32 %v7448_v10, %v7447_v36  ;;  %v7520_v24 = vpop.f32.mrf.mxu1 }
 0x43e   : > { %v10757_v60 = vadd.f32 %v7519_v42, %v4919_v50  ;;  %v7450_v28 = vpop.f32.mrf.mxu0 }
 0x43f   : > { %v7521_v40 = vpop.f32.mrf.mxu1 }
 0x440   : > { %v7451_v56 = vpop.f32.mrf.mxu0  ;;  %v7522_v33 = vadd.f32 %v7521_v40, %v7520_v24  ;;  %v4938_v40 = vadd.f32 %v10685_v7, %v10617_v12 }
 0x441   : > { %v10761_v1 = vadd.f32 %v7451_v56, %v7450_v28  ;;  %v7523_v43 = vpop.f32.mrf.mxu1 }
 0x442   : > { %v10763_v48 = vadd.f32 %v7522_v33, %v4922_v18  ;;  %v7581_v22 = vpop.f32.mrf.mxu0 }
 0x443   : > { %v7524_v51 = vpop.f32.mrf.mxu1 }
 0x444   : > { %v7525_v55 = vadd.f32 %v7524_v51, %v7523_v43  ;;  %v7582_v4 = vpop.f32.mrf.mxu0 }
 0x445   : > { %v7583_v32 = vadd.f32 %v7582_v4, %v7581_v22  ;;  %v7526_v13 = vpop.f32.mrf.mxu1 }
 0x446   : > { %v10767_v14 = vadd.f32 %v7525_v55, %v4927_v34  ;;  %v7584_v54 = vpop.f32.mrf.mxu0  ;;  %v4943_v34 = vadd.f32 %v10695_v35, %v10617_v12 }
 0x447   : > { %v10770_v25 = vadd.f32 %v7583_v32, %v10633_v49  ;;  %v7527_v30 = vpop.f32.mrf.mxu1 }
 0x448   : > { %v7528_v3 = vadd.f32 %v7527_v30, %v7526_v13  ;;  %v7585_v59 = vpop.f32.mrf.mxu0 }
 0x449   : > { %v7586_v9 = vadd.f32 %v7585_v59, %v7584_v54  ;;  %v7529_v6 = vpop.f32.mrf.mxu1 }
 0x44a   : > { %v10774_v45 = vadd.f32 %v7528_v3, %v4930_v17  ;;  %v7587_v20 = vpop.f32.mrf.mxu0  ;;  %v4946_v17 = vadd.f32 %v10701_v46, %v10617_v12 }
 0x44b   : > { %v10777_v27 = vadd.f32 %v7586_v9, %v10640_v39  ;;  %v7530_v36 = vpop.f32.mrf.mxu1 }
 0x44c   : > { %v7531_v49 = vadd.f32 %v7530_v36, %v7529_v6  ;;  %v7588_v23 = vpop.f32.mrf.mxu0 }
 0x44d   : > { %v7589_v50 = vadd.f32 %v7588_v23, %v7587_v20  ;;  %v7532_v10 = vpop.f32.mrf.mxu1 }
 0x44e   : > { %v10781_v42 = vadd.f32 %v7531_v49, %v4935_v11  ;;  %v7590_v5 = vpop.f32.mrf.mxu0  ;;  %v4951_v11 = vadd.f32 %v10711_v44, %v10617_v12 }
 0x44f   : > { %v10784_v24 = vadd.f32 %v7589_v50, %v10649_v57  ;;  %v7533_v28 = vpop.f32.mrf.mxu1 }
 0x450   : > { %v7534_v39 = vadd.f32 %v7533_v28, %v7532_v10  ;;  %v7591_v18 = vpop.f32.mrf.mxu0 }
 0x451   : > { %v7592_v56 = vadd.f32 %v7591_v18, %v7590_v5  ;;  %v7535_v33 = vpop.f32.mrf.mxu1 }
 0x452   : > { %v10788_v43 = vadd.f32 %v7534_v39, %v4938_v40  ;;  %v7593_v61 = vpop.f32.mrf.mxu0  ;;  %v4954_v40 = vadd.f32 %v10717_v29, %v10617_v12 }
 0x453   : > { %v10791_v22 = vadd.f32 %v7592_v56, %v10656_v53  ;;  %v7536_v51 = vpop.f32.mrf.mxu1 }
 0x454   : > { %v7537_v57 = vadd.f32 %v7536_v51, %v7535_v33  ;;  %v7594_v55 = vpop.f32.mrf.mxu0 }
 0x455   : > { %v7595_v4 = vadd.f32 %v7594_v55, %v7593_v61  ;;  %v7538_v32 = vpop.f32.mrf.mxu1 }
 0x456   : > { %v10795_v13 = vadd.f32 %v7537_v57, %v4943_v34  ;;  %v7596_v7 = vpop.f32.mrf.mxu0  ;;  %v4959_v34 = vadd.f32 %v10727_v38, %v10617_v12 }
 0x457   : > { %v10798_v54 = vadd.f32 %v7595_v4, %v10665_v8  ;;  %v7539_v30 = vpop.f32.mrf.mxu1 }
 0x458   : > { %v7540_v53 = vadd.f32 %v7539_v30, %v7538_v32  ;;  %v7597_v3 = vpop.f32.mrf.mxu0 }
 0x459   : > { %v7598_v59 = vadd.f32 %v7597_v3, %v7596_v7  ;;  %v7541_v9 = vpop.f32.mrf.mxu1 }
 0x45a   : > { %v10802_v6 = vadd.f32 %v7540_v53, %v4946_v17  ;;  %v7599_v35 = vpop.f32.mrf.mxu0  ;;  %v4962_v17 = vadd.f32 %v10733_v62, %v10617_v12 }
 0x45b   : > { %v10805_v20 = vadd.f32 %v7598_v59, %v10672_v41  ;;  %v7542_v36 = vpop.f32.mrf.mxu1 }
 0x45c   : > { %v7543_v8 = vadd.f32 %v7542_v36, %v7541_v9  ;;  %v7600_v49 = vpop.f32.mrf.mxu0 }
 0x45d   : > { %v7601_v23 = vadd.f32 %v7600_v49, %v7599_v35  ;;  %v7544_v50 = vpop.f32.mrf.mxu1 }
 0x45e   : > { %v10809_v10 = vadd.f32 %v7543_v8, %v4951_v11  ;;  %v7602_v46 = vpop.f32.mrf.mxu0  ;;  %v4967_v11 = vadd.f32 %v10742_v0, %v10617_v12 }
 0x45f   : > { %v10812_v5 = vadd.f32 %v7601_v23, %v10681_v31  ;;  %v7545_v28 = vpop.f32.mrf.mxu1 }
 0x460   : > { %v7546_v41 = vadd.f32 %v7545_v28, %v7544_v50  ;;  %v7603_v39 = vpop.f32.mrf.mxu0 }
 0x461   : > { %v7604_v18 = vadd.f32 %v7603_v39, %v7602_v46  ;;  %v7547_v56 = vpop.f32.mrf.mxu1 }
 0x462   : > { %v10816_v33 = vadd.f32 %v7546_v41, %v4954_v40  ;;  %v7605_v44 = vpop.f32.mrf.mxu0  ;;  %v4970_v40 = vadd.f32 %v10748_v26, %v10617_v12 }
 0x463   : > { %v10819_v61 = vadd.f32 %v7604_v18, %v10688_v47  ;;  %v7548_v51 = vpop.f32.mrf.mxu1 }
 0x464   : > { %v7549_v31 = vadd.f32 %v7548_v51, %v7547_v56  ;;  %v7606_v57 = vpop.f32.mrf.mxu0 }
 0x465   : > { %v7607_v55 = vadd.f32 %v7606_v57, %v7605_v44  ;;  %v7550_v4 = vpop.f32.mrf.mxu1 }
 0x466   : > { %v10823_v32 = vadd.f32 %v7549_v31, %v4959_v34  ;;  %v7608_v29 = vpop.f32.mrf.mxu0  ;;  %v4975_v34 = vadd.f32 %v10755_v21, %v10617_v12 }
 0x467   : > { %v10826_v7 = vadd.f32 %v7607_v55, %v10697_v63  ;;  %v7551_v30 = vpop.f32.mrf.mxu1 }
 0x468   : > { %v7552_v47 = vadd.f32 %v7551_v30, %v7550_v4  ;;  %v7609_v53 = vpop.f32.mrf.mxu0 }
 0x469   : > { %v7610_v3 = vadd.f32 %v7609_v53, %v7608_v29  ;;  %v7553_v59 = vpop.f32.mrf.mxu1 }
 0x46a   : > { %v10830_v9 = vadd.f32 %v7552_v47, %v4962_v17  ;;  %v7611_v38 = vpop.f32.mrf.mxu0  ;;  %v4978_v17 = vadd.f32 %v10761_v1, %v10617_v12 }
 0x46b   : > { %v10833_v35 = vadd.f32 %v7610_v3, %v10704_v16  ;;  %v7554_v36 = vpop.f32.mrf.mxu1 }
 0x46c   : > { %v7555_v63 = vadd.f32 %v7554_v36, %v7553_v59  ;;  %v7612_v8 = vpop.f32.mrf.mxu0 }
 0x46d   : > { %v7613_v49 = vadd.f32 %v7612_v8, %v7611_v38  ;;  %v7556_v23 = vpop.f32.mrf.mxu1 }
 0x46e   : > { %v10837_v50 = vadd.f32 %v7555_v63, %v4967_v11  ;;  %v7614_v62 = vpop.f32.mrf.mxu0 }
 0x46f   : > { %v10840_v46 = vadd.f32 %v7613_v49, %v10713_v19  ;;  %v7557_v28 = vpop.f32.mrf.mxu1 }
 0x470   : > { %v7558_v16 = vadd.f32 %v7557_v28, %v7556_v23  ;;  %v7615_v41 = vpop.f32.mrf.mxu0 }
 0x471   : > { %v7616_v39 = vadd.f32 %v7615_v41, %v7614_v62  ;;  %v7559_v18 = vpop.f32.mrf.mxu1 }
 0x472   : > { %v10844_v56 = vadd.f32 %v7558_v16, %v4970_v40  ;;  %v7617_v0 = vpop.f32.mrf.mxu0 }
 0x473   : > { %v10847_v44 = vadd.f32 %v7616_v39, %v10720_v2  ;;  %v7560_v51 = vpop.f32.mrf.mxu1 }
 0x474   : > { %v7561_v19 = vadd.f32 %v7560_v51, %v7559_v18  ;;  %v7618_v31 = vpop.f32.mrf.mxu0 }
 0x475   : > { %v7619_v57 = vadd.f32 %v7618_v31, %v7617_v0  ;;  %v7562_v55 = vpop.f32.mrf.mxu1 }
 0x476   : > { %v10851_v4 = vadd.f32 %v7561_v19, %v4975_v34  ;;  %v7620_v26 = vpop.f32.mrf.mxu0 }
 0x477   : > { %v10854_v29 = vadd.f32 %v7619_v57, %v10729_v52  ;;  %v7563_v30 = vpop.f32.mrf.mxu1 }
 0x478   : > { %11455 = vst [vmem:[#allocation53_spill] sm:$0xff] %v10851_v4  ;;  %v7564_v2 = vadd.f32 %v7563_v30, %v7562_v55  ;;  %v7621_v47 = vpop.f32.mrf.mxu0 }
 0x479   : > { %v7622_v53 = vadd.f32 %v7621_v47, %v7620_v26  ;;  %v7693_v3 = vpop.f32.mrf.mxu1 }
 0x47a   : > { %v10858_v59 = vadd.f32 %v7564_v2, %v4978_v17  ;;  %v7623_v21 = vpop.f32.mrf.mxu0 }
 0x47b   : > { %v10861_v38 = vadd.f32 %v7622_v53, %v10736_v15  ;;  %v7694_v36 = vpop.f32.mrf.mxu1 }
 0x47c   : > { %11456 = vst [vmem:[#allocation8_spill] sm:$0xff] %v10858_v59  ;;  %v7624_v11 = vpop.f32.mrf.mxu0  ;;  %v7695_v63 = vadd.f32 %v7694_v36, %v7693_v3 }
 0x47d   : > { %v7625_v8 = vadd.f32 %v7624_v11, %v7623_v21  ;;  %v7696_v52 = vpop.f32.mrf.mxu1 }
 0x47e   : > { %v7626_v49 = vpop.f32.mrf.mxu0  ;;  %v10864_v23 = vadd.f32 %v7695_v63, %v10770_v25 }
 0x47f   : > { %v10867_v12 = vadd.f32 %v7625_v8, %v10744_v37  ;;  %v7697_v1 = vpop.f32.mrf.mxu1 }
 0x480   : > { %v7627_v62 = vpop.f32.mrf.mxu0  ;;  %v7698_v28 = vadd.f32 %v7697_v1, %v7696_v52 }
 0x481   : > { %v7628_v40 = vadd.f32 %v7627_v62, %v7626_v49  ;;  %v10869_v16 = vpop.f32.mrf.mxu1 }
 0x482   : > { %v7629_v15 = vpop.f32.mrf.mxu0  ;;  %v10872_v41 = vadd.f32 %v7698_v28, %v10777_v27 }
 0x483   : > { %v10875_v39 = vadd.f32 %v7628_v40, %v10750_v58  ;;  %v10877_v18 = vpop.f32.mrf.mxu1 }
 0x484   : > { %v7630_v25 = vpop.f32.mrf.mxu0 }
 0x485   : > { %v7631_v0 = vadd.f32 %v7630_v25, %v7629_v15  ;;  %v10879_v51 = vpop.f32.mrf.mxu1 }
 0x486   : > { %v7632_v37 = vpop.f32.mrf.mxu0 }
 0x487   : > { %v10882_v34 = vadd.f32 %v7631_v0, %v10757_v60  ;;  %v10884_v19 = vpop.f32.mrf.mxu1 }
 0x488   : > { %v7633_v31 = vpop.f32.mrf.mxu0 }
 0x489   : > { %v7634_v57 = vadd.f32 %v7633_v31, %v7632_v37  ;;  %v10886_v55 = vpop.f32.mrf.mxu1 }
 0x48a   : > { %v7635_v27 = vpop.f32.mrf.mxu0 }
 0x48b   : > { %v10889_v58 = vadd.f32 %v7634_v57, %v10763_v48  ;;  %v10891_v26 = vpop.f32.mrf.mxu1 }
 0x48c   : > { %v7636_v30 = vpop.f32.mrf.mxu0 }
 0x48d   : > { %v7637_v17 = vadd.f32 %v7636_v30, %v7635_v27  ;;  %v10893_v2 = vpop.f32.mrf.mxu1 }
 0x48e   : > { %v7638_v47 = vpop.f32.mrf.mxu0 }
 0x48f   : > { %v10896_v60 = vadd.f32 %v7637_v17, %v10767_v14  ;;  %v10898_v53 = vpop.f32.mrf.mxu1 }
 0x490   : > { %v7639_v3 = vpop.f32.mrf.mxu0 }
 0x491   : > { %v7640_v21 = vadd.f32 %v7639_v3, %v7638_v47  ;;  %v10900_v36 = vpop.f32.mrf.mxu1 }
 0x492   : > { %v7641_v11 = vpop.f32.mrf.mxu0 }
 0x493   : > { %v10903_v48 = vadd.f32 %v7640_v21, %v10774_v45  ;;  %v10905_v63 = vpop.f32.mrf.mxu1 }
 0x494   : > { %v7642_v8 = vpop.f32.mrf.mxu0 }
 0x495   : > { %v7643_v52 = vadd.f32 %v7642_v8, %v7641_v11  ;;  %v10907_v49 = vpop.f32.mrf.mxu1 }
 0x496   : > { %v7644_v1 = vpop.f32.mrf.mxu0 }
 0x497   : > { %v10910_v14 = vadd.f32 %v7643_v52, %v10781_v42  ;;  %v10912_v62 = vpop.f32.mrf.mxu1 }
 0x498   : > { %v7645_v28 = vpop.f32.mrf.mxu0 }
 0x499   : > { %11457 = vst [vmem:[#allocation13_spill] sm:$0xff] %v10910_v14  ;;  %v7646_v40 = vadd.f32 %v7645_v28, %v7644_v1  ;;  %v10914_v15 = vpop.f32.mrf.mxu1 }
 0x49a   : > { %v7647_v25 = vpop.f32.mrf.mxu0 }
 0x49b   : > { %v10917_v45 = vadd.f32 %v7646_v40, %v10788_v43  ;;  %v10919_v0 = vpop.f32.mrf.mxu1 }
 0x49c   : > { %v7648_v37 = vpop.f32.mrf.mxu0 }
 0x49d   : > { %11458 = vst [vmem:[#allocation5_spill] sm:$0xff] %v10917_v45  ;;  %v7649_v31 = vadd.f32 %v7648_v37, %v7647_v25  ;;  %v10921_v57 = vpop.f32.mrf.mxu1 }
 0x49e   : > { %v7650_v27 = vpop.f32.mrf.mxu0 }
 0x49f   : > { %v10924_v42 = vadd.f32 %v7649_v31, %v10795_v13  ;;  %v10926_v30 = vpop.f32.mrf.mxu1 }
 0x4a0   : > { %v7651_v17 = vpop.f32.mrf.mxu0 }
 0x4a1   : > { %v7652_v47 = vadd.f32 %v7651_v17, %v7650_v27  ;;  %v10928_v3 = vpop.f32.mrf.mxu1 }
 0x4a2   : > { %v7653_v21 = vpop.f32.mrf.mxu0 }
 0x4a3   : > { %v10931_v43 = vadd.f32 %v7652_v47, %v10802_v6  ;;  %v10933_v11 = vpop.f32.mrf.mxu1 }
 0x4a4   : > { %v7654_v8 = vpop.f32.mrf.mxu0 }
 0x4a5   : > { %11459 = vst [vmem:[#allocation16_spill] sm:$0xff] %v10931_v43  ;;  %v7655_v52 = vadd.f32 %v7654_v8, %v7653_v21  ;;  %v10935_v1 = vpop.f32.mrf.mxu1 }
 0x4a6   : > { %v7656_v28 = vpop.f32.mrf.mxu0 }
 0x4a7   : > { %v10938_v13 = vadd.f32 %v7655_v52, %v10809_v10  ;;  %v10940_v40 = vpop.f32.mrf.mxu1 }
 0x4a8   : > { %v7657_v25 = vpop.f32.mrf.mxu0 }
 0x4a9   : > { %11460 = vst [vmem:[#allocation57_spill] sm:$0xff] %v10938_v13  ;;  %v7658_v37 = vadd.f32 %v7657_v25, %v7656_v28  ;;  %v10942_v31 = vpop.f32.mrf.mxu1 }
 0x4aa   : > { %v7659_v27 = vpop.f32.mrf.mxu0 }
 0x4ab   : > { %v10945_v6 = vadd.f32 %v7658_v37, %v10816_v33  ;;  %v10947_v17 = vpop.f32.mrf.mxu1 }
 0x4ac   : > { %v7660_v47 = vpop.f32.mrf.mxu0 }
 0x4ad   : > { %11461 = vst [vmem:[#allocation28_spill] sm:$0xff] %v10945_v6  ;;  %v7661_v21 = vadd.f32 %v7660_v47, %v7659_v27  ;;  %v10949_v8 = vpop.f32.mrf.mxu1 }
 0x4ae   : > { %v7662_v59 = vpop.f32.mrf.mxu0 }
 0x4af   : > { %v10952_v10 = vadd.f32 %v7661_v21, %v10823_v32  ;;  %v10954_v52 = vpop.f32.mrf.mxu1 }
 0x4b0   : > { %v7663_v4 = vpop.f32.mrf.mxu0 }
 0x4b1   : > { %11462 = vst [vmem:[#allocation18_spill] sm:$0xff] %v10952_v10  ;;  %v7664_v28 = vadd.f32 %v7663_v4, %v7662_v59  ;;  %v10956_v25 = vpop.f32.mrf.mxu1 }
 0x4b2   : > { %v7665_v13 = vpop.f32.mrf.mxu0 }
 0x4b3   : > { %v10959_v33 = vadd.f32 %v7664_v28, %v10830_v9  ;;  %v10961_v37 = vpop.f32.mrf.mxu1 }
 0x4b4   : > { %v7666_v6 = vpop.f32.mrf.mxu0 }
 0x4b5   : > { %11463 = vst [vmem:[#allocation60_spill] sm:$0xff] %v10959_v33  ;;  %v7667_v27 = vadd.f32 %v7666_v6, %v7665_v13  ;;  %v10963_v47 = vpop.f32.mrf.mxu1 }
 0x4b6   : > { %v7668_v45 = vpop.f32.mrf.mxu0 }
 0x4b7   : > { %v10966_v32 = vadd.f32 %v7667_v27, %v10837_v50  ;;  %v10968_v21 = vpop.f32.mrf.mxu1  ;;  %v7701_v50 = vadd.f32 %v10877_v18, %v10869_v16  ;;  %v7713_v18 = vadd.f32 %v10905_v63, %v10900_v36 }
 0x4b8   : > { %v7669_v10 = vpop.f32.mrf.mxu0 }
 0x4b9   : > { %11464 = vst [vmem:[#allocation30_spill] sm:$0xff] %v10966_v32  ;;  %v7670_v4 = vadd.f32 %v7669_v10, %v7668_v45  ;;  %v10970_v59 = vpop.f32.mrf.mxu1  ;;  %v7704_v32 = vadd.f32 %v10884_v19, %v10879_v51 }
 0x4ba   : > { %v10972_v43 = vpop.f32.mrf.mxu0 }
 0x4bb   : > { %11465 = vst [vmem:[#allocation20_spill] sm:$0xff] %v10972_v43  ;;  %v10975_v9 = vadd.f32 %v7670_v4, %v10844_v56  ;;  %v10977_v28 = vpop.f32.mrf.mxu1  ;;  %v5346_v4 = vadd.f32 %v7701_v50, %v10784_v24 }
 0x4bc   : > { %v10979_v13 = vpop.f32.mrf.mxu0 }
 0x4bd   : > { %11466 = vst [vmem:[#allocation63_spill] sm:$0xff] %v10975_v9  ;;  %11467 = vst [vmem:[#allocation31_spill] sm:$0xff] %v10979_v13  ;;  %v10983_v6 = vpop.f32.mrf.mxu1 }
 0x4be   : > { %v10985_v27 = vpop.f32.mrf.mxu0 }
 0x4bf   : > { %11468 = vst [vmem:[#allocation22_spill] sm:$0xff] %v10985_v27  ;;  %v10987_v45 = vpop.f32.mrf.mxu1 }
 0x4c0   : > { %v10989_v10 = vpop.f32.mrf.mxu0 }
 0x4c1   : > { %11469 = vst [vmem:[#allocation66_spill] sm:$0xff] %v10989_v10  ;;  %v10993_v56 = vpop.f32.mrf.mxu1 }
 0x4c2   : > { %v7927_v9 = vpop.f32.mrf.mxu0 }
 0x4c3   : > { %v5507_v33 = vadd.f32 %v7927_v9, %v5346_v4  ;;  %v10996_v13 = vpop.f32.mrf.mxu1  ;;  %v5349_v9 = vadd.f32 %v7704_v32, %v10791_v22  ;;  %v7707_v4 = vadd.f32 %v10891_v26, %v10886_v55  ;;  %v5362_v55 = vadd.f32 %v7713_v18, %v10812_v5 }
 0x4c4   : > { %v5498_v16 = vpop.f32.mrf.mxu0 }
 0x4c5   : > { %v6367_v51 = vpack.c.bf16 %v5507_v33, %v5507_v33  ;;  %v5499_v19 = vadd.f32 %v5498_v16, %v10864_v23  ;;  %v11008_v24 = vpop.f32.mrf.mxu1  ;;  %v7716_v23 = vadd.f32 %v10912_v62, %v10907_v49  ;;  %v7710_v33 = vadd.f32 %v10898_v53, %v10893_v2 }
 0x4c6   : > { %v7928_v50 = vpop.f32.mrf.mxu0  ;;  %v5354_v49 = vadd.f32 %v7707_v4, %v10798_v54 }
 0x4c7   : > { %5916 = vst.msk [vmem:[%s11003_s30 + $0x8] sm:$0xf] %vm5753_vm1, %v6367_v51  ;;  %v6365_v10 = vpack.c.bf16 %v5499_v19, %v5499_v19  ;;  %v5510_v27 = vadd.f32 %v7928_v50, %v5349_v9  ;;  %v11015_v43 = vpop.f32.mrf.mxu1  ;;  %v5365_v2 = vadd.f32 %v7716_v23, %v10819_v61  ;;  %v7728_v9 = vadd.f32 %v10940_v40, %v10935_v1 }
 0x4c8   : > { %v5501_v14 = vpop.f32.mrf.mxu0  ;;  %v7722_v23 = vadd.f32 %v10926_v30, %v10921_v57 }
 0x4c9   : > { %5914 = vst.msk [vmem:[%s11003_s30] sm:$0xf] %vm5753_vm1, %v6365_v10  ;;  %v6368_v36 = vpack.c.bf16 %v5510_v27, %v5510_v27  ;;  %v5502_v22 = vadd.f32 %v5501_v14, %v10872_v41  ;;  %v11022_v63 = vpop.f32.mrf.mxu1  ;;  %v7725_v41 = vadd.f32 %v10933_v11, %v10928_v3  ;;  %v7719_v10 = vadd.f32 %v10919_v0, %v10914_v15 }
 0x4ca   : > { %v7931_v26 = vpop.f32.mrf.mxu0  ;;  %v5357_v3 = vadd.f32 %v7710_v33, %v10805_v20  ;;  %v5381_v57 = vadd.f32 %v7728_v9, %v10847_v44 }
 0x4cb   : > { %5917 = vst.msk [vmem:[%s11003_s30 + $0xc] sm:$0xf] %vm5753_vm1, %v6368_v36  ;;  %v6366_v32 = vpack.c.bf16 %v5502_v22, %v5502_v22  ;;  %v5523_v16 = vadd.f32 %v7931_v26, %v5362_v55  ;;  %v11029_v51 = vpop.f32.mrf.mxu1  ;;  %v5378_v15 = vadd.f32 %v7725_v41, %v10840_v46  ;;  %v5370_v1 = vadd.f32 %v7719_v10, %v10826_v7 }
 0x4cc   : > { %v5514_v62 = vpop.f32.mrf.mxu0  ;;  %v7737_v55 = vadd.f32 %v10961_v37, %v10956_v25  ;;  %v5373_v25 = vadd.f32 %v7722_v23, %v10833_v35  ;;  %v7749_v10 = vadd.f32 %v10996_v13, %v10993_v56 }
 0x4cd   : > { %5915 = vst.msk [vmem:[%s11003_s30 + $0x4] sm:$0xf] %vm5753_vm1, %v6366_v32  ;;  %v6371_v5 = vpack.c.bf16 %v5523_v16, %v5523_v16  ;;  %v5515_v14 = vadd.f32 %v5514_v62, %v5354_v49  ;;  %v11036_v27 = vpop.f32.mrf.mxu1  ;;  %v7731_v32 = vadd.f32 %v10947_v17, %v10942_v31  ;;  %v7740_v62 = vadd.f32 %v10968_v21, %v10963_v47 }
 0x4ce   : > { %v7932_v53 = vpop.f32.mrf.mxu0  ;;  %v5394_v31 = vadd.f32 %v7737_v55, %v10867_v12 }
 0x4cf   : > { %5920 = vst.msk [vmem:[%s11003_s30 + $0x18] sm:$0xf] %vm5753_vm1, %v6371_v5  ;;  %v6369_v54 = vpack.c.bf16 %v5515_v14, %v5515_v14  ;;  %v5526_v18 = vadd.f32 %v7932_v53, %v5365_v2  ;;  %v11043_v19 = vpop.f32.mrf.mxu1  ;;  %v7734_v14 = vadd.f32 %v10954_v52, %v10949_v8  ;;  %v5386_v47 = vadd.f32 %v7731_v32, %v10854_v29 }
 0x4d0   : > { %v5517_v11 = vpop.f32.mrf.mxu0  ;;  %v5397_v8 = vadd.f32 %v7740_v62, %v10875_v39 }
 0x4d1   : > { %5918 = vst.msk [vmem:[%s11003_s30 + $0x10] sm:$0xf] %vm5753_vm1, %v6369_v54  ;;  %v6372_v61 = vpack.c.bf16 %v5526_v18, %v5526_v18  ;;  %v5518_v50 = vadd.f32 %v5517_v11, %v5357_v3  ;;  %v11050_v4 = vpop.f32.mrf.mxu1  ;;  %v7743_v3 = vadd.f32 %v10977_v28, %v10970_v59  ;;  %v5389_v13 = vadd.f32 %v7734_v14, %v10861_v38 }
 0x4d2   : > { %v7935_v0 = vpop.f32.mrf.mxu0  ;;  %v5410_v59 = vadd.f32 %v7749_v10, %v10896_v60 }
 0x4d3   : > { %5921 = vst.msk [vmem:[%s11003_s30 + $0x1c] sm:$0xf] %vm5753_vm1, %v6372_v61  ;;  %v6370_v20 = vpack.c.bf16 %v5518_v50, %v5518_v50  ;;  %v5539_v36 = vadd.f32 %v7935_v0, %v5378_v15  ;;  %v7760_v22 = vpop.f32.mrf.mxu1  ;;  %v7752_v61 = vadd.f32 %v11015_v43, %v11008_v24  ;;  %v7746_v0 = vadd.f32 %v10987_v45, %v10983_v6 }
 0x4d4   : > { %v5530_v40 = vpop.f32.mrf.mxu0  ;;  %v7761_v24 = vadd.f32 %v7760_v22, %v11050_v4  ;;  %v7755_v6 = vadd.f32 %v11029_v51, %v11022_v63  ;;  %v7758_v63 = vadd.f32 %v11043_v19, %v11036_v27 }
 0x4d5   : > { %5919 = vst.msk [vmem:[%s11003_s30 + $0x14] sm:$0xf] %vm5753_vm1, %v6370_v20  ;;  %v6375_v46 = vpack.c.bf16 %v5539_v36, %v5539_v36  ;;  %v5531_v26 = vadd.f32 %v5530_v40, %v5370_v1  ;;  %v11062_v33 = vpop.f32.mrf.mxu1  ;;  %v5402_v36 = vadd.f32 %v7743_v3, %v10882_v34  ;;  %v5413_v55 = vadd.f32 %v7752_v61, %v10903_v48  ;;  %v11473_v3 = vld [vmem:[#allocation18_spill] sm:$0xff] }
 0x4d6   : > { %v7936_v30 = vpop.f32.mrf.mxu0 }
 0x4d7   : > { %5924 = vst.msk [vmem:[%s11003_s30 + $0x28] sm:$0xf] %vm5753_vm1, %v6375_v46  ;;  %v6373_v7 = vpack.c.bf16 %v5531_v26, %v5531_v26  ;;  %v5542_v16 = vadd.f32 %v7936_v30, %v5381_v57  ;;  %v7763_v49 = vpop.f32.mrf.mxu1  ;;  %v5405_v57 = vadd.f32 %v7746_v0, %v10889_v58 }
 0x4d8   : > { %v5533_v37 = vpop.f32.mrf.mxu0  ;;  %v7764_v22 = vadd.f32 %v7763_v49, %v11062_v33 }
 0x4d9   : > { %5922 = vst.msk [vmem:[%s11003_s30 + $0x20] sm:$0xf] %vm5753_vm1, %v6373_v7  ;;  %v6376_v44 = vpack.c.bf16 %v5542_v16, %v5542_v16  ;;  %v5534_v41 = vadd.f32 %v5533_v37, %v5373_v25  ;;  %v11074_v5 = vpop.f32.mrf.mxu1  ;;  %v5426_v7 = vadd.f32 %v7761_v24, %v10924_v42  ;;  %v11470_v37 = vld [vmem:[#allocation13_spill] sm:$0xff] }
 0x4da   : > { %v7939_v17 = vpop.f32.mrf.mxu0  ;;  %v5418_v62 = vadd.f32 %v7755_v6, %v11470_v37  ;;  %v11478_v24 = vld [vmem:[#allocation53_spill] sm:$0xff] }
 0x4db   : > { %5925 = vst.msk [vmem:[%s11003_s30 + $0x2c] sm:$0xf] %vm5753_vm1, %v6376_v44  ;;  %v6374_v35 = vpack.c.bf16 %v5534_v41, %v5534_v41  ;;  %v5555_v2 = vadd.f32 %v7939_v17, %v5394_v31  ;;  %v11081_v53 = vpop.f32.mrf.mxu1  ;;  %v11471_v31 = vld [vmem:[#allocation16_spill] sm:$0xff] }
 0x4dc   : > { %v5546_v21 = vpop.f32.mrf.mxu0  ;;  %v5429_v17 = vadd.f32 %v7764_v22, %v11471_v31  ;;  %v7767_v27 = vadd.f32 %v11081_v53, %v11074_v5  ;;  %v11475_v5 = vld [vmem:[#allocation31_spill] sm:$0xff] }
 0x4dd   : > { %5923 = vst.msk [vmem:[%s11003_s30 + $0x24] sm:$0xf] %vm5753_vm1, %v6374_v35  ;;  %v6379_v12 = vpack.c.bf16 %v5555_v2, %v5555_v2  ;;  %v5547_v54 = vadd.f32 %v5546_v21, %v5386_v47  ;;  %v11088_v18 = vpop.f32.mrf.mxu1  ;;  %v11472_v47 = vld [vmem:[#allocation5_spill] sm:$0xff] }
 0x4de   : > { %v7940_v52 = vpop.f32.mrf.mxu0  ;;  %v5421_v21 = vadd.f32 %v7758_v63, %v11472_v47 }
 0x4df   : > { %5928 = vst.msk [vmem:[%s11003_s30 + $0x38] sm:$0xf] %vm5753_vm1, %v6379_v12  ;;  %v6377_v29 = vpack.c.bf16 %v5547_v54, %v5547_v54  ;;  %v5558_v11 = vadd.f32 %v7940_v52, %v5397_v8  ;;  %v11095_v9 = vpop.f32.mrf.mxu1 }
 0x4e0   : > { %v5549_v56 = vpop.f32.mrf.mxu0 }
 0x4e1   : > { %5926 = vst.msk [vmem:[%s11003_s30 + $0x30] sm:$0xf] %vm5753_vm1, %v6377_v29  ;;  %v6380_v39 = vpack.c.bf16 %v5558_v11, %v5558_v11  ;;  %v5550_v50 = vadd.f32 %v5549_v56, %v5389_v13  ;;  %v7771_v15 = vpop.f32.mrf.mxu1  ;;  %v11474_v11 = vld [vmem:[#allocation20_spill] sm:$0xff]  ;;  %v7770_v56 = vadd.f32 %v11095_v9, %v11088_v18  ;;  %v11479_v9 = vld [vmem:[#allocation22_spill] sm:$0xff] }
 0x4e2   : > { %v7943_v28 = vpop.f32.mrf.mxu0  ;;  %v7673_v53 = vadd.f32 %v11475_v5, %v11474_v11 }
 0x4e3   : > { %5929 = vst.msk [vmem:[%s11003_s30 + $0x3c] sm:$0xf] %vm5753_vm1, %v6380_v39  ;;  %v6378_v38 = vpack.c.bf16 %v5550_v50, %v5550_v50  ;;  %v5571_v23 = vadd.f32 %v7943_v28, %v5410_v59  ;;  %v7772_v20 = vpop.f32.mrf.mxu1 }
 0x4e4   : > { %v5562_v43 = vpop.f32.mrf.mxu0  ;;  %v7773_v49 = vadd.f32 %v7772_v20, %v7771_v15  ;;  %v11476_v15 = vld [vmem:[#allocation57_spill] sm:$0xff]  ;;  %v5297_v18 = vadd.f32 %v7673_v53, %v11478_v24 }
 0x4e5   : > { %5927 = vst.msk [vmem:[%s11003_s30 + $0x34] sm:$0xf] %vm5753_vm1, %v6378_v38  ;;  %v6383_v1 = vpack.c.bf16 %v5571_v23, %v5571_v23  ;;  %v5563_v60 = vadd.f32 %v5562_v43, %v5402_v36  ;;  %v7774_v40 = vpop.f32.mrf.mxu1  ;;  %v5434_v59 = vadd.f32 %v7767_v27, %v11476_v15  ;;  %v11477_v36 = vld [vmem:[#allocation60_spill] sm:$0xff] }
 0x4e6   : > { %v7944_v46 = vpop.f32.mrf.mxu0  ;;  %v5442_v29 = vadd.f32 %v7773_v49, %v11473_v3 }
 0x4e7   : > { %5932 = vst.msk [vmem:[%s11003_s30 + $0x48] sm:$0xf] %vm5753_vm1, %v6383_v1  ;;  %v6381_v45 = vpack.c.bf16 %v5563_v60, %v5563_v60  ;;  %v5574_v34 = vadd.f32 %v7944_v46, %v5413_v55  ;;  %v7775_v26 = vpop.f32.mrf.mxu1  ;;  %v11480_v1 = vld [vmem:[#allocation66_spill] sm:$0xff] }
 0x4e8   : > { %v5565_v4 = vpop.f32.mrf.mxu0  ;;  %v7776_v12 = vadd.f32 %v7775_v26, %v7774_v40  ;;  %v7676_v60 = vadd.f32 %v11480_v1, %v11479_v9 }
 0x4e9   : > { %5930 = vst.msk [vmem:[%s11003_s30 + $0x40] sm:$0xf] %vm5753_vm1, %v6381_v45  ;;  %v6384_v30 = vpack.c.bf16 %v5574_v34, %v5574_v34  ;;  %v5566_v48 = vadd.f32 %v5565_v4, %v5405_v57  ;;  %v7777_v32 = vpop.f32.mrf.mxu1  ;;  %v11481_v34 = vld [vmem:[#allocation28_spill] sm:$0xff] }
 0x4ea   : > { %v7947_v16 = vpop.f32.mrf.mxu0  ;;  %v5445_v43 = vadd.f32 %v7776_v12, %v11477_v36  ;;  %v5437_v26 = vadd.f32 %v7770_v56, %v11481_v34 }
 0x4eb   : > { %5933 = vst.msk [vmem:[%s11003_s30 + $0x4c] sm:$0xf] %vm5753_vm1, %v6384_v30  ;;  %v6382_v51 = vpack.c.bf16 %v5566_v48, %v5566_v48  ;;  %v5587_v58 = vadd.f32 %v7947_v16, %v5426_v7  ;;  %v7778_v25 = vpop.f32.mrf.mxu1  ;;  %v11482_v7 = vld [vmem:[#allocation8_spill] sm:$0xff] }
 0x4ec   : > { %v5578_v33 = vpop.f32.mrf.mxu0  ;;  %v7779_v55 = vadd.f32 %v7778_v25, %v7777_v32  ;;  %v5300_v16 = vadd.f32 %v7676_v60, %v11482_v7  ;;  %v11483_v25 = vld [vmem:[#allocation30_spill] sm:$0xff] }
 0x4ed   : > { %5931 = vst.msk [vmem:[%s11003_s30 + $0x44] sm:$0xf] %vm5753_vm1, %v6382_v51  ;;  %v6387_v44 = vpack.c.bf16 %v5587_v58, %v5587_v58  ;;  %v5579_v41 = vadd.f32 %v5578_v33, %v5418_v62  ;;  %v7780_v42 = vpop.f32.mrf.mxu1 }
 0x4ee   : > { %v7948_v14 = vpop.f32.mrf.mxu0  ;;  %v5450_v37 = vadd.f32 %v7779_v55, %v11483_v25 }
 0x4ef   : > { %5936 = vst.msk [vmem:[%s11003_s30 + $0x58] sm:$0xf] %vm5753_vm1, %v6387_v44  ;;  %v6385_v19 = vpack.c.bf16 %v5579_v41, %v5579_v41  ;;  %v5590_v35 = vadd.f32 %v7948_v14, %v5429_v17  ;;  %v7781_v2 = vpop.f32.mrf.mxu1  ;;  %v11484_v17 = vld [vmem:[#allocation63_spill] sm:$0xff] }
 0x4f0   : > { %v5581_v10 = vpop.f32.mrf.mxu0  ;;  %v7782_v32 = vadd.f32 %v7781_v2, %v7780_v42 }
 0x4f1   : > { %5934 = vst.msk [vmem:[%s11003_s30 + $0x50] sm:$0xf] %vm5753_vm1, %v6385_v19  ;;  %v6388_v54 = vpack.c.bf16 %v5590_v35, %v5590_v35  ;;  %v5582_v8 = vadd.f32 %v5581_v10, %v5421_v21  ;;  %v7783_v52 = vpop.f32.mrf.mxu1 }
 0x4f2   : > { %v7951_v13 = vpop.f32.mrf.mxu0  ;;  %v5453_v14 = vadd.f32 %v7782_v32, %v11484_v17 }
 0x4f3   : > { %5937 = vst.msk [vmem:[%s11003_s30 + $0x5c] sm:$0xf] %vm5753_vm1, %v6388_v54  ;;  %v6386_v61 = vpack.c.bf16 %v5582_v8, %v5582_v8  ;;  %v5603_v39 = vadd.f32 %v7951_v13, %v5442_v29  ;;  %v7784_v50 = vpop.f32.mrf.mxu1 }
 0x4f4   : > { %v5594_v28 = vpop.f32.mrf.mxu0  ;;  %v7785_v38 = vadd.f32 %v7784_v50, %v7783_v52 }
 0x4f5   : > { %5935 = vst.msk [vmem:[%s11003_s30 + $0x54] sm:$0xf] %vm5753_vm1, %v6386_v61  ;;  %v6391_v0 = vpack.c.bf16 %v5603_v39, %v5603_v39  ;;  %v5595_v23 = vadd.f32 %v5594_v28, %v5434_v59  ;;  %v7786_v20 = vpop.f32.mrf.mxu1 }
 0x4f6   : > { %v7952_v40 = vpop.f32.mrf.mxu0  ;;  %v5458_v48 = vadd.f32 %v7785_v38, %v5297_v18 }
 0x4f7   : > { %5940 = vst.msk [vmem:[%s11003_s30 + $0x68] sm:$0xf] %vm5753_vm1, %v6391_v0  ;;  %v6389_v46 = vpack.c.bf16 %v5595_v23, %v5595_v23  ;;  %v5606_v6 = vadd.f32 %v7952_v40, %v5445_v43  ;;  %v7787_v45 = vpop.f32.mrf.mxu1 }
 0x4f8   : > { %v5597_v57 = vpop.f32.mrf.mxu0  ;;  %v7788_v22 = vadd.f32 %v7787_v45, %v7786_v20 }
 0x4f9   : > { %5938 = vst.msk [vmem:[%s11003_s30 + $0x60] sm:$0xf] %vm5753_vm1, %v6389_v46  ;;  %v6392_v4 = vpack.c.bf16 %v5606_v6, %v5606_v6  ;;  %v5598_v30 = vadd.f32 %v5597_v57, %v5437_v26 }
 0x4fa   : > { %v7955_v63 = vpop.f32.mrf.mxu0  ;;  %v5461_v44 = vadd.f32 %v7788_v22, %v5300_v16 }
 0x4fb   : > { %5941 = vst.msk [vmem:[%s11003_s30 + $0x6c] sm:$0xf] %vm5753_vm1, %v6392_v4  ;;  %v6390_v51 = vpack.c.bf16 %v5598_v30, %v5598_v30  ;;  %v5619_v58 = vadd.f32 %v7955_v63, %v5458_v48 }
 0x4fc   : > { %v5610_v62 = vpop.f32.mrf.mxu0 }
 0x4fd   : > { %5939 = vst.msk [vmem:[%s11003_s30 + $0x64] sm:$0xf] %vm5753_vm1, %v6390_v51  ;;  %v6395_v33 = vpack.c.bf16 %v5619_v58, %v5619_v58  ;;  %v5611_v49 = vadd.f32 %v5610_v62, %v5450_v37 }
 0x4fe   : > { %v7956_v41 = vpop.f32.mrf.mxu0 }
 0x4ff   : > { %5944 = vst.msk [vmem:[%s11003_s30 + $0x78] sm:$0xf] %vm5753_vm1, %v6395_v33  ;;  %v6393_v31 = vpack.c.bf16 %v5611_v49, %v5611_v49  ;;  %v5622_v42 = vadd.f32 %v7956_v41, %v5461_v44 }
 0x500   : > { %v5613_v27 = vpop.f32.mrf.mxu0 }
 0x501   : > { %5942 = vst.msk [vmem:[%s11003_s30 + $0x70] sm:$0xf] %vm5753_vm1, %v6393_v31  ;;  %v6396_v19 = vpack.c.bf16 %v5622_v42, %v5622_v42  ;;  %v5614_v35 = vadd.f32 %v5613_v27, %v5453_v14 }
 0x503   : > { %5945 = vst.msk [vmem:[%s11003_s30 + $0x7c] sm:$0xf] %vm5753_vm1, %v6396_v19  ;;  %v6394_v2 = vpack.c.bf16 %v5614_v35, %v5614_v35 }
 0x505   : > { %5943 = vst.msk [vmem:[%s11003_s30 + $0x74] sm:$0xf] %vm5753_vm1, %v6394_v2 }
 0x506 PF: > { %s19_s27 = sadd.s32 1, %s8206_s27  }
 0x507   : > { %p16_p4 = scmp.ge.s32.totalorder %s19_s27, 4  }
 0x509   :  { %18 = sbr.rel (!%p16_p4) target bundleno = 1 (0x1), region = 94 }

</bundles_post_ra>
